<compile_context>
chip_gen: v6e
topology: v6e:2x2x1
jax: 0.10.0
libtpu: 0.0.40
codegen_flags: <defaults>
</compile_context>

<pallas_src>
import numpy as np

import jax
import jax.numpy as jnp
from jax import lax
from jax.experimental import pallas as pl
from jax.experimental.pallas import tpu as pltpu


# LeNet5 geometry (fixed by the architecture: 1x32x32 inputs).
_H0, _W0, _C0 = 32, 32, 1      # input
_H1, _W1, _C1 = 28, 28, 6      # after conv1 (5x5, stride 1)
_H2, _W2, _C2 = 10, 10, 16     # after pool1+conv2 (effective 10x10, stride 2)
_H3, _W3, _C3 = 1, 1, 120      # after pool2+conv3 (effective 10x10, stride 2)
_FC1 = 84


# ------------------------------ fused kernel -------------------------------


def _lenet5_kernel(x_ref,
                   s1_ref, w1_ref, b1_ref,
                   s2_ref, w2_ref, b2_ref,
                   s3_ref, w3_ref, b3_ref,
                   fc1w_ref, fc1b_ref, fc2w_ref, fc2b_ref,
                   logits_ref, probs_ref):
    """Whole LeNet5 forward for one sample (grid axis = batch)."""
    f32, bf16 = jnp.float32, jnp.bfloat16

    def conv_block(act_bf16, s_ref, w_ref, b_ref):
        # out = tanh( sum_p (S_p @ A) @ B_p + bias_row ), fp32 accumulation.
        acc = None
        for p in range(s_ref.shape[0]):
            rows = jnp.dot(s_ref[p], act_bf16,                 # exact row gather
                           preferred_element_type=f32).astype(bf16)
            tap = jnp.dot(rows, w_ref[p], preferred_element_type=f32)
            acc = tap if acc is None else acc + tap
        return jnp.tanh(acc + b_ref[...])

    a0 = x_ref[0].astype(bf16)                                  # (32, 32)
    a1 = conv_block(a0, s1_ref, w1_ref, b1_ref)                 # (28, 168)
    a2 = conv_block(a1.astype(bf16), s2_ref, w2_ref, b2_ref)    # (10, 160)
    a3 = conv_block(a2.astype(bf16), s3_ref, w3_ref, b3_ref)    # (1, 120) == flatten

    h = jnp.tanh(jnp.dot(a3.astype(bf16), fc1w_ref[...],
                         preferred_element_type=f32) + fc1b_ref[...])    # (1, 84)
    logits = jnp.dot(h.astype(bf16), fc2w_ref[...],
                     preferred_element_type=f32) + fc2b_ref[...]         # (1, NC)
    logits_ref[0] = logits

    m = jnp.max(logits, axis=1, keepdims=True)
    e = jnp.exp(logits - m)
    probs_ref[0] = e * pl.reciprocal(jnp.sum(e, axis=1, keepdims=True))


# ----------------- host-side constant-operator construction ----------------


def _selection_ops(kh, out_h, in_h, stride):
    """S[p, r, stride*r + p] = 1  (vertical tap offset + stride)."""
    s = np.zeros((kh, out_h, in_h), np.float32)
    for p in range(kh):
        for r in range(out_h):
            s[p, r, stride * r + p] = 1.0
    return s


def _banded_ops(w_eff, in_w, out_w, stride):
    """Block-Toeplitz matrices realizing horizontal im2col + channel contraction.

    w_eff: (kh, kw, cin, cout)  ->  (kh, in_w*cin, out_w*cout)
    """
    kh, kw, cin, cout = w_eff.shape
    wb = np.zeros((kh, in_w * cin, out_w * cout), np.float32)
    for p in range(kh):
        for ow in range(out_w):
            for q in range(kw):
                col = stride * ow + q
                wb[p, col * cin:(col + 1) * cin,
                   ow * cout:(ow + 1) * cout] = w_eff[p, q]
    return wb


def _fold_pool_into_conv(w_oihw):
    """AvgPool2d(2) followed by this 5x5 conv == stride-2 conv with an
    effective 10x10 kernel w_eff[p, q] = 0.25 * w[p // 2, q // 2]."""
    w = np.transpose(np.asarray(w_oihw, np.float32), (2, 3, 1, 0))  # (kh,kw,ic,oc)
    return np.repeat(np.repeat(w, 2, axis=0), 2, axis=1) * 0.25


def build_operator_params(tp):
    """Turn PyTorch-layout LeNet5 params into the fused kernel's operands."""
    f32, bf16 = jnp.float32, jnp.bfloat16
    w1 = np.transpose(np.asarray(tp["w1"], np.float32), (2, 3, 1, 0))  # (5,5,1,6)
    w2e = _fold_pool_into_conv(tp["w2"])                               # (10,10,6,16)
    w3e = _fold_pool_into_conv(tp["w3"])                               # (10,10,16,120)

    return {
        "s1": jnp.asarray(_selection_ops(5, _H1, _H0, 1), bf16),
        "w1": jnp.asarray(_banded_ops(w1, _W0, _W1, 1), bf16),
        "b1": jnp.asarray(np.tile(np.asarray(tp["b1"], np.float32), _W1)[None, :], f32),
        "s2": jnp.asarray(_selection_ops(10, _H2, _H1, 2), bf16),
        "w2": jnp.asarray(_banded_ops(w2e, _W1, _W2, 2), bf16),
        "b2": jnp.asarray(np.tile(np.asarray(tp["b2"], np.float32), _W2)[None, :], f32),
        "s3": jnp.asarray(_selection_ops(10, _H3, _H2, 2), bf16),
        "w3": jnp.asarray(_banded_ops(w3e, _W2, _W3, 2), bf16),
        "b3": jnp.asarray(np.tile(np.asarray(tp["b3"], np.float32), _W3)[None, :], f32),
        "fc1_w": jnp.asarray(np.asarray(tp["fc1_w"], np.float32).T, bf16),
        "fc1_b": jnp.asarray(np.asarray(tp["fc1_b"], np.float32)[None, :], f32),
        "fc2_w": jnp.asarray(np.asarray(tp["fc2_w"], np.float32).T, bf16),
        "fc2_b": jnp.asarray(np.asarray(tp["fc2_b"], np.float32)[None, :], f32),
    }


# --------------------------------- forward ---------------------------------


def lenet5_forward(ops, x_nchw):
    """x_nchw: (B, 1, 32, 32) float32. Returns (logits, probs)."""
    B, C, H, W = x_nchw.shape
    assert (C, H, W) == (_C0, _H0, _W0), "LeNet5 expects (B, 1, 32, 32) inputs"
    n_classes = ops["fc2_b"].shape[-1]
    x = x_nchw.reshape(B, _H0, _W0)

    def const_spec(a):
        zeros = (0,) * len(a.shape)
        return pl.BlockSpec(a.shape, lambda b: zeros)

    in_specs = [
        pl.BlockSpec((1, _H0, _W0), lambda b: (b, 0, 0)),
        const_spec(ops["s1"]), const_spec(ops["w1"]), const_spec(ops["b1"]),
        const_spec(ops["s2"]), const_spec(ops["w2"]), const_spec(ops["b2"]),
        const_spec(ops["s3"]), const_spec(ops["w3"]), const_spec(ops["b3"]),
        const_spec(ops["fc1_w"]), const_spec(ops["fc1_b"]),
        const_spec(ops["fc2_w"]), const_spec(ops["fc2_b"]),
    ]
    out_spec = pl.BlockSpec((1, 1, n_classes), lambda b: (b, 0, 0))
    out_shape = (jax.ShapeDtypeStruct((B, 1, n_classes), jnp.float32),
                 jax.ShapeDtypeStruct((B, 1, n_classes), jnp.float32))

    # Advisory cost hint for the XLA scheduler.
    macs = B * (5 * (_H1 * _H0 * _W0 + _H1 * _W0 * _W1 * _C1)
                + 10 * (_H2 * _H1 * _W1 * _C1 + _H2 * _W1 * _C1 * _W2 * _C2)
                + 10 * (_H3 * _H2 * _W2 * _C2 + _H3 * _W2 * _C2 * _W3 * _C3)
                + _C3 * _FC1 + _FC1 * n_classes)
    trans = B * (_H1 * _W1 * _C1 + _H2 * _W2 * _C2 + _C3 + _FC1 + n_classes)
    nbytes = (x.size * x.dtype.itemsize
              + sum(a.size * a.dtype.itemsize for a in ops.values())
              + 2 * B * n_classes * 4)

    fwd = pl.pallas_call(
        _lenet5_kernel,
        out_shape=out_shape,
        grid=(B,),
        in_specs=in_specs,
        out_specs=(out_spec, out_spec),
        compiler_params=pltpu.CompilerParams(
            dimension_semantics=("parallel",)),
        cost_estimate=pl.CostEstimate(flops=2 * macs, transcendentals=trans,
                                      bytes_accessed=nbytes),
    )
    logits3, probs3 = fwd(x,
                          ops["s1"], ops["w1"], ops["b1"],
                          ops["s2"], ops["w2"], ops["b2"],
                          ops["s3"], ops["w3"], ops["b3"],
                          ops["fc1_w"], ops["fc1_b"],
                          ops["fc2_w"], ops["fc2_b"])
    return logits3.reshape(B, n_classes), probs3.reshape(B, n_classes)


# ------------------------- params / pure-JAX reference ---------------------


def init_torch_params(key, n_classes):
    """Random params in PyTorch layout: conv (OC, IC, KH, KW), linear (out, in)."""
    ks = jax.random.split(key, 10)

    def u(k, shape, fan_in):
        bound = 1.0 / float(np.sqrt(fan_in))
        return jax.random.uniform(k, shape, jnp.float32, -bound, bound)

    return {
        "w1": u(ks[0], (6, 1, 5, 5), 25), "b1": u(ks[1], (6,), 25),
        "w2": u(ks[2], (16, 6, 5, 5), 150), "b2": u(ks[3], (16,), 150),
        "w3": u(ks[4], (120, 16, 5, 5), 400), "b3": u(ks[5], (120,), 400),
        "fc1_w": u(ks[6], (84, 120), 120), "fc1_b": u(ks[7], (84,), 120),
        "fc2_w": u(ks[8], (n_classes, 84), 84), "fc2_b": u(ks[9], (n_classes,), 84),
    }


def lenet5_reference(tp, x):
    """Pure-JAX/XLA reference that mirrors the PyTorch module exactly."""
    def conv(a, w, b):
        y = lax.conv_general_dilated(a, w, (1, 1), "VALID",
                                     dimension_numbers=("NCHW", "OIHW", "NCHW"))
        return y + b.reshape(1, -1, 1, 1)

    def pool(a):
        B, C, H, W = a.shape
        return a.reshape(B, C, H // 2, 2, W // 2, 2).mean(axis=(3, 5))

    a = jnp.tanh(conv(x, tp["w1"], tp["b1"]))
    a = pool(a)
    a = jnp.tanh(conv(a, tp["w2"], tp["b2"]))
    a = pool(a)
    a = jnp.tanh(conv(a, tp["w3"], tp["b3"]))
    f = a.reshape(a.shape[0], -1)
    h = jnp.tanh(f @ tp["fc1_w"].T + tp["fc1_b"])
    logits = h @ tp["fc2_w"].T + tp["fc2_b"]
    return logits, jax.nn.softmax(logits, axis=1)


if __name__ == "__main__":
    n_classes = 10
    batch = 2
    key = jax.random.PRNGKey(0)
    k_params, k_x = jax.random.split(key)

    torch_params = init_torch_params(k_params, n_classes)
    ops = build_operator_params(torch_params)
    # LeNet5's 120-dim flatten requires 32x32 single-channel inputs.
    x = jax.random.normal(k_x, (batch, 1, 32, 32), jnp.float32)

    forward = jax.jit(lenet5_forward)
    logits, probs = forward(ops, x)
    jax.block_until_ready((logits, probs))

    assert logits.shape == (batch, n_classes)
    assert probs.shape == (batch, n_classes)
    assert jnp.allclose(jnp.sum(probs, axis=1), 1.0, atol=1e-4)

    # Compare against a pure-JAX reference of the PyTorch module (loose
    # tolerance: the kernel feeds the MXU bf16 operands with fp32 accumulation).
    ref_logits, ref_probs = lenet5_reference(torch_params, x)
    assert float(jnp.max(jnp.abs(logits - ref_logits))) < 1e-1
    assert float(jnp.max(jnp.abs(probs - ref_probs))) < 5e-2

    print("KERNEL_OK")
</pallas_src>

<mosaic_0001>
module attributes {stable_mosaic.version = 11 : i64} {
  func.func @_lenet5_kernel(%arg0: i32, %arg1: memref<1x32x32xf32, #tpu.memory_space<vmem>>, %arg2: memref<5x28x32xbf16, #tpu.memory_space<vmem>>, %arg3: memref<5x32x168xbf16, #tpu.memory_space<vmem>>, %arg4: memref<1x168xf32, #tpu.memory_space<vmem>>, %arg5: memref<10x10x28xbf16, #tpu.memory_space<vmem>>, %arg6: memref<10x168x160xbf16, #tpu.memory_space<vmem>>, %arg7: memref<1x160xf32, #tpu.memory_space<vmem>>, %arg8: memref<10x1x10xbf16, #tpu.memory_space<vmem>>, %arg9: memref<10x160x120xbf16, #tpu.memory_space<vmem>>, %arg10: memref<1x120xf32, #tpu.memory_space<vmem>>, %arg11: memref<120x84xbf16, #tpu.memory_space<vmem>>, %arg12: memref<1x84xf32, #tpu.memory_space<vmem>>, %arg13: memref<84x10xbf16, #tpu.memory_space<vmem>>, %arg14: memref<1x10xf32, #tpu.memory_space<vmem>>, %arg15: memref<1x1x10xf32, #tpu.memory_space<vmem>>, %arg16: memref<1x1x10xf32, #tpu.memory_space<vmem>>) attributes {dimension_semantics = [#tpu.dimension_semantics<parallel>], iteration_bounds = array<i64: 2>, scalar_prefetch = 0 : i64, scratch_operands = 0 : i64, tpu.core_type = #tpu.core_type<tc>, window_params = [{transform_indices = @transform_0, window_bounds = array<i64: 1, 32, 32>}, {pipeline_mode = #tpu.pipeline_mode<synchronous>, transform_indices = @transform_1, window_bounds = array<i64: 5, 28, 32>}, {pipeline_mode = #tpu.pipeline_mode<synchronous>, transform_indices = @transform_2, window_bounds = array<i64: 5, 32, 168>}, {pipeline_mode = #tpu.pipeline_mode<synchronous>, transform_indices = @transform_3, window_bounds = array<i64: 1, 168>}, {pipeline_mode = #tpu.pipeline_mode<synchronous>, transform_indices = @transform_4, window_bounds = array<i64: 10, 10, 28>}, {pipeline_mode = #tpu.pipeline_mode<synchronous>, transform_indices = @transform_5, window_bounds = array<i64: 10, 168, 160>}, {pipeline_mode = #tpu.pipeline_mode<synchronous>, transform_indices = @transform_6, window_bounds = array<i64: 1, 160>}, {pipeline_mode = #tpu.pipeline_mode<synchronous>, transform_indices = @transform_7, window_bounds = array<i64: 10, 1, 10>}, {pipeline_mode = #tpu.pipeline_mode<synchronous>, transform_indices = @transform_8, window_bounds = array<i64: 10, 160, 120>}, {pipeline_mode = #tpu.pipeline_mode<synchronous>, transform_indices = @transform_9, window_bounds = array<i64: 1, 120>}, {pipeline_mode = #tpu.pipeline_mode<synchronous>, transform_indices = @transform_10, window_bounds = array<i64: 120, 84>}, {pipeline_mode = #tpu.pipeline_mode<synchronous>, transform_indices = @transform_11, window_bounds = array<i64: 1, 84>}, {pipeline_mode = #tpu.pipeline_mode<synchronous>, transform_indices = @transform_12, window_bounds = array<i64: 84, 10>}, {pipeline_mode = #tpu.pipeline_mode<synchronous>, transform_indices = @transform_13, window_bounds = array<i64: 1, 10>}, {transform_indices = @transform_14, window_bounds = array<i64: 1, 1, 10>}, {transform_indices = @transform_15, window_bounds = array<i64: 1, 1, 10>}]} {
    %c0 = arith.constant 0 : index
    %c0_0 = arith.constant 0 : index
    %c0_1 = arith.constant 0 : index
    %0 = vector.load %arg1[%c0, %c0_0, %c0_1] : memref<1x32x32xf32, #tpu.memory_space<vmem>>, vector<1x32x32xf32>
    %1 = vector.shape_cast %0 : vector<1x32x32xf32> to vector<32x32xf32>
    %2 = arith.truncf %1 : vector<32x32xf32> to vector<32x32xbf16>
    %c0_2 = arith.constant 0 : index
    %c0_3 = arith.constant 0 : index
    %c0_4 = arith.constant 0 : index
    %3 = vector.load %arg2[%c0_2, %c0_3, %c0_4] : memref<5x28x32xbf16, #tpu.memory_space<vmem>>, vector<1x28x32xbf16>
    %4 = vector.shape_cast %3 : vector<1x28x32xbf16> to vector<28x32xbf16>
    %cst = arith.constant dense<0.000000e+00> : vector<28x32xf32>
    %5 = tpu.matmul %4, %2, %cst {dimension_numbers = #tpu.dot_dimension_numbers<[1], [0], [0], [1], [0, 0, 1, 1], [], []>} : vector<28x32xbf16>, vector<32x32xbf16>, vector<28x32xf32> -> vector<28x32xf32>
    %6 = arith.truncf %5 : vector<28x32xf32> to vector<28x32xbf16>
    %c0_5 = arith.constant 0 : index
    %c0_6 = arith.constant 0 : index
    %c0_7 = arith.constant 0 : index
    %7 = vector.load %arg3[%c0_5, %c0_6, %c0_7] : memref<5x32x168xbf16, #tpu.memory_space<vmem>>, vector<1x32x168xbf16>
    %8 = vector.shape_cast %7 : vector<1x32x168xbf16> to vector<32x168xbf16>
    %cst_8 = arith.constant dense<0.000000e+00> : vector<28x168xf32>
    %9 = tpu.matmul %6, %8, %cst_8 {dimension_numbers = #tpu.dot_dimension_numbers<[1], [0], [0], [1], [0, 0, 1, 1], [], []>} : vector<28x32xbf16>, vector<32x168xbf16>, vector<28x168xf32> -> vector<28x168xf32>
    %c1 = arith.constant 1 : index
    %c0_9 = arith.constant 0 : index
    %c0_10 = arith.constant 0 : index
    %10 = vector.load %arg2[%c1, %c0_9, %c0_10] : memref<5x28x32xbf16, #tpu.memory_space<vmem>>, vector<1x28x32xbf16>
    %11 = vector.shape_cast %10 : vector<1x28x32xbf16> to vector<28x32xbf16>
    %cst_11 = arith.constant dense<0.000000e+00> : vector<28x32xf32>
    %12 = tpu.matmul %11, %2, %cst_11 {dimension_numbers = #tpu.dot_dimension_numbers<[1], [0], [0], [1], [0, 0, 1, 1], [], []>} : vector<28x32xbf16>, vector<32x32xbf16>, vector<28x32xf32> -> vector<28x32xf32>
    %13 = arith.truncf %12 : vector<28x32xf32> to vector<28x32xbf16>
    %c1_12 = arith.constant 1 : index
    %c0_13 = arith.constant 0 : index
    %c0_14 = arith.constant 0 : index
    %14 = vector.load %arg3[%c1_12, %c0_13, %c0_14] : memref<5x32x168xbf16, #tpu.memory_space<vmem>>, vector<1x32x168xbf16>
    %15 = vector.shape_cast %14 : vector<1x32x168xbf16> to vector<32x168xbf16>
    %cst_15 = arith.constant dense<0.000000e+00> : vector<28x168xf32>
    %16 = tpu.matmul %13, %15, %cst_15 {dimension_numbers = #tpu.dot_dimension_numbers<[1], [0], [0], [1], [0, 0, 1, 1], [], []>} : vector<28x32xbf16>, vector<32x168xbf16>, vector<28x168xf32> -> vector<28x168xf32>
    %17 = arith.addf %9, %16 : vector<28x168xf32>
    %c2 = arith.constant 2 : index
    %c0_16 = arith.constant 0 : index
    %c0_17 = arith.constant 0 : index
    %18 = vector.load %arg2[%c2, %c0_16, %c0_17] : memref<5x28x32xbf16, #tpu.memory_space<vmem>>, vector<1x28x32xbf16>
    %19 = vector.shape_cast %18 : vector<1x28x32xbf16> to vector<28x32xbf16>
    %cst_18 = arith.constant dense<0.000000e+00> : vector<28x32xf32>
    %20 = tpu.matmul %19, %2, %cst_18 {dimension_numbers = #tpu.dot_dimension_numbers<[1], [0], [0], [1], [0, 0, 1, 1], [], []>} : vector<28x32xbf16>, vector<32x32xbf16>, vector<28x32xf32> -> vector<28x32xf32>
    %21 = arith.truncf %20 : vector<28x32xf32> to vector<28x32xbf16>
    %c2_19 = arith.constant 2 : index
    %c0_20 = arith.constant 0 : index
    %c0_21 = arith.constant 0 : index
    %22 = vector.load %arg3[%c2_19, %c0_20, %c0_21] : memref<5x32x168xbf16, #tpu.memory_space<vmem>>, vector<1x32x168xbf16>
    %23 = vector.shape_cast %22 : vector<1x32x168xbf16> to vector<32x168xbf16>
    %cst_22 = arith.constant dense<0.000000e+00> : vector<28x168xf32>
    %24 = tpu.matmul %21, %23, %cst_22 {dimension_numbers = #tpu.dot_dimension_numbers<[1], [0], [0], [1], [0, 0, 1, 1], [], []>} : vector<28x32xbf16>, vector<32x168xbf16>, vector<28x168xf32> -> vector<28x168xf32>
    %25 = arith.addf %17, %24 : vector<28x168xf32>
    %c3 = arith.constant 3 : index
    %c0_23 = arith.constant 0 : index
    %c0_24 = arith.constant 0 : index
    %26 = vector.load %arg2[%c3, %c0_23, %c0_24] : memref<5x28x32xbf16, #tpu.memory_space<vmem>>, vector<1x28x32xbf16>
    %27 = vector.shape_cast %26 : vector<1x28x32xbf16> to vector<28x32xbf16>
    %cst_25 = arith.constant dense<0.000000e+00> : vector<28x32xf32>
    %28 = tpu.matmul %27, %2, %cst_25 {dimension_numbers = #tpu.dot_dimension_numbers<[1], [0], [0], [1], [0, 0, 1, 1], [], []>} : vector<28x32xbf16>, vector<32x32xbf16>, vector<28x32xf32> -> vector<28x32xf32>
    %29 = arith.truncf %28 : vector<28x32xf32> to vector<28x32xbf16>
    %c3_26 = arith.constant 3 : index
    %c0_27 = arith.constant 0 : index
    %c0_28 = arith.constant 0 : index
    %30 = vector.load %arg3[%c3_26, %c0_27, %c0_28] : memref<5x32x168xbf16, #tpu.memory_space<vmem>>, vector<1x32x168xbf16>
    %31 = vector.shape_cast %30 : vector<1x32x168xbf16> to vector<32x168xbf16>
    %cst_29 = arith.constant dense<0.000000e+00> : vector<28x168xf32>
    %32 = tpu.matmul %29, %31, %cst_29 {dimension_numbers = #tpu.dot_dimension_numbers<[1], [0], [0], [1], [0, 0, 1, 1], [], []>} : vector<28x32xbf16>, vector<32x168xbf16>, vector<28x168xf32> -> vector<28x168xf32>
    %33 = arith.addf %25, %32 : vector<28x168xf32>
    %c4 = arith.constant 4 : index
    %c0_30 = arith.constant 0 : index
    %c0_31 = arith.constant 0 : index
    %34 = vector.load %arg2[%c4, %c0_30, %c0_31] : memref<5x28x32xbf16, #tpu.memory_space<vmem>>, vector<1x28x32xbf16>
    %35 = vector.shape_cast %34 : vector<1x28x32xbf16> to vector<28x32xbf16>
    %cst_32 = arith.constant dense<0.000000e+00> : vector<28x32xf32>
    %36 = tpu.matmul %35, %2, %cst_32 {dimension_numbers = #tpu.dot_dimension_numbers<[1], [0], [0], [1], [0, 0, 1, 1], [], []>} : vector<28x32xbf16>, vector<32x32xbf16>, vector<28x32xf32> -> vector<28x32xf32>
    %37 = arith.truncf %36 : vector<28x32xf32> to vector<28x32xbf16>
    %c4_33 = arith.constant 4 : index
    %c0_34 = arith.constant 0 : index
    %c0_35 = arith.constant 0 : index
    %38 = vector.load %arg3[%c4_33, %c0_34, %c0_35] : memref<5x32x168xbf16, #tpu.memory_space<vmem>>, vector<1x32x168xbf16>
    %39 = vector.shape_cast %38 : vector<1x32x168xbf16> to vector<32x168xbf16>
    %cst_36 = arith.constant dense<0.000000e+00> : vector<28x168xf32>
    %40 = tpu.matmul %37, %39, %cst_36 {dimension_numbers = #tpu.dot_dimension_numbers<[1], [0], [0], [1], [0, 0, 1, 1], [], []>} : vector<28x32xbf16>, vector<32x168xbf16>, vector<28x168xf32> -> vector<28x168xf32>
    %41 = arith.addf %33, %40 : vector<28x168xf32>
    %c0_37 = arith.constant 0 : index
    %c0_38 = arith.constant 0 : index
    %42 = vector.load %arg4[%c0_37, %c0_38] : memref<1x168xf32, #tpu.memory_space<vmem>>, vector<1x168xf32>
    %43 = vector.broadcast %42 : vector<1x168xf32> to vector<28x168xf32>
    %44 = arith.addf %41, %43 : vector<28x168xf32>
    %45 = math.tanh %44 : vector<28x168xf32>
    %46 = arith.truncf %45 : vector<28x168xf32> to vector<28x168xbf16>
    %c0_39 = arith.constant 0 : index
    %c0_40 = arith.constant 0 : index
    %c0_41 = arith.constant 0 : index
    %47 = vector.load %arg5[%c0_39, %c0_40, %c0_41] : memref<10x10x28xbf16, #tpu.memory_space<vmem>>, vector<1x10x28xbf16>
    %48 = vector.shape_cast %47 : vector<1x10x28xbf16> to vector<10x28xbf16>
    %cst_42 = arith.constant dense<0.000000e+00> : vector<10x168xf32>
    %49 = tpu.matmul %48, %46, %cst_42 {dimension_numbers = #tpu.dot_dimension_numbers<[1], [0], [0], [1], [0, 0, 1, 1], [], []>} : vector<10x28xbf16>, vector<28x168xbf16>, vector<10x168xf32> -> vector<10x168xf32>
    %50 = arith.truncf %49 : vector<10x168xf32> to vector<10x168xbf16>
    %c0_43 = arith.constant 0 : index
    %c0_44 = arith.constant 0 : index
    %c0_45 = arith.constant 0 : index
    %51 = vector.load %arg6[%c0_43, %c0_44, %c0_45] : memref<10x168x160xbf16, #tpu.memory_space<vmem>>, vector<1x168x160xbf16>
    %52 = vector.shape_cast %51 : vector<1x168x160xbf16> to vector<168x160xbf16>
    %cst_46 = arith.constant dense<0.000000e+00> : vector<10x160xf32>
    %53 = tpu.matmul %50, %52, %cst_46 {dimension_numbers = #tpu.dot_dimension_numbers<[1], [0], [0], [1], [0, 0, 1, 1], [], []>} : vector<10x168xbf16>, vector<168x160xbf16>, vector<10x160xf32> -> vector<10x160xf32>
    %c1_47 = arith.constant 1 : index
    %c0_48 = arith.constant 0 : index
    %c0_49 = arith.constant 0 : index
    %54 = vector.load %arg5[%c1_47, %c0_48, %c0_49] : memref<10x10x28xbf16, #tpu.memory_space<vmem>>, vector<1x10x28xbf16>
    %55 = vector.shape_cast %54 : vector<1x10x28xbf16> to vector<10x28xbf16>
    %cst_50 = arith.constant dense<0.000000e+00> : vector<10x168xf32>
    %56 = tpu.matmul %55, %46, %cst_50 {dimension_numbers = #tpu.dot_dimension_numbers<[1], [0], [0], [1], [0, 0, 1, 1], [], []>} : vector<10x28xbf16>, vector<28x168xbf16>, vector<10x168xf32> -> vector<10x168xf32>
    %57 = arith.truncf %56 : vector<10x168xf32> to vector<10x168xbf16>
    %c1_51 = arith.constant 1 : index
    %c0_52 = arith.constant 0 : index
    %c0_53 = arith.constant 0 : index
    %58 = vector.load %arg6[%c1_51, %c0_52, %c0_53] : memref<10x168x160xbf16, #tpu.memory_space<vmem>>, vector<1x168x160xbf16>
    %59 = vector.shape_cast %58 : vector<1x168x160xbf16> to vector<168x160xbf16>
    %cst_54 = arith.constant dense<0.000000e+00> : vector<10x160xf32>
    %60 = tpu.matmul %57, %59, %cst_54 {dimension_numbers = #tpu.dot_dimension_numbers<[1], [0], [0], [1], [0, 0, 1, 1], [], []>} : vector<10x168xbf16>, vector<168x160xbf16>, vector<10x160xf32> -> vector<10x160xf32>
    %61 = arith.addf %53, %60 : vector<10x160xf32>
    %c2_55 = arith.constant 2 : index
    %c0_56 = arith.constant 0 : index
    %c0_57 = arith.constant 0 : index
    %62 = vector.load %arg5[%c2_55, %c0_56, %c0_57] : memref<10x10x28xbf16, #tpu.memory_space<vmem>>, vector<1x10x28xbf16>
    %63 = vector.shape_cast %62 : vector<1x10x28xbf16> to vector<10x28xbf16>
    %cst_58 = arith.constant dense<0.000000e+00> : vector<10x168xf32>
    %64 = tpu.matmul %63, %46, %cst_58 {dimension_numbers = #tpu.dot_dimension_numbers<[1], [0], [0], [1], [0, 0, 1, 1], [], []>} : vector<10x28xbf16>, vector<28x168xbf16>, vector<10x168xf32> -> vector<10x168xf32>
    %65 = arith.truncf %64 : vector<10x168xf32> to vector<10x168xbf16>
    %c2_59 = arith.constant 2 : index
    %c0_60 = arith.constant 0 : index
    %c0_61 = arith.constant 0 : index
    %66 = vector.load %arg6[%c2_59, %c0_60, %c0_61] : memref<10x168x160xbf16, #tpu.memory_space<vmem>>, vector<1x168x160xbf16>
    %67 = vector.shape_cast %66 : vector<1x168x160xbf16> to vector<168x160xbf16>
    %cst_62 = arith.constant dense<0.000000e+00> : vector<10x160xf32>
    %68 = tpu.matmul %65, %67, %cst_62 {dimension_numbers = #tpu.dot_dimension_numbers<[1], [0], [0], [1], [0, 0, 1, 1], [], []>} : vector<10x168xbf16>, vector<168x160xbf16>, vector<10x160xf32> -> vector<10x160xf32>
    %69 = arith.addf %61, %68 : vector<10x160xf32>
    %c3_63 = arith.constant 3 : index
    %c0_64 = arith.constant 0 : index
    %c0_65 = arith.constant 0 : index
    %70 = vector.load %arg5[%c3_63, %c0_64, %c0_65] : memref<10x10x28xbf16, #tpu.memory_space<vmem>>, vector<1x10x28xbf16>
    %71 = vector.shape_cast %70 : vector<1x10x28xbf16> to vector<10x28xbf16>
    %cst_66 = arith.constant dense<0.000000e+00> : vector<10x168xf32>
    %72 = tpu.matmul %71, %46, %cst_66 {dimension_numbers = #tpu.dot_dimension_numbers<[1], [0], [0], [1], [0, 0, 1, 1], [], []>} : vector<10x28xbf16>, vector<28x168xbf16>, vector<10x168xf32> -> vector<10x168xf32>
    %73 = arith.truncf %72 : vector<10x168xf32> to vector<10x168xbf16>
    %c3_67 = arith.constant 3 : index
    %c0_68 = arith.constant 0 : index
    %c0_69 = arith.constant 0 : index
    %74 = vector.load %arg6[%c3_67, %c0_68, %c0_69] : memref<10x168x160xbf16, #tpu.memory_space<vmem>>, vector<1x168x160xbf16>
    %75 = vector.shape_cast %74 : vector<1x168x160xbf16> to vector<168x160xbf16>
    %cst_70 = arith.constant dense<0.000000e+00> : vector<10x160xf32>
    %76 = tpu.matmul %73, %75, %cst_70 {dimension_numbers = #tpu.dot_dimension_numbers<[1], [0], [0], [1], [0, 0, 1, 1], [], []>} : vector<10x168xbf16>, vector<168x160xbf16>, vector<10x160xf32> -> vector<10x160xf32>
    %77 = arith.addf %69, %76 : vector<10x160xf32>
    %c4_71 = arith.constant 4 : index
    %c0_72 = arith.constant 0 : index
    %c0_73 = arith.constant 0 : index
    %78 = vector.load %arg5[%c4_71, %c0_72, %c0_73] : memref<10x10x28xbf16, #tpu.memory_space<vmem>>, vector<1x10x28xbf16>
    %79 = vector.shape_cast %78 : vector<1x10x28xbf16> to vector<10x28xbf16>
    %cst_74 = arith.constant dense<0.000000e+00> : vector<10x168xf32>
    %80 = tpu.matmul %79, %46, %cst_74 {dimension_numbers = #tpu.dot_dimension_numbers<[1], [0], [0], [1], [0, 0, 1, 1], [], []>} : vector<10x28xbf16>, vector<28x168xbf16>, vector<10x168xf32> -> vector<10x168xf32>
    %81 = arith.truncf %80 : vector<10x168xf32> to vector<10x168xbf16>
    %c4_75 = arith.constant 4 : index
    %c0_76 = arith.constant 0 : index
    %c0_77 = arith.constant 0 : index
    %82 = vector.load %arg6[%c4_75, %c0_76, %c0_77] : memref<10x168x160xbf16, #tpu.memory_space<vmem>>, vector<1x168x160xbf16>
    %83 = vector.shape_cast %82 : vector<1x168x160xbf16> to vector<168x160xbf16>
    %cst_78 = arith.constant dense<0.000000e+00> : vector<10x160xf32>
    %84 = tpu.matmul %81, %83, %cst_78 {dimension_numbers = #tpu.dot_dimension_numbers<[1], [0], [0], [1], [0, 0, 1, 1], [], []>} : vector<10x168xbf16>, vector<168x160xbf16>, vector<10x160xf32> -> vector<10x160xf32>
    %85 = arith.addf %77, %84 : vector<10x160xf32>
    %c5 = arith.constant 5 : index
    %c0_79 = arith.constant 0 : index
    %c0_80 = arith.constant 0 : index
    %86 = vector.load %arg5[%c5, %c0_79, %c0_80] : memref<10x10x28xbf16, #tpu.memory_space<vmem>>, vector<1x10x28xbf16>
    %87 = vector.shape_cast %86 : vector<1x10x28xbf16> to vector<10x28xbf16>
    %cst_81 = arith.constant dense<0.000000e+00> : vector<10x168xf32>
    %88 = tpu.matmul %87, %46, %cst_81 {dimension_numbers = #tpu.dot_dimension_numbers<[1], [0], [0], [1], [0, 0, 1, 1], [], []>} : vector<10x28xbf16>, vector<28x168xbf16>, vector<10x168xf32> -> vector<10x168xf32>
    %89 = arith.truncf %88 : vector<10x168xf32> to vector<10x168xbf16>
    %c5_82 = arith.constant 5 : index
    %c0_83 = arith.constant 0 : index
    %c0_84 = arith.constant 0 : index
    %90 = vector.load %arg6[%c5_82, %c0_83, %c0_84] : memref<10x168x160xbf16, #tpu.memory_space<vmem>>, vector<1x168x160xbf16>
    %91 = vector.shape_cast %90 : vector<1x168x160xbf16> to vector<168x160xbf16>
    %cst_85 = arith.constant dense<0.000000e+00> : vector<10x160xf32>
    %92 = tpu.matmul %89, %91, %cst_85 {dimension_numbers = #tpu.dot_dimension_numbers<[1], [0], [0], [1], [0, 0, 1, 1], [], []>} : vector<10x168xbf16>, vector<168x160xbf16>, vector<10x160xf32> -> vector<10x160xf32>
    %93 = arith.addf %85, %92 : vector<10x160xf32>
    %c6 = arith.constant 6 : index
    %c0_86 = arith.constant 0 : index
    %c0_87 = arith.constant 0 : index
    %94 = vector.load %arg5[%c6, %c0_86, %c0_87] : memref<10x10x28xbf16, #tpu.memory_space<vmem>>, vector<1x10x28xbf16>
    %95 = vector.shape_cast %94 : vector<1x10x28xbf16> to vector<10x28xbf16>
    %cst_88 = arith.constant dense<0.000000e+00> : vector<10x168xf32>
    %96 = tpu.matmul %95, %46, %cst_88 {dimension_numbers = #tpu.dot_dimension_numbers<[1], [0], [0], [1], [0, 0, 1, 1], [], []>} : vector<10x28xbf16>, vector<28x168xbf16>, vector<10x168xf32> -> vector<10x168xf32>
    %97 = arith.truncf %96 : vector<10x168xf32> to vector<10x168xbf16>
    %c6_89 = arith.constant 6 : index
    %c0_90 = arith.constant 0 : index
    %c0_91 = arith.constant 0 : index
    %98 = vector.load %arg6[%c6_89, %c0_90, %c0_91] : memref<10x168x160xbf16, #tpu.memory_space<vmem>>, vector<1x168x160xbf16>
    %99 = vector.shape_cast %98 : vector<1x168x160xbf16> to vector<168x160xbf16>
    %cst_92 = arith.constant dense<0.000000e+00> : vector<10x160xf32>
    %100 = tpu.matmul %97, %99, %cst_92 {dimension_numbers = #tpu.dot_dimension_numbers<[1], [0], [0], [1], [0, 0, 1, 1], [], []>} : vector<10x168xbf16>, vector<168x160xbf16>, vector<10x160xf32> -> vector<10x160xf32>
    %101 = arith.addf %93, %100 : vector<10x160xf32>
    %c7 = arith.constant 7 : index
    %c0_93 = arith.constant 0 : index
    %c0_94 = arith.constant 0 : index
    %102 = vector.load %arg5[%c7, %c0_93, %c0_94] : memref<10x10x28xbf16, #tpu.memory_space<vmem>>, vector<1x10x28xbf16>
    %103 = vector.shape_cast %102 : vector<1x10x28xbf16> to vector<10x28xbf16>
    %cst_95 = arith.constant dense<0.000000e+00> : vector<10x168xf32>
    %104 = tpu.matmul %103, %46, %cst_95 {dimension_numbers = #tpu.dot_dimension_numbers<[1], [0], [0], [1], [0, 0, 1, 1], [], []>} : vector<10x28xbf16>, vector<28x168xbf16>, vector<10x168xf32> -> vector<10x168xf32>
    %105 = arith.truncf %104 : vector<10x168xf32> to vector<10x168xbf16>
    %c7_96 = arith.constant 7 : index
    %c0_97 = arith.constant 0 : index
    %c0_98 = arith.constant 0 : index
    %106 = vector.load %arg6[%c7_96, %c0_97, %c0_98] : memref<10x168x160xbf16, #tpu.memory_space<vmem>>, vector<1x168x160xbf16>
    %107 = vector.shape_cast %106 : vector<1x168x160xbf16> to vector<168x160xbf16>
    %cst_99 = arith.constant dense<0.000000e+00> : vector<10x160xf32>
    %108 = tpu.matmul %105, %107, %cst_99 {dimension_numbers = #tpu.dot_dimension_numbers<[1], [0], [0], [1], [0, 0, 1, 1], [], []>} : vector<10x168xbf16>, vector<168x160xbf16>, vector<10x160xf32> -> vector<10x160xf32>
    %109 = arith.addf %101, %108 : vector<10x160xf32>
    %c8 = arith.constant 8 : index
    %c0_100 = arith.constant 0 : index
    %c0_101 = arith.constant 0 : index
    %110 = vector.load %arg5[%c8, %c0_100, %c0_101] : memref<10x10x28xbf16, #tpu.memory_space<vmem>>, vector<1x10x28xbf16>
    %111 = vector.shape_cast %110 : vector<1x10x28xbf16> to vector<10x28xbf16>
    %cst_102 = arith.constant dense<0.000000e+00> : vector<10x168xf32>
    %112 = tpu.matmul %111, %46, %cst_102 {dimension_numbers = #tpu.dot_dimension_numbers<[1], [0], [0], [1], [0, 0, 1, 1], [], []>} : vector<10x28xbf16>, vector<28x168xbf16>, vector<10x168xf32> -> vector<10x168xf32>
    %113 = arith.truncf %112 : vector<10x168xf32> to vector<10x168xbf16>
    %c8_103 = arith.constant 8 : index
    %c0_104 = arith.constant 0 : index
    %c0_105 = arith.constant 0 : index
    %114 = vector.load %arg6[%c8_103, %c0_104, %c0_105] : memref<10x168x160xbf16, #tpu.memory_space<vmem>>, vector<1x168x160xbf16>
    %115 = vector.shape_cast %114 : vector<1x168x160xbf16> to vector<168x160xbf16>
    %cst_106 = arith.constant dense<0.000000e+00> : vector<10x160xf32>
    %116 = tpu.matmul %113, %115, %cst_106 {dimension_numbers = #tpu.dot_dimension_numbers<[1], [0], [0], [1], [0, 0, 1, 1], [], []>} : vector<10x168xbf16>, vector<168x160xbf16>, vector<10x160xf32> -> vector<10x160xf32>
    %117 = arith.addf %109, %116 : vector<10x160xf32>
    %c9 = arith.constant 9 : index
    %c0_107 = arith.constant 0 : index
    %c0_108 = arith.constant 0 : index
    %118 = vector.load %arg5[%c9, %c0_107, %c0_108] : memref<10x10x28xbf16, #tpu.memory_space<vmem>>, vector<1x10x28xbf16>
    %119 = vector.shape_cast %118 : vector<1x10x28xbf16> to vector<10x28xbf16>
    %cst_109 = arith.constant dense<0.000000e+00> : vector<10x168xf32>
    %120 = tpu.matmul %119, %46, %cst_109 {dimension_numbers = #tpu.dot_dimension_numbers<[1], [0], [0], [1], [0, 0, 1, 1], [], []>} : vector<10x28xbf16>, vector<28x168xbf16>, vector<10x168xf32> -> vector<10x168xf32>
    %121 = arith.truncf %120 : vector<10x168xf32> to vector<10x168xbf16>
    %c9_110 = arith.constant 9 : index
    %c0_111 = arith.constant 0 : index
    %c0_112 = arith.constant 0 : index
    %122 = vector.load %arg6[%c9_110, %c0_111, %c0_112] : memref<10x168x160xbf16, #tpu.memory_space<vmem>>, vector<1x168x160xbf16>
    %123 = vector.shape_cast %122 : vector<1x168x160xbf16> to vector<168x160xbf16>
    %cst_113 = arith.constant dense<0.000000e+00> : vector<10x160xf32>
    %124 = tpu.matmul %121, %123, %cst_113 {dimension_numbers = #tpu.dot_dimension_numbers<[1], [0], [0], [1], [0, 0, 1, 1], [], []>} : vector<10x168xbf16>, vector<168x160xbf16>, vector<10x160xf32> -> vector<10x160xf32>
    %125 = arith.addf %117, %124 : vector<10x160xf32>
    %c0_114 = arith.constant 0 : index
    %c0_115 = arith.constant 0 : index
    %126 = vector.load %arg7[%c0_114, %c0_115] : memref<1x160xf32, #tpu.memory_space<vmem>>, vector<1x160xf32>
    %127 = vector.broadcast %126 : vector<1x160xf32> to vector<10x160xf32>
    %128 = arith.addf %125, %127 : vector<10x160xf32>
    %129 = math.tanh %128 : vector<10x160xf32>
    %130 = arith.truncf %129 : vector<10x160xf32> to vector<10x160xbf16>
    %c0_116 = arith.constant 0 : index
    %c0_117 = arith.constant 0 : index
    %c0_118 = arith.constant 0 : index
    %131 = vector.load %arg8[%c0_116, %c0_117, %c0_118] : memref<10x1x10xbf16, #tpu.memory_space<vmem>>, vector<1x1x10xbf16>
    %132 = vector.shape_cast %131 : vector<1x1x10xbf16> to vector<1x10xbf16>
    %cst_119 = arith.constant dense<0.000000e+00> : vector<1x160xf32>
    %133 = tpu.matmul %132, %130, %cst_119 {dimension_numbers = #tpu.dot_dimension_numbers<[1], [0], [0], [1], [0, 0, 1, 1], [], []>} : vector<1x10xbf16>, vector<10x160xbf16>, vector<1x160xf32> -> vector<1x160xf32>
    %134 = arith.truncf %133 : vector<1x160xf32> to vector<1x160xbf16>
    %c0_120 = arith.constant 0 : index
    %c0_121 = arith.constant 0 : index
    %c0_122 = arith.constant 0 : index
    %135 = vector.load %arg9[%c0_120, %c0_121, %c0_122] : memref<10x160x120xbf16, #tpu.memory_space<vmem>>, vector<1x160x120xbf16>
    %136 = vector.shape_cast %135 : vector<1x160x120xbf16> to vector<160x120xbf16>
    %cst_123 = arith.constant dense<0.000000e+00> : vector<1x120xf32>
    %137 = tpu.matmul %134, %136, %cst_123 {dimension_numbers = #tpu.dot_dimension_numbers<[1], [0], [0], [1], [0, 0, 1, 1], [], []>} : vector<1x160xbf16>, vector<160x120xbf16>, vector<1x120xf32> -> vector<1x120xf32>
    %c1_124 = arith.constant 1 : index
    %c0_125 = arith.constant 0 : index
    %c0_126 = arith.constant 0 : index
    %138 = vector.load %arg8[%c1_124, %c0_125, %c0_126] : memref<10x1x10xbf16, #tpu.memory_space<vmem>>, vector<1x1x10xbf16>
    %139 = vector.shape_cast %138 : vector<1x1x10xbf16> to vector<1x10xbf16>
    %cst_127 = arith.constant dense<0.000000e+00> : vector<1x160xf32>
    %140 = tpu.matmul %139, %130, %cst_127 {dimension_numbers = #tpu.dot_dimension_numbers<[1], [0], [0], [1], [0, 0, 1, 1], [], []>} : vector<1x10xbf16>, vector<10x160xbf16>, vector<1x160xf32> -> vector<1x160xf32>
    %141 = arith.truncf %140 : vector<1x160xf32> to vector<1x160xbf16>
    %c1_128 = arith.constant 1 : index
    %c0_129 = arith.constant 0 : index
    %c0_130 = arith.constant 0 : index
    %142 = vector.load %arg9[%c1_128, %c0_129, %c0_130] : memref<10x160x120xbf16, #tpu.memory_space<vmem>>, vector<1x160x120xbf16>
    %143 = vector.shape_cast %142 : vector<1x160x120xbf16> to vector<160x120xbf16>
    %cst_131 = arith.constant dense<0.000000e+00> : vector<1x120xf32>
    %144 = tpu.matmul %141, %143, %cst_131 {dimension_numbers = #tpu.dot_dimension_numbers<[1], [0], [0], [1], [0, 0, 1, 1], [], []>} : vector<1x160xbf16>, vector<160x120xbf16>, vector<1x120xf32> -> vector<1x120xf32>
    %145 = arith.addf %137, %144 : vector<1x120xf32>
    %c2_132 = arith.constant 2 : index
    %c0_133 = arith.constant 0 : index
    %c0_134 = arith.constant 0 : index
    %146 = vector.load %arg8[%c2_132, %c0_133, %c0_134] : memref<10x1x10xbf16, #tpu.memory_space<vmem>>, vector<1x1x10xbf16>
    %147 = vector.shape_cast %146 : vector<1x1x10xbf16> to vector<1x10xbf16>
    %cst_135 = arith.constant dense<0.000000e+00> : vector<1x160xf32>
    %148 = tpu.matmul %147, %130, %cst_135 {dimension_numbers = #tpu.dot_dimension_numbers<[1], [0], [0], [1], [0, 0, 1, 1], [], []>} : vector<1x10xbf16>, vector<10x160xbf16>, vector<1x160xf32> -> vector<1x160xf32>
    %149 = arith.truncf %148 : vector<1x160xf32> to vector<1x160xbf16>
    %c2_136 = arith.constant 2 : index
    %c0_137 = arith.constant 0 : index
    %c0_138 = arith.constant 0 : index
    %150 = vector.load %arg9[%c2_136, %c0_137, %c0_138] : memref<10x160x120xbf16, #tpu.memory_space<vmem>>, vector<1x160x120xbf16>
    %151 = vector.shape_cast %150 : vector<1x160x120xbf16> to vector<160x120xbf16>
    %cst_139 = arith.constant dense<0.000000e+00> : vector<1x120xf32>
    %152 = tpu.matmul %149, %151, %cst_139 {dimension_numbers = #tpu.dot_dimension_numbers<[1], [0], [0], [1], [0, 0, 1, 1], [], []>} : vector<1x160xbf16>, vector<160x120xbf16>, vector<1x120xf32> -> vector<1x120xf32>
    %153 = arith.addf %145, %152 : vector<1x120xf32>
    %c3_140 = arith.constant 3 : index
    %c0_141 = arith.constant 0 : index
    %c0_142 = arith.constant 0 : index
    %154 = vector.load %arg8[%c3_140, %c0_141, %c0_142] : memref<10x1x10xbf16, #tpu.memory_space<vmem>>, vector<1x1x10xbf16>
    %155 = vector.shape_cast %154 : vector<1x1x10xbf16> to vector<1x10xbf16>
    %cst_143 = arith.constant dense<0.000000e+00> : vector<1x160xf32>
    %156 = tpu.matmul %155, %130, %cst_143 {dimension_numbers = #tpu.dot_dimension_numbers<[1], [0], [0], [1], [0, 0, 1, 1], [], []>} : vector<1x10xbf16>, vector<10x160xbf16>, vector<1x160xf32> -> vector<1x160xf32>
    %157 = arith.truncf %156 : vector<1x160xf32> to vector<1x160xbf16>
    %c3_144 = arith.constant 3 : index
    %c0_145 = arith.constant 0 : index
    %c0_146 = arith.constant 0 : index
    %158 = vector.load %arg9[%c3_144, %c0_145, %c0_146] : memref<10x160x120xbf16, #tpu.memory_space<vmem>>, vector<1x160x120xbf16>
    %159 = vector.shape_cast %158 : vector<1x160x120xbf16> to vector<160x120xbf16>
    %cst_147 = arith.constant dense<0.000000e+00> : vector<1x120xf32>
    %160 = tpu.matmul %157, %159, %cst_147 {dimension_numbers = #tpu.dot_dimension_numbers<[1], [0], [0], [1], [0, 0, 1, 1], [], []>} : vector<1x160xbf16>, vector<160x120xbf16>, vector<1x120xf32> -> vector<1x120xf32>
    %161 = arith.addf %153, %160 : vector<1x120xf32>
    %c4_148 = arith.constant 4 : index
    %c0_149 = arith.constant 0 : index
    %c0_150 = arith.constant 0 : index
    %162 = vector.load %arg8[%c4_148, %c0_149, %c0_150] : memref<10x1x10xbf16, #tpu.memory_space<vmem>>, vector<1x1x10xbf16>
    %163 = vector.shape_cast %162 : vector<1x1x10xbf16> to vector<1x10xbf16>
    %cst_151 = arith.constant dense<0.000000e+00> : vector<1x160xf32>
    %164 = tpu.matmul %163, %130, %cst_151 {dimension_numbers = #tpu.dot_dimension_numbers<[1], [0], [0], [1], [0, 0, 1, 1], [], []>} : vector<1x10xbf16>, vector<10x160xbf16>, vector<1x160xf32> -> vector<1x160xf32>
    %165 = arith.truncf %164 : vector<1x160xf32> to vector<1x160xbf16>
    %c4_152 = arith.constant 4 : index
    %c0_153 = arith.constant 0 : index
    %c0_154 = arith.constant 0 : index
    %166 = vector.load %arg9[%c4_152, %c0_153, %c0_154] : memref<10x160x120xbf16, #tpu.memory_space<vmem>>, vector<1x160x120xbf16>
    %167 = vector.shape_cast %166 : vector<1x160x120xbf16> to vector<160x120xbf16>
    %cst_155 = arith.constant dense<0.000000e+00> : vector<1x120xf32>
    %168 = tpu.matmul %165, %167, %cst_155 {dimension_numbers = #tpu.dot_dimension_numbers<[1], [0], [0], [1], [0, 0, 1, 1], [], []>} : vector<1x160xbf16>, vector<160x120xbf16>, vector<1x120xf32> -> vector<1x120xf32>
    %169 = arith.addf %161, %168 : vector<1x120xf32>
    %c5_156 = arith.constant 5 : index
    %c0_157 = arith.constant 0 : index
    %c0_158 = arith.constant 0 : index
    %170 = vector.load %arg8[%c5_156, %c0_157, %c0_158] : memref<10x1x10xbf16, #tpu.memory_space<vmem>>, vector<1x1x10xbf16>
    %171 = vector.shape_cast %170 : vector<1x1x10xbf16> to vector<1x10xbf16>
    %cst_159 = arith.constant dense<0.000000e+00> : vector<1x160xf32>
    %172 = tpu.matmul %171, %130, %cst_159 {dimension_numbers = #tpu.dot_dimension_numbers<[1], [0], [0], [1], [0, 0, 1, 1], [], []>} : vector<1x10xbf16>, vector<10x160xbf16>, vector<1x160xf32> -> vector<1x160xf32>
    %173 = arith.truncf %172 : vector<1x160xf32> to vector<1x160xbf16>
    %c5_160 = arith.constant 5 : index
    %c0_161 = arith.constant 0 : index
    %c0_162 = arith.constant 0 : index
    %174 = vector.load %arg9[%c5_160, %c0_161, %c0_162] : memref<10x160x120xbf16, #tpu.memory_space<vmem>>, vector<1x160x120xbf16>
    %175 = vector.shape_cast %174 : vector<1x160x120xbf16> to vector<160x120xbf16>
    %cst_163 = arith.constant dense<0.000000e+00> : vector<1x120xf32>
    %176 = tpu.matmul %173, %175, %cst_163 {dimension_numbers = #tpu.dot_dimension_numbers<[1], [0], [0], [1], [0, 0, 1, 1], [], []>} : vector<1x160xbf16>, vector<160x120xbf16>, vector<1x120xf32> -> vector<1x120xf32>
    %177 = arith.addf %169, %176 : vector<1x120xf32>
    %c6_164 = arith.constant 6 : index
    %c0_165 = arith.constant 0 : index
    %c0_166 = arith.constant 0 : index
    %178 = vector.load %arg8[%c6_164, %c0_165, %c0_166] : memref<10x1x10xbf16, #tpu.memory_space<vmem>>, vector<1x1x10xbf16>
    %179 = vector.shape_cast %178 : vector<1x1x10xbf16> to vector<1x10xbf16>
    %cst_167 = arith.constant dense<0.000000e+00> : vector<1x160xf32>
    %180 = tpu.matmul %179, %130, %cst_167 {dimension_numbers = #tpu.dot_dimension_numbers<[1], [0], [0], [1], [0, 0, 1, 1], [], []>} : vector<1x10xbf16>, vector<10x160xbf16>, vector<1x160xf32> -> vector<1x160xf32>
    %181 = arith.truncf %180 : vector<1x160xf32> to vector<1x160xbf16>
    %c6_168 = arith.constant 6 : index
    %c0_169 = arith.constant 0 : index
    %c0_170 = arith.constant 0 : index
    %182 = vector.load %arg9[%c6_168, %c0_169, %c0_170] : memref<10x160x120xbf16, #tpu.memory_space<vmem>>, vector<1x160x120xbf16>
    %183 = vector.shape_cast %182 : vector<1x160x120xbf16> to vector<160x120xbf16>
    %cst_171 = arith.constant dense<0.000000e+00> : vector<1x120xf32>
    %184 = tpu.matmul %181, %183, %cst_171 {dimension_numbers = #tpu.dot_dimension_numbers<[1], [0], [0], [1], [0, 0, 1, 1], [], []>} : vector<1x160xbf16>, vector<160x120xbf16>, vector<1x120xf32> -> vector<1x120xf32>
    %185 = arith.addf %177, %184 : vector<1x120xf32>
    %c7_172 = arith.constant 7 : index
    %c0_173 = arith.constant 0 : index
    %c0_174 = arith.constant 0 : index
    %186 = vector.load %arg8[%c7_172, %c0_173, %c0_174] : memref<10x1x10xbf16, #tpu.memory_space<vmem>>, vector<1x1x10xbf16>
    %187 = vector.shape_cast %186 : vector<1x1x10xbf16> to vector<1x10xbf16>
    %cst_175 = arith.constant dense<0.000000e+00> : vector<1x160xf32>
    %188 = tpu.matmul %187, %130, %cst_175 {dimension_numbers = #tpu.dot_dimension_numbers<[1], [0], [0], [1], [0, 0, 1, 1], [], []>} : vector<1x10xbf16>, vector<10x160xbf16>, vector<1x160xf32> -> vector<1x160xf32>
    %189 = arith.truncf %188 : vector<1x160xf32> to vector<1x160xbf16>
    %c7_176 = arith.constant 7 : index
    %c0_177 = arith.constant 0 : index
    %c0_178 = arith.constant 0 : index
    %190 = vector.load %arg9[%c7_176, %c0_177, %c0_178] : memref<10x160x120xbf16, #tpu.memory_space<vmem>>, vector<1x160x120xbf16>
    %191 = vector.shape_cast %190 : vector<1x160x120xbf16> to vector<160x120xbf16>
    %cst_179 = arith.constant dense<0.000000e+00> : vector<1x120xf32>
    %192 = tpu.matmul %189, %191, %cst_179 {dimension_numbers = #tpu.dot_dimension_numbers<[1], [0], [0], [1], [0, 0, 1, 1], [], []>} : vector<1x160xbf16>, vector<160x120xbf16>, vector<1x120xf32> -> vector<1x120xf32>
    %193 = arith.addf %185, %192 : vector<1x120xf32>
    %c8_180 = arith.constant 8 : index
    %c0_181 = arith.constant 0 : index
    %c0_182 = arith.constant 0 : index
    %194 = vector.load %arg8[%c8_180, %c0_181, %c0_182] : memref<10x1x10xbf16, #tpu.memory_space<vmem>>, vector<1x1x10xbf16>
    %195 = vector.shape_cast %194 : vector<1x1x10xbf16> to vector<1x10xbf16>
    %cst_183 = arith.constant dense<0.000000e+00> : vector<1x160xf32>
    %196 = tpu.matmul %195, %130, %cst_183 {dimension_numbers = #tpu.dot_dimension_numbers<[1], [0], [0], [1], [0, 0, 1, 1], [], []>} : vector<1x10xbf16>, vector<10x160xbf16>, vector<1x160xf32> -> vector<1x160xf32>
    %197 = arith.truncf %196 : vector<1x160xf32> to vector<1x160xbf16>
    %c8_184 = arith.constant 8 : index
    %c0_185 = arith.constant 0 : index
    %c0_186 = arith.constant 0 : index
    %198 = vector.load %arg9[%c8_184, %c0_185, %c0_186] : memref<10x160x120xbf16, #tpu.memory_space<vmem>>, vector<1x160x120xbf16>
    %199 = vector.shape_cast %198 : vector<1x160x120xbf16> to vector<160x120xbf16>
    %cst_187 = arith.constant dense<0.000000e+00> : vector<1x120xf32>
    %200 = tpu.matmul %197, %199, %cst_187 {dimension_numbers = #tpu.dot_dimension_numbers<[1], [0], [0], [1], [0, 0, 1, 1], [], []>} : vector<1x160xbf16>, vector<160x120xbf16>, vector<1x120xf32> -> vector<1x120xf32>
    %201 = arith.addf %193, %200 : vector<1x120xf32>
    %c9_188 = arith.constant 9 : index
    %c0_189 = arith.constant 0 : index
    %c0_190 = arith.constant 0 : index
    %202 = vector.load %arg8[%c9_188, %c0_189, %c0_190] : memref<10x1x10xbf16, #tpu.memory_space<vmem>>, vector<1x1x10xbf16>
    %203 = vector.shape_cast %202 : vector<1x1x10xbf16> to vector<1x10xbf16>
    %cst_191 = arith.constant dense<0.000000e+00> : vector<1x160xf32>
    %204 = tpu.matmul %203, %130, %cst_191 {dimension_numbers = #tpu.dot_dimension_numbers<[1], [0], [0], [1], [0, 0, 1, 1], [], []>} : vector<1x10xbf16>, vector<10x160xbf16>, vector<1x160xf32> -> vector<1x160xf32>
    %205 = arith.truncf %204 : vector<1x160xf32> to vector<1x160xbf16>
    %c9_192 = arith.constant 9 : index
    %c0_193 = arith.constant 0 : index
    %c0_194 = arith.constant 0 : index
    %206 = vector.load %arg9[%c9_192, %c0_193, %c0_194] : memref<10x160x120xbf16, #tpu.memory_space<vmem>>, vector<1x160x120xbf16>
    %207 = vector.shape_cast %206 : vector<1x160x120xbf16> to vector<160x120xbf16>
    %cst_195 = arith.constant dense<0.000000e+00> : vector<1x120xf32>
    %208 = tpu.matmul %205, %207, %cst_195 {dimension_numbers = #tpu.dot_dimension_numbers<[1], [0], [0], [1], [0, 0, 1, 1], [], []>} : vector<1x160xbf16>, vector<160x120xbf16>, vector<1x120xf32> -> vector<1x120xf32>
    %209 = arith.addf %201, %208 : vector<1x120xf32>
    %c0_196 = arith.constant 0 : index
    %c0_197 = arith.constant 0 : index
    %210 = vector.load %arg10[%c0_196, %c0_197] : memref<1x120xf32, #tpu.memory_space<vmem>>, vector<1x120xf32>
    %211 = arith.addf %209, %210 : vector<1x120xf32>
    %212 = math.tanh %211 : vector<1x120xf32>
    %213 = arith.truncf %212 : vector<1x120xf32> to vector<1x120xbf16>
    %c0_198 = arith.constant 0 : index
    %c0_199 = arith.constant 0 : index
    %214 = vector.load %arg11[%c0_198, %c0_199] : memref<120x84xbf16, #tpu.memory_space<vmem>>, vector<120x84xbf16>
    %cst_200 = arith.constant dense<0.000000e+00> : vector<1x84xf32>
    %215 = tpu.matmul %213, %214, %cst_200 {dimension_numbers = #tpu.dot_dimension_numbers<[1], [0], [0], [1], [0, 0, 1, 1], [], []>} : vector<1x120xbf16>, vector<120x84xbf16>, vector<1x84xf32> -> vector<1x84xf32>
    %c0_201 = arith.constant 0 : index
    %c0_202 = arith.constant 0 : index
    %216 = vector.load %arg12[%c0_201, %c0_202] : memref<1x84xf32, #tpu.memory_space<vmem>>, vector<1x84xf32>
    %217 = arith.addf %215, %216 : vector<1x84xf32>
    %218 = math.tanh %217 : vector<1x84xf32>
    %219 = arith.truncf %218 : vector<1x84xf32> to vector<1x84xbf16>
    %c0_203 = arith.constant 0 : index
    %c0_204 = arith.constant 0 : index
    %220 = vector.load %arg13[%c0_203, %c0_204] : memref<84x10xbf16, #tpu.memory_space<vmem>>, vector<84x10xbf16>
    %cst_205 = arith.constant dense<0.000000e+00> : vector<1x10xf32>
    %221 = tpu.matmul %219, %220, %cst_205 {dimension_numbers = #tpu.dot_dimension_numbers<[1], [0], [0], [1], [0, 0, 1, 1], [], []>} : vector<1x84xbf16>, vector<84x10xbf16>, vector<1x10xf32> -> vector<1x10xf32>
    %c0_206 = arith.constant 0 : index
    %c0_207 = arith.constant 0 : index
    %222 = vector.load %arg14[%c0_206, %c0_207] : memref<1x10xf32, #tpu.memory_space<vmem>>, vector<1x10xf32>
    %223 = arith.addf %221, %222 : vector<1x10xf32>
    %c0_208 = arith.constant 0 : index
    %c0_209 = arith.constant 0 : index
    %c0_210 = arith.constant 0 : index
    %224 = vector.load %arg15[%c0_208, %c0_209, %c0_210] : memref<1x1x10xf32, #tpu.memory_space<vmem>>, vector<1x1x10xf32>
    %225 = vector.shape_cast %224 : vector<1x1x10xf32> to vector<1x10xf32>
    %226 = vector.shape_cast %223 : vector<1x10xf32> to vector<1x1x10xf32>
    tpu.vector_store %arg15[%c0_208, %c0_209, %c0_210], %226 {strides = array<i32>} : memref<1x1x10xf32, #tpu.memory_space<vmem>>, vector<1x1x10xf32>,
    %cst_211 = arith.constant dense<0xFF800000> : vector<1xf32>
    %227 = vector.multi_reduction <maximumf>, %223, %cst_211 [1] : vector<1x10xf32> to vector<1xf32>
    %228 = vector.shape_cast %227 : vector<1xf32> to vector<1x1xf32>
    %229 = vector.broadcast %228 : vector<1x1xf32> to vector<1x10xf32>
    %230 = arith.subf %223, %229 : vector<1x10xf32>
    %231 = math.exp %230 : vector<1x10xf32>
    %cst_212 = arith.constant dense<0.000000e+00> : vector<1xf32>
    %232 = vector.multi_reduction <add>, %231, %cst_212 [1] : vector<1x10xf32> to vector<1xf32>
    %233 = vector.shape_cast %232 : vector<1xf32> to vector<1x1xf32>
    %234 = tpu.reciprocal %233 : vector<1x1xf32> -> vector<1x1xf32>
    %235 = vector.broadcast %234 : vector<1x1xf32> to vector<1x10xf32>
    %236 = arith.mulf %231, %235 : vector<1x10xf32>
    %c0_213 = arith.constant 0 : index
    %c0_214 = arith.constant 0 : index
    %c0_215 = arith.constant 0 : index
    %237 = vector.load %arg16[%c0_213, %c0_214, %c0_215] : memref<1x1x10xf32, #tpu.memory_space<vmem>>, vector<1x1x10xf32>
    %238 = vector.shape_cast %237 : vector<1x1x10xf32> to vector<1x10xf32>
    %239 = vector.shape_cast %236 : vector<1x10xf32> to vector<1x1x10xf32>
    tpu.vector_store %arg16[%c0_213, %c0_214, %c0_215], %239 {strides = array<i32>} : memref<1x1x10xf32, #tpu.memory_space<vmem>>, vector<1x1x10xf32>,
    return
  }
  func.func @transform_0(%arg0: i32) -> (i32, i32, i32) {
    %c0_i32 = arith.constant 0 : i32
    %c0_i32_0 = arith.constant 0 : i32
    %c0_i32_1 = arith.constant 0 : i32
    return %arg0, %c0_i32, %c0_i32_0 : i32, i32, i32
  }
  func.func @transform_1(%arg0: i32) -> (i32, i32, i32) {
    %c0_i32 = arith.constant 0 : i32
    %c0_i32_0 = arith.constant 0 : i32
    %c0_i32_1 = arith.constant 0 : i32
    %c0_i32_2 = arith.constant 0 : i32
    return %c0_i32, %c0_i32_0, %c0_i32_1 : i32, i32, i32
  }
  func.func @transform_2(%arg0: i32) -> (i32, i32, i32) {
    %c0_i32 = arith.constant 0 : i32
    %c0_i32_0 = arith.constant 0 : i32
    %c0_i32_1 = arith.constant 0 : i32
    %c0_i32_2 = arith.constant 0 : i32
    return %c0_i32, %c0_i32_0, %c0_i32_1 : i32, i32, i32
  }
  func.func @transform_3(%arg0: i32) -> (i32, i32) {
    %c0_i32 = arith.constant 0 : i32
    %c0_i32_0 = arith.constant 0 : i32
    %c0_i32_1 = arith.constant 0 : i32
    return %c0_i32, %c0_i32_0 : i32, i32
  }
  func.func @transform_4(%arg0: i32) -> (i32, i32, i32) {
    %c0_i32 = arith.constant 0 : i32
    %c0_i32_0 = arith.constant 0 : i32
    %c0_i32_1 = arith.constant 0 : i32
    %c0_i32_2 = arith.constant 0 : i32
    return %c0_i32, %c0_i32_0, %c0_i32_1 : i32, i32, i32
  }
  func.func @transform_5(%arg0: i32) -> (i32, i32, i32) {
    %c0_i32 = arith.constant 0 : i32
    %c0_i32_0 = arith.constant 0 : i32
    %c0_i32_1 = arith.constant 0 : i32
    %c0_i32_2 = arith.constant 0 : i32
    return %c0_i32, %c0_i32_0, %c0_i32_1 : i32, i32, i32
  }
  func.func @transform_6(%arg0: i32) -> (i32, i32) {
    %c0_i32 = arith.constant 0 : i32
    %c0_i32_0 = arith.constant 0 : i32
    %c0_i32_1 = arith.constant 0 : i32
    return %c0_i32, %c0_i32_0 : i32, i32
  }
  func.func @transform_7(%arg0: i32) -> (i32, i32, i32) {
    %c0_i32 = arith.constant 0 : i32
    %c0_i32_0 = arith.constant 0 : i32
    %c0_i32_1 = arith.constant 0 : i32
    %c0_i32_2 = arith.constant 0 : i32
    return %c0_i32, %c0_i32_0, %c0_i32_1 : i32, i32, i32
  }
  func.func @transform_8(%arg0: i32) -> (i32, i32, i32) {
    %c0_i32 = arith.constant 0 : i32
    %c0_i32_0 = arith.constant 0 : i32
    %c0_i32_1 = arith.constant 0 : i32
    %c0_i32_2 = arith.constant 0 : i32
    return %c0_i32, %c0_i32_0, %c0_i32_1 : i32, i32, i32
  }
  func.func @transform_9(%arg0: i32) -> (i32, i32) {
    %c0_i32 = arith.constant 0 : i32
    %c0_i32_0 = arith.constant 0 : i32
    %c0_i32_1 = arith.constant 0 : i32
    return %c0_i32, %c0_i32_0 : i32, i32
  }
  func.func @transform_10(%arg0: i32) -> (i32, i32) {
    %c0_i32 = arith.constant 0 : i32
    %c0_i32_0 = arith.constant 0 : i32
    %c0_i32_1 = arith.constant 0 : i32
    return %c0_i32, %c0_i32_0 : i32, i32
  }
  func.func @transform_11(%arg0: i32) -> (i32, i32) {
    %c0_i32 = arith.constant 0 : i32
    %c0_i32_0 = arith.constant 0 : i32
    %c0_i32_1 = arith.constant 0 : i32
    return %c0_i32, %c0_i32_0 : i32, i32
  }
  func.func @transform_12(%arg0: i32) -> (i32, i32) {
    %c0_i32 = arith.constant 0 : i32
    %c0_i32_0 = arith.constant 0 : i32
    %c0_i32_1 = arith.constant 0 : i32
    return %c0_i32, %c0_i32_0 : i32, i32
  }
  func.func @transform_13(%arg0: i32) -> (i32, i32) {
    %c0_i32 = arith.constant 0 : i32
    %c0_i32_0 = arith.constant 0 : i32
    %c0_i32_1 = arith.constant 0 : i32
    return %c0_i32, %c0_i32_0 : i32, i32
  }
  func.func @transform_14(%arg0: i32) -> (i32, i32, i32) {
    %c0_i32 = arith.constant 0 : i32
    %c0_i32_0 = arith.constant 0 : i32
    %c0_i32_1 = arith.constant 0 : i32
    return %arg0, %c0_i32, %c0_i32_0 : i32, i32, i32
  }
  func.func @transform_15(%arg0: i32) -> (i32, i32, i32) {
    %c0_i32 = arith.constant 0 : i32
    %c0_i32_0 = arith.constant 0 : i32
    %c0_i32_1 = arith.constant 0 : i32
    return %arg0, %c0_i32, %c0_i32_0 : i32, i32, i32
  }
}

</mosaic_0001>

<bundles_post_ra>
// kernel: lenet5_forward.1
= control target key start
LH: loop header
LB: loop body
LE: loop exit
PB: predicated region body
PF: predicated region fallthrough
CT: control target
= control target key end

     0   :  { %s9260_s0 = inlined_call_operand.vmem [shape: f32[2,32,32], index: 0, kind: input, shape index: {}]   ;;  %s9261_s1 = inlined_call_operand.vmem [shape: bf16[5,28,32], index: 1, kind: input, shape index: {}]   ;;  %s9262_s2 = inlined_call_operand.vmem [shape: bf16[5,32,168], index: 2, kind: input, shape index: {}]   ;;  %s9263_s3 = inlined_call_operand.vmem [shape: f32[1,168], index: 3, kind: input, shape index: {}]   ;;  %s9264_s4 = inlined_call_operand.vmem [shape: bf16[10,10,28], index: 4, kind: input, shape index: {}]   ;;  %s9265_s5 = inlined_call_operand.vmem [shape: bf16[10,168,160], index: 5, kind: input, shape index: {}]   ;;  %s9266_s6 = inlined_call_operand.vmem [shape: f32[1,160], index: 6, kind: input, shape index: {}]   ;;  %s9267_s7 = inlined_call_operand.vmem [shape: bf16[10,1,10], index: 7, kind: input, shape index: {}]   ;;  %s9268_s8 = inlined_call_operand.vmem [shape: bf16[10,160,120], index: 8, kind: input, shape index: {}]   ;;  %s9269_s9 = inlined_call_operand.vmem [shape: f32[1,120], index: 9, kind: input, shape index: {}]   ;;  %s9270_s10 = inlined_call_operand.vmem [shape: bf16[120,84], index: 10, kind: input, shape index: {}]   ;;  %s9271_s11 = inlined_call_operand.vmem [shape: f32[1,84], index: 11, kind: input, shape index: {}]   ;;  %s9272_s12 = inlined_call_operand.vmem [shape: bf16[84,10], index: 12, kind: input, shape index: {}]   ;;  %s9273_s13 = inlined_call_operand.vmem [shape: f32[1,10], index: 13, kind: input, shape index: {}]   ;;  %s9274_s14 = inlined_call_operand.hbm [shape: f32[2,1,10], index: 14, kind: output, shape index: {0}]   ;;  %s9275_s15 = inlined_call_operand.hbm [shape: f32[2,1,10], index: 15, kind: output, shape index: {1}]  }
   0x1   :  { %9280 = sst [smem:[#allocation11_spill]] %s9260_s0 }
   0x2   :  { %9281 = sst [smem:[#allocation12_spill]] %s9261_s1 }
   0x3   :  { %9282 = sst [smem:[#allocation13_spill]] %s9262_s2 }
   0x4   :  { %9283 = sst [smem:[#allocation14_spill]] %s9263_s3 }
   0x5   :  { %9284 = sst [smem:[#allocation15_spill]] %s9264_s4 }
   0x6   :  { %21 = vsyncpa [#allocation3], 0 }
   0x7   :  { %23 = vsyncpa [#allocation3 + $0x1], 0 }
   0x8   :  { %24 = vsyncpa [#allocation5], 0 }
   0x9   :  { %26 = vsyncpa [#allocation5 + $0x1], 0  ;;  %s7581_s18 = smov 0   ;;  %s7583_s19 = smov 0  }
   0xa   :  { %s7585_s20 = smov 0   ;;  %s7587_s21 = smov 0  }
   0xb LB: > { %9285 = sst [smem:[#allocation8_spill]] %s7490_s20  ;;  %s7602_s22 = sadd.s32 4294967295, %s7494_s21   ;;  %s7494_s21 = sphi %s7587_s21, %s9296_s21   ;;  %s7490_s20 = sphi %s7585_s20, %s9301_s20   ;;  %s7486_s19 = sphi %s7583_s19, %s9300_s19   ;;  %s7482_s18 = sphi %s7581_s18, %s9299_s18  }
   0xc   : > { %s5824_s23 = sadd.s32 4294967294, %s7494_s21   ;;  %s7606_s24 = sadd.s32 1, %s7494_s21  }
   0xd   : > { %9286 = sst [smem:[#allocation9_spill]] %s7606_s24  ;;  %s338_s25 = sadd.s32 1, %s7490_s20 }
   0xe   : > { %s335_s26 = ssub.s32 %s7494_s21, %s7606_s24  ;;  %p348_p0 = scmp.ne.s32.totalorder %s7490_s20, %s7486_s19 }
   0xf   : > { %p336_p1 = scmp.eq.s32.totalorder %s335_s26, 0  ;;  %p349_p2 = scmp.eq.s32.totalorder %s7602_s22, 1 }
  0x10   : > { %p354_p3 = scmp.ne.s32.totalorder %s7486_s19, %s7482_s18  ;;  %p355_p4 = scmp.eq.s32.totalorder %s5824_s23, 1 }
  0x11   : > { %s7617_s27 = scalar_select %p336_p1, %s7490_s20, %s338_s25  }
  0x12   : > { %p7619_p5 = por %p349_p2, %p348_p0  ;;  %p7623_p6 = por %p355_p4, %p354_p3 }
  0x13   : > { %9287 = sst [smem:[#allocation10_spill]] %s7617_s27  ;;  %p5827_p7 = scmp.ge.s32.totalorder %s7494_s21, 1 }
  0x14   : > { %p446_p8 = scmp.lt.s32.totalorder %s7494_s21, 3 }
  0x16   : > { %p447_p9 = pnand %p5827_p7, %p446_p8 }
  0x17   : > { %p497_p10 = scmp.lt.s32.totalorder (!%p447_p9), %s7602_s22, 1  ;;  %s9290_s1 = sld [smem:[#allocation12_spill]] (!%p447_p9) }
  0x18   : > { %450 = sbr.rel (%p447_p9) target bundleno = 4171 (0x104b), region = 76  ;;  %s9291_s0 = sld [smem:[#allocation11_spill]] (!%p447_p9) }
  0x19   : > { %s9292_s2 = sld [smem:[#allocation13_spill]] (!%p447_p9)  ;;  %s9195_s30 = sand.u32 (!%p447_p9), 1, %s7486_s19  }
  0x1a   : > { %s9293_s3 = sld [smem:[#allocation14_spill]] (!%p447_p9)  ;;  %s490_s17 = scalar_lea.vmem (!%p447_p9), [#allocation2], %s9195_s30 }
  0x1b   : > { %s9294_s4 = sld [smem:[#allocation15_spill]] (!%p447_p9)  ;;  %s9279_s23 = sshll.u32 (!%p447_p9), %s7602_s22, 4 }
  0x1c   : > { %s5726_s20 = scalar_lea.hbm (!%p447_p9), %s9274_s14, %s9279_s23  ;;  %s5712_s27 = scalar_lea.sflag (!%p447_p9), [#allocation3], %s9195_s30 }
  0x1d   : > { %v6888_v0 = vld [vmem:[%s9290_s1] sm:$0xff]   ;;  %vm523_vm0 = vcmask 261120   ;;  %v6889_v1 = vld [vmem:[%s9290_s1 + $0x10] sm:$0xff]   ;;  %s498_s25 = scalar_select %p497_p10, %s7602_s22, 1  ;;  %v6890_v8 = vld [vmem:[%s9290_s1 + $0x8] sm:$0x3f]  }
  0x1e   : > { %6769 = vmatprep.mubr.msk.bf16.mxu0 %vm523_vm0, %v6888_v0  ;;  %6777 = vmatprep.mubr.msk.bf16.mxu1 %vm523_vm0, %v6889_v1  ;;  %v6891_v9 = vld [vmem:[%s9290_s1 + $0x18] sm:$0x3f]   ;;  %v7496_v18 = vmov 0   ;;  %v6904_v30 = vld [vmem:[%s9290_s1 + $0x20] sm:$0xff]   ;;  %v6905_v32 = vld [vmem:[%s9290_s1 + $0x28] sm:$0x3f]  }
  0x1f   : > { %s6728_s26 = sshll.u32 %s498_s25, 5  ;;  %v6894_v10 = vld [vmem:[%s9292_s2 + $0x34] ss:$8 sps:$4 sm:$0xff]   ;;  %v6892_v12 = vld [vmem:[%s9292_s2 + $0x30] ss:$8 sps:$4 sm:$0xff]   ;;  %vm1615_vm1 = vcmask 1043456  }
  0x20   : > { %s501_s24 = scalar_lea.vmem %s9291_s0, %s6728_s26  ;;  %v6897_v11 = vld [vmem:[%s9292_s2 + $0x14] ss:$8 sps:$4 sm:$0xff]   ;;  %v6895_v13 = vld [vmem:[%s9292_s2 + $0x10] ss:$8 sps:$4 sm:$0xff]   ;;  %v6900_v14 = vld [vmem:[%s9292_s2 + $0x24] ss:$8 sps:$4 sm:$0xff]  }
  0x21   : > { %v505_v2 = vld [vmem:[%s501_s24 + $0x10] sm:$0xff]  ;;  %v506_v3 = vld [vmem:[%s501_s24 + $0x18] sm:$0xff]  ;;  %v503_v4 = vld [vmem:[%s501_s24] sm:$0xff]  ;;  %vm1355_vm2 = vcmask 1045504   ;;  %vm1351_vm3 = vcmask 228352   ;;  %vm1611_vm4 = vcmask 326656  }
  0x22   : > { %v7642_v5 = vpack.c.bf16 %v506_v3, %v505_v2  ;;  %v504_v6 = vld [vmem:[%s501_s24 + $0x8] sm:$0xff]  ;;  %v6906_v33 = vld [vmem:[%s9290_s1 + $0x30] sm:$0xff]   ;;  %v6907_v34 = vld [vmem:[%s9290_s1 + $0x38] sm:$0x3f]   ;;  %vm3761_vm5 = vcmask 1044480   ;;  %vm3757_vm6 = vcmask 80896  }
  0x23   : > { %v7644_v7 = vpack.c.bf16 %v504_v6, %v503_v4  ;;  %v6903_v15 = vld [vmem:[%s9292_s2 + $0x4] ss:$8 sps:$4 sm:$0xff]   ;;  %v6898_v16 = vld [vmem:[%s9292_s2 + $0x20] ss:$8 sps:$4 sm:$0xff]   ;;  %v6910_v35 = vld [vmem:[%s9292_s2 + $0x54] ss:$8 sps:$4 sm:$0xff]  }
  0x24   : > { %6765 = vmatprep.subr.bf16.mxu0 %v7642_v5  ;;  %6773 = vmatprep.subr.bf16.mxu1 %v7642_v5  ;;  %v6901_v17 = vld [vmem:[%s9292_s2] ss:$8 sps:$4 sm:$0xff]   ;;  %v6908_v36 = vld [vmem:[%s9292_s2 + $0x50] ss:$8 sps:$4 sm:$0xff]   ;;  %v6913_v37 = vld [vmem:[%s9292_s2 + $0x44] ss:$8 sps:$4 sm:$0xff]  }
  0x25   : > { %6766 = vmatpush3.bf16.msra.mxu0 %v7642_v5  ;;  %6774 = vmatpush3.bf16.msra.mxu1 %v7642_v5  ;;  %v6911_v38 = vld [vmem:[%s9292_s2 + $0x40] ss:$8 sps:$4 sm:$0xff]   ;;  %v6916_v39 = vld [vmem:[%s9292_s2 + $0x74] ss:$8 sps:$4 sm:$0xff]   ;;  %v6914_v40 = vld [vmem:[%s9292_s2 + $0x70] ss:$8 sps:$4 sm:$0xff]  }
  0x26   : > { %6767 = vmatprep.subr.bf16.mxu0 %v7644_v7  ;;  %6775 = vmatprep.subr.bf16.mxu1 %v7644_v7  ;;  %v6919_v41 = vld [vmem:[%s9292_s2 + $0x64] ss:$8 sps:$4 sm:$0xff]   ;;  %v6917_v42 = vld [vmem:[%s9292_s2 + $0x60] ss:$8 sps:$4 sm:$0xff]   ;;  %vm7498_vm7 = vmmov 0   ;;  %vm5653_vm8 = vcmask 1041408  }
  0x27   : > { %vm5555_vm9 = vcmask 982016   ;;  %vm5649_vm10 = vcmask 687104   ;;  %vm5697_vm11 = vcmask 73728   ;;  %s5728_s0 = sshll.u32 %s490_s17, 4  ;;  %s7499_s16 = smov [#allocation2]   ;;  %s5729_s0 = int_to_ptr.vmem [resolvable:$true] %s5728_s0 }
  0x28   : > { %s7404_s24 = scalar_lea.vmem %s5729_s0, 16 }
  0x29   : > { %6768 = vmatpush3.bf16.msra.mxu0 %v7644_v7  ;;  %6776 = vmatpush3.bf16.msra.mxu1 %v7644_v7  ;;  %p7405_p11 = scmp.ne.s32.totalorder %s5729_s0, %s7404_s24 }
  0x2a   : > { %700 = vmatprep.subr.bf16.mxu0 %v6894_v10  ;;  %779 = vmatprep.subr.bf16.mxu1 %v6897_v11 }
  0x2b   : > { %p7406_p12 = pnand %p7405_p11, %p7619_p5 }
  0x2c   : > { %6770 = vmatmul.mubr.msk.bf16.vlgmr.msra.gmra.mxu0 %vm523_vm0, %v6890_v8  ;;  %6778 = vmatmul.mubr.msk.bf16.vlgmr.msra.gmra.mxu1 %vm523_vm0, %v6891_v9 }
  0x2d   : > { %701 = vmatpush1.bf16.msra.mxu0 %v6892_v12  ;;  %780 = vmatpush1.bf16.msra.mxu1 %v6895_v13  ;;  %v6920_v12 = vld [vmem:[%s9290_s1 + $0x40] sm:$0xff]   ;;  %p7407_p13 = pneg %p7406_p12 }
  0x2e   : > { %702 = vmatprep.subr.bf16.mxu0 %v6900_v14  ;;  %781 = vmatprep.subr.bf16.mxu1 %v6903_v15  ;;  %v6921_v15 = vld [vmem:[%s9290_s1 + $0x48] sm:$0x3f]   ;;  %s7408_s1 = sshll.u32 %s7499_s16, 4  ;;  %s7409_s1 = int_to_ptr.vmem [resolvable:$false] %s7408_s1 }
  0x2f   : > { %720 = vmatprep.mubr.bf16.mxu0 %v7496_v18  ;;  %799 = vmatprep.mubr.bf16.mxu1 %v7496_v18  ;;  %p7411_p0 = scmp.lt.s32.totalorder %s5729_s0, %s7409_s1 }
  0x31   : > { %703 = vmatpush1.bf16.msra.mxu0 %v6898_v16  ;;  %782 = vmatpush1.bf16.msra.mxu1 %v6901_v17  ;;  %v6922_v16 = vld [vmem:[%s9292_s2 + $0x90] ss:$8 sps:$4 sm:$0xff]   ;;  %v6927_v17 = vld [vmem:[%s9292_s2 + $0x84] ss:$8 sps:$4 sm:$0xff]  }
  0x32   : > { %6781 = vmatprep.subr.bf16.mxu0 %v7642_v5  ;;  %935 = vmatprep.subr.bf16.mxu1 %v6910_v35 }
  0xec   : > { %v6771_v19 = vpop.f32.mrf.mxu0  ;;  %v6779_v20 = vpop.f32.mrf.mxu1 }
  0xee   : > { %v564_v21 = vpop.f32.mrf.mxu0  ;;  %v640_v22 = vpop.f32.mrf.mxu1 }
  0xf0   : > { %v6772_v23 = vpop.f32.mrf.mxu0  ;;  %v6780_v24 = vpop.f32.mrf.mxu1 }
  0xf1   : > { %v580_v29 = vpack.c.bf16 %v6772_v23, %v6771_v19  ;;  %v656_v31 = vpack.c.bf16 %v6780_v24, %v6779_v20  ;;  %v6925_v19 = vld [vmem:[%s9292_s2 + $0x80] ss:$8 sps:$4 sm:$0xff]   ;;  %v6930_v20 = vld [vmem:[%s9265_s5 + $0x11c] ss:$8 sps:$4 sm:$0xff]  }
  0xf2   : > { %v567_v25 = vpop.f32.mrf.mxu0  ;;  %v643_v26 = vpop.f32.mrf.mxu1 }
  0xf3   : > { %v579_v27 = vpack.c.bf16 %v567_v25, %v564_v21  ;;  %v655_v28 = vpack.c.bf16 %v643_v26, %v640_v22 }
  0xf5   : > { %5850 = vmatmul.mubr.msk.bf16.vlgmr.msra.gmra.mxu0 %vm523_vm0, %v655_v28  ;;  %5856 = vmatmul.mubr.msk.bf16.vlgmr.msra.gmra.mxu1 %vm523_vm0, %v579_v27 }
  0xf6   : > { %730 = vmatprep.mubr.bf16.mxu0 %v7496_v18  ;;  %809 = vmatprep.mubr.bf16.mxu1 %v7496_v18 }
  0xf7   : > { %6782 = vmatpush3.bf16.msra.mxu0 %v7642_v5  ;;  %936 = vmatpush1.bf16.msra.mxu1 %v6908_v36 }
  0xf8   : > { %6783 = vmatprep.subr.bf16.mxu0 %v7644_v7  ;;  %937 = vmatprep.subr.bf16.mxu1 %v6913_v37 }
  0xfb   : > { %6784 = vmatpush3.bf16.msra.mxu0 %v7644_v7  ;;  %938 = vmatpush1.bf16.msra.mxu1 %v6911_v38 }
  0xfc   : > { %6789 = vmatprep.subr.bf16.mxu0 %v7642_v5  ;;  %6797 = vmatprep.subr.bf16.mxu1 %v7642_v5 }
  0xfd   : > { %5851 = vmatmul.mubr.msk.bf16.gmra.mxu0 %vm523_vm0, %v656_v31  ;;  %5857 = vmatmul.mubr.msk.bf16.gmra.mxu1 %vm523_vm0, %v580_v29 }
  0xfe   : > { %6785 = vmatprep.mubr.msk.bf16.mxu0 %vm523_vm0, %v6904_v30  ;;  %955 = vmatprep.mubr.bf16.mxu1 %v7496_v18 }
 0x105   : > { %6786 = vmatmul.mubr.msk.bf16.vlgmr.msra.gmra.mxu0 %vm523_vm0, %v6905_v32 }
 0x106   : > { %6790 = vmatpush3.bf16.msra.mxu0 %v7642_v5  ;;  %6793 = vmatprep.mubr.msk.bf16.mxu0 %vm523_vm0, %v6906_v33 }
 0x107   : > { %6791 = vmatprep.subr.bf16.mxu0 %v7644_v7 }
 0x10a   : > { %6792 = vmatpush3.bf16.msra.mxu0 %v7644_v7 }
 0x10b   : > { %1099 = vmatprep.subr.bf16.mxu0 %v6916_v39 }
 0x10d   : > { %6794 = vmatmul.mubr.msk.bf16.vlgmr.msra.gmra.mxu0 %vm523_vm0, %v6907_v34 }
 0x10e   : > { %1119 = vmatprep.mubr.bf16.mxu0 %v7496_v18  ;;  %1100 = vmatpush1.bf16.msra.mxu0 %v6914_v40 }
 0x10f   : > { %1101 = vmatprep.subr.bf16.mxu0 %v6919_v41 }
 0x112   : > { %1102 = vmatpush1.bf16.msra.mxu0 %v6917_v42 }
 0x1b5   : > { %v722_v43 = vpop.f32.mrf.mxu0  ;;  %v801_v44 = vpop.f32.mrf.mxu1 }
 0x1b6   : > { %v802_v45 = vadd.f32 %v801_v44, %v722_v43  ;;  %v6928_v43 = vld [vmem:[%s9265_s5 + $0x118] ss:$8 sps:$4 sm:$0xff]  }
 0x1b7   : > { %v724_v46 = vpop.f32.mrf.mxu0  ;;  %v803_v47 = vpop.f32.mrf.mxu1 }
 0x1b8   : > { %v804_v48 = vadd.f32 %v803_v47, %v724_v46  ;;  %v6931_v46 = vld [vmem:[%s9265_s5 + $0x108] ss:$8 sps:$4 sm:$0xff]  }
 0x1b9   : > { %v726_v49 = vpop.f32.mrf.mxu0  ;;  %v805_v50 = vpop.f32.mrf.mxu1 }
 0x1ba   : > { %v806_v51 = vadd.f32 %v805_v50, %v726_v49  ;;  %v6934_v49 = vld [vmem:[%s9265_s5 + $0xf8] ss:$8 sps:$4 sm:$0xff]   ;;  %v6939_v50 = vld [vmem:[%s9265_s5 + $0xec] ss:$8 sps:$4 sm:$0xff]  }
 0x1bb   : > { %v728_v52 = vpop.f32.mrf.mxu0  ;;  %v807_v53 = vpop.f32.mrf.mxu1 }
 0x1bc   : > { %v808_v54 = vadd.f32 %v807_v53, %v728_v52  ;;  %v6942_v52 = vld [vmem:[%s9265_s5 + $0xdc] ss:$8 sps:$4 sm:$0xff]   ;;  %v6940_v53 = vld [vmem:[%s9265_s5 + $0xd8] ss:$8 sps:$4 sm:$0xff]  }
 0x1bd   : > { %v732_v55 = vpop.f32.mrf.mxu0  ;;  %v811_v56 = vpop.f32.mrf.mxu1 }
 0x1be   : > { %v812_v57 = vadd.f32 %v811_v56, %v732_v55  ;;  %v6943_v55 = vld [vmem:[%s9265_s5 + $0xc8] ss:$8 sps:$4 sm:$0xff]   ;;  %v6948_v56 = vld [vmem:[%s9265_s5 + $0xbc] ss:$8 sps:$4 sm:$0xff]  }
 0x1bf   : > { %v734_v58 = vpop.f32.mrf.mxu0  ;;  %v813_v59 = vpop.f32.mrf.mxu1 }
 0x1c0   : > { %v814_v60 = vadd.f32 %v813_v59, %v734_v58  ;;  %v6951_v58 = vld [vmem:[%s9265_s5 + $0xac] ss:$8 sps:$4 sm:$0xff]   ;;  %v6949_v59 = vld [vmem:[%s9265_s5 + $0xa8] ss:$8 sps:$4 sm:$0xff]  }
 0x1c1   : > { %v736_v61 = vpop.f32.mrf.mxu0  ;;  %v815_v62 = vpop.f32.mrf.mxu1 }
 0x1c2   : > { %v816_v63 = vadd.f32 %v815_v62, %v736_v61 }
 0x1c3   : > { %v738_v0 = vpop.f32.mrf.mxu0  ;;  %v817_v21 = vpop.f32.mrf.mxu1 }
 0x1c4   : > { %v818_v35 = vadd.f32 %v817_v21, %v738_v0  ;;  %v6956_v0 = vld [vmem:[%s9265_s5 + $0x13c] ss:$8 sps:$4 sm:$0xff]  }
 0x1c5   : > { %v6787_v1 = vpop.f32.mrf.mxu0 }
 0x1c7   : > { %v875_v2 = vpop.f32.mrf.mxu0 }
 0x1c9   : > { %v6788_v3 = vpop.f32.mrf.mxu0 }
 0x1ca   : > { %v891_v13 = vpack.c.bf16 %v6788_v3, %v6787_v1  ;;  %v6954_v1 = vld [vmem:[%s9265_s5 + $0x138] ss:$8 sps:$4 sm:$0xff]   ;;  %v6957_v3 = vld [vmem:[%s9265_s5 + $0x128] ss:$8 sps:$4 sm:$0xff]  }
 0x1cb   : > { %v878_v4 = vpop.f32.mrf.mxu0 }
 0x1cc   : > { %v890_v6 = vpack.c.bf16 %v878_v4, %v875_v2  ;;  %v6959_v2 = vld [vmem:[%s9265_s5 + $0x12c] ss:$8 sps:$4 sm:$0xff]  }
 0x1cd   : > { %v6795_v8 = vpop.f32.mrf.mxu0 }
 0x1ce   : > { %5874 = vmatmul.mubr.msk.bf16.vlgmr.msra.gmra.mxu1 %vm523_vm0, %v890_v6 }
 0x1cf   : > { %v1039_v9 = vpop.f32.mrf.mxu0  ;;  %965 = vmatprep.mubr.bf16.mxu1 %v7496_v18  ;;  %6798 = vmatpush3.bf16.msra.mxu1 %v7642_v5 }
 0x1d0   : > { %6799 = vmatprep.subr.bf16.mxu1 %v7644_v7 }
 0x1d1   : > { %v6796_v10 = vpop.f32.mrf.mxu0 }
 0x1d2   : > { %v1055_v5 = vpack.c.bf16 %v6796_v10, %v6795_v8  ;;  %v1314_v8 = vlaneseq }
 0x1d3   : > { %v1042_v11 = vpop.f32.mrf.mxu0  ;;  %6800 = vmatpush3.bf16.msra.mxu1 %v7644_v7  ;;  %v6924_v7 = vld [vmem:[%s9292_s2 + $0x94] ss:$8 sps:$4 sm:$0xff]   ;;  %s7410_s2 = scalar_lea.vmem %s7409_s1, 32 }
 0x1d4   : > { %v1054_v14 = vpack.c.bf16 %v1042_v11, %v1039_v9  ;;  %1263 = vmatprep.subr.bf16.mxu1 %v6924_v7  ;;  %v7860_v10 = vshrl.u32 %v1314_v8, 7  ;;  %v6965_v8 = vld [vmem:[%s9265_s5 + $0x60] ss:$8 sps:$4 sm:$0xff]   ;;  %p7412_p1 = scmp.lt.s32.totalorder %s7410_s2, %s7404_s24 }
 0x1d6   : > { %5875 = vmatmul.mubr.msk.bf16.gmra.mxu1 %vm523_vm0, %v891_v13  ;;  %5892 = vmatmul.mubr.msk.bf16.vlgmr.msra.gmra.mxu0 %vm523_vm0, %v1054_v14  ;;  %v1312_v13 = vld [vmem:[%s9293_s3] sm:$0x3]  ;;  %p7413_p2 = por %p7412_p1, %p7411_p0 }
 0x1d7   : > { %1129 = vmatprep.mubr.bf16.mxu0 %v7496_v18  ;;  %6801 = vmatprep.mubr.msk.bf16.mxu1 %vm523_vm0, %v6920_v12  ;;  %v1316_v12 = vsub.s32 0, %v7860_v10 }
 0x1d8   : > { %p7414_p3 = pnand %p7413_p2, %p7407_p13 }
 0x1de   : > { %5893 = vmatmul.mubr.msk.bf16.gmra.mxu0 %vm523_vm0, %v1055_v5  ;;  %6802 = vmatmul.mubr.msk.bf16.vlgmr.msra.gmra.mxu1 %vm523_vm0, %v6921_v15  ;;  %v1320_v5 = vsub.s32 1, %v7860_v10 }
 0x1df   : > { %1283 = vmatprep.mubr.bf16.mxu1 %v7496_v18  ;;  %1394 = vmatprep.mubr.bf16.mxu0 %v7496_v18 }
 0x1e0   : > { %1264 = vmatpush1.bf16.msra.mxu1 %v6922_v16  ;;  %v1317_v16 = vrot.slane %v1312_v13, %v1316_v12 }
 0x1e1   : > { %1265 = vmatprep.subr.bf16.mxu1 %v6927_v17 }
 0x1e4   : > { %1266 = vmatpush1.bf16.msra.mxu1 %v6925_v19 }
 0x1e5   : > { %1622 = vmatprep.subr.bf16.mxu1 %v6930_v20 }
 0x28e   : > { %v957_v22 = vpop.f32.mrf.mxu1 }
 0x28f   : > { %v7779_v23 = vadd.f32 %v957_v22, %v802_v45  ;;  %v6933_v45 = vld [vmem:[%s9265_s5 + $0x10c] ss:$8 sps:$4 sm:$0xff]   ;;  %v1321_v22 = vrot.slane %v1312_v13, %v1320_v5 }
 0x290   : > { %v959_v24 = vpop.f32.mrf.mxu1  ;;  %v6973_v13 = vld [vmem:[%s9265_s5 + $0x44] ss:$8 sps:$4 sm:$0xff]  }
 0x291   : > { %v7781_v25 = vadd.f32 %v959_v24, %v804_v48  ;;  %v6936_v48 = vld [vmem:[%s9265_s5 + $0xfc] ss:$8 sps:$4 sm:$0xff]  }
 0x292   : > { %v961_v26 = vpop.f32.mrf.mxu1 }
 0x293   : > { %v7783_v27 = vadd.f32 %v961_v26, %v806_v51  ;;  %v6937_v51 = vld [vmem:[%s9265_s5 + $0xe8] ss:$8 sps:$4 sm:$0xff]  }
 0x294   : > { %v963_v28 = vpop.f32.mrf.mxu1 }
 0x295   : > { %v7785_v29 = vadd.f32 %v963_v28, %v808_v54  ;;  %v6945_v54 = vld [vmem:[%s9265_s5 + $0xcc] ss:$8 sps:$4 sm:$0xff]  }
 0x296   : > { %v967_v30 = vpop.f32.mrf.mxu1  ;;  %v1121_v4 = vpop.f32.mrf.mxu0 }
 0x297   : > { %v7787_v31 = vadd.f32 %v967_v30, %v812_v57  ;;  %v6946_v57 = vld [vmem:[%s9265_s5 + $0xb8] ss:$8 sps:$4 sm:$0xff]   ;;  %v1140_v15 = vadd.f32 %v1121_v4, %v7779_v23 }
 0x298   : > { %v969_v32 = vpop.f32.mrf.mxu1  ;;  %v1123_v6 = vpop.f32.mrf.mxu0  ;;  %v6962_v4 = vld [vmem:[%s9265_s5 + $0x70] ss:$8 sps:$4 sm:$0xff]  }
 0x299   : > { %v7789_v33 = vadd.f32 %v969_v32, %v814_v60  ;;  %v5940_v60 = vld [vmem:[%s9265_s5 + $0x148] sm:$0xff]  ;;  %v1141_v17 = vadd.f32 %v1123_v6, %v7781_v25 }
 0x29a   : > { %v971_v34 = vpop.f32.mrf.mxu1  ;;  %v5962_v61 = vcombine.high %v5940_v60, %v5940_v60  ;;  %v5961_v62 = vcombine.low %v5940_v60, %v5940_v60  ;;  %v1125_v9 = vpop.f32.mrf.mxu0  ;;  %v6967_v6 = vld [vmem:[%s9265_s5 + $0x64] ss:$8 sps:$4 sm:$0xff]  }
 0x29b   : > { %v7791_v36 = vadd.f32 %v971_v34, %v816_v63  ;;  %v1142_v24 = vadd.f32 %v1125_v9, %v7783_v27  ;;  %v6970_v9 = vld [vmem:[%s9265_s5 + $0x54] ss:$8 sps:$4 sm:$0xff]  }
 0x29c   : > { %v973_v37 = vpop.f32.mrf.mxu1  ;;  %v1617_v63 = vsel %vm1615_vm1, %v5961_v62, 0  ;;  %v1127_v11 = vpop.f32.mrf.mxu0 }
 0x29d   : > { %v7793_v38 = vadd.f32 %v973_v37, %v818_v35  ;;  %v1143_v32 = vadd.f32 %v1127_v11, %v7785_v29  ;;  %v6968_v11 = vld [vmem:[%s9265_s5 + $0x50] ss:$8 sps:$4 sm:$0xff]  }
 0x29e   : > { %v6803_v39 = vpop.f32.mrf.mxu1  ;;  %v1131_v14 = vpop.f32.mrf.mxu0 }
 0x2a0   : > { %v1203_v40 = vpop.f32.mrf.mxu1  ;;  %v1133_v20 = vpop.f32.mrf.mxu0 }
 0x2a2   : > { %v6804_v41 = vpop.f32.mrf.mxu1  ;;  %v1135_v34 = vpop.f32.mrf.mxu0 }
 0x2a3   : > { %v1219_v47 = vpack.c.bf16 %v6804_v41, %v6803_v39  ;;  %v1144_v39 = vadd.f32 %v1131_v14, %v7787_v31  ;;  %v1146_v29 = vadd.f32 %v1135_v34, %v7791_v36  ;;  %v6971_v14 = vld [vmem:[%s9265_s5 + $0x40] ss:$8 sps:$4 sm:$0xff]   ;;  %v6993_v34 = vld [vmem:[%s9265_s5 + $0x84] ss:$8 sps:$4 sm:$0xff]  }
 0x2a4   : > { %v1206_v42 = vpop.f32.mrf.mxu1 }
 0x2a5   : > { %v1218_v44 = vpack.c.bf16 %v1206_v42, %v1203_v40  ;;  %v1145_v42 = vadd.f32 %v1133_v20, %v7789_v33  ;;  %v6980_v20 = vld [vmem:[%s9265_s5 + $0x10] ss:$8 sps:$4 sm:$0xff]  }
 0x2a7   : > { %5910 = vmatmul.mubr.msk.bf16.vlgmr.msra.gmra.mxu1 %vm523_vm0, %v1218_v44  ;;  %v1137_v44 = vpop.f32.mrf.mxu0 }
 0x2a8   : > { %1293 = vmatprep.mubr.bf16.mxu1 %v7496_v18  ;;  %1623 = vmatpush1.bf16.msra.mxu1 %v6928_v43  ;;  %v1147_v31 = vadd.f32 %v1137_v44, %v7793_v38 }
 0x2a9   : > { %1624 = vmatprep.subr.bf16.mxu1 %v6933_v45 }
 0x2ac   : > { %1625 = vmatpush1.bf16.msra.mxu1 %v6931_v46 }
 0x2ad   : > { %1626 = vmatprep.subr.bf16.mxu1 %v6936_v48 }
 0x2af   : > { %5911 = vmatmul.mubr.msk.bf16.gmra.mxu1 %vm523_vm0, %v1219_v47 }
 0x2b0   : > { %1627 = vmatpush1.bf16.msra.mxu1 %v6934_v49 }
 0x2b1   : > { %1628 = vmatprep.subr.bf16.mxu1 %v6939_v50 }
 0x2b4   : > { %1629 = vmatpush1.bf16.msra.mxu1 %v6937_v51 }
 0x2b5   : > { %1630 = vmatprep.subr.bf16.mxu1 %v6942_v52 }
 0x2b8   : > { %1631 = vmatpush1.bf16.msra.mxu1 %v6940_v53 }
 0x2b9   : > { %1632 = vmatprep.subr.bf16.mxu1 %v6945_v54 }
 0x2bc   : > { %1633 = vmatpush1.bf16.msra.mxu1 %v6943_v55 }
 0x2bd   : > { %1634 = vmatprep.subr.bf16.mxu1 %v6948_v56 }
 0x2c0   : > { %1635 = vmatpush1.bf16.msra.mxu1 %v6946_v57 }
 0x2c1   : > { %1636 = vmatprep.subr.bf16.mxu1 %v6951_v58 }
 0x2c4   : > { %1637 = vmatpush1.bf16.msra.mxu1 %v6949_v59 }
 0x2c5   : > { %5963 = vmatprep.subr.msk.bf16.mxu1 %vm1615_vm1, %v5962_v61 }
 0x2c8   : > { %1649 = vmatpush2.bf16.msra.mxu1 %v1617_v63 }
 0x2c9   : > { %1650 = vmatprep.subr.bf16.mxu1 %v6956_v0 }
 0x2cc   : > { %1651 = vmatpush2.bf16.msra.mxu1 %v6954_v1  ;;  %v6960_v1 = vld [vmem:[%s9294_s4] sm:$0x1f]  }
 0x2cd   : > { %1652 = vmatprep.subr.bf16.mxu1 %v6959_v2  ;;  %v6964_v2 = vld [vmem:[%s9265_s5 + $0x74] ss:$8 sps:$4 sm:$0xff]  }
 0x2d0   : > { %1653 = vmatpush2.bf16.msra.mxu1 %v6957_v3  ;;  %v6961_v3 = vld [vmem:[%s9294_s4 + $0x8] sm:$0x1f]  }
 0x367   : > { %v1285_v7 = vpop.f32.mrf.mxu1 }
 0x368   : > { %v1304_v19 = vadd.f32 %v1285_v7, %v1140_v15  ;;  %v6976_v15 = vld [vmem:[%s9265_s5 + $0x34] ss:$8 sps:$4 sm:$0xff]   ;;  %v6974_v7 = vld [vmem:[%s9265_s5 + $0x30] ss:$8 sps:$4 sm:$0xff]  }
 0x369   : > { %v1287_v21 = vpop.f32.mrf.mxu1 }
 0x36a   : > { %v1305_v26 = vadd.f32 %v1287_v21, %v1141_v17  ;;  %v1324_v28 = vadd.f32 %v1317_v16, %v1304_v19  ;;  %v6977_v17 = vld [vmem:[%s9265_s5 + $0x20] ss:$8 sps:$4 sm:$0xff]   ;;  %v6982_v19 = vld [vmem:[%s9265_s5 + $0x14] ss:$8 sps:$4 sm:$0xff]   ;;  %v6985_v21 = vld [vmem:[%s9265_s5 + $0x4] ss:$8 sps:$4 sm:$0xff]  }
 0x36b   : > { %v1289_v30 = vpop.f32.mrf.mxu1 }
 0x36c   : > { %v1306_v23 = vadd.f32 %v1289_v30, %v1142_v24  ;;  %v1325_v35 = vadd.f32 %v1321_v22, %v1305_v26  ;;  %7372 = vtanh.f32 %v1324_v28  ;;  %v6983_v24 = vld [vmem:[%s9265_s5] ss:$8 sps:$4 sm:$0xff]  }
 0x36d   : > { %v1291_v37 = vpop.f32.mrf.mxu1 }
 0x36e   : > { %v1326_v25 = vadd.f32 %v1317_v16, %v1306_v23  ;;  %v1307_v40 = vadd.f32 %v1291_v37, %v1143_v32  ;;  %v6990_v32 = vld [vmem:[%s9265_s5 + $0x94] ss:$8 sps:$4 sm:$0xff]   ;;  %v6988_v23 = vld [vmem:[%s9265_s5 + $0x90] ss:$8 sps:$4 sm:$0xff]  }
 0x36f   : > { %v1295_v41 = vpop.f32.mrf.mxu1 }
 0x370   : > { %7374 = vtanh.f32 %v1326_v25  ;;  %v1327_v43 = vadd.f32 %v1321_v22, %v1307_v40  ;;  %v1308_v27 = vadd.f32 %v1295_v41, %v1144_v39 }
 0x371   : > { %7376 = vtanh.f32 %v1325_v35  ;;  %v1297_v45 = vpop.f32.mrf.mxu1  ;;  %v6991_v35 = vld [vmem:[%s9265_s5 + $0x80] ss:$8 sps:$4 sm:$0xff]  }
 0x372   : > { %7378 = vtanh.f32 %v1327_v43  ;;  %v1309_v46 = vadd.f32 %v1297_v45, %v1145_v42  ;;  %v1328_v47 = vadd.f32 %v1317_v16, %v1308_v27  ;;  %v6996_v45 = vld [vmem:[%s9265_s5 + $0x26c] ss:$8 sps:$4 sm:$0xff]  }
 0x373   : > { %v1299_v48 = vpop.f32.mrf.mxu1 }
 0x374   : > { %v1310_v49 = vadd.f32 %v1299_v48, %v1146_v29  ;;  %v1329_v50 = vadd.f32 %v1321_v22, %v1309_v46  ;;  %7380 = vtanh.f32 %v1328_v47  ;;  %v6997_v46 = vld [vmem:[%s9294_s4 + $0x18] sm:$0x1f]   ;;  %v6994_v48 = vld [vmem:[%s9265_s5 + $0x268] ss:$8 sps:$4 sm:$0xff]  }
 0x375   : > { %v1301_v51 = vpop.f32.mrf.mxu1 }
 0x376   : > { %v1330_v52 = vadd.f32 %v1317_v16, %v1310_v49  ;;  %v1311_v53 = vadd.f32 %v1301_v51, %v1147_v31  ;;  %v6979_v16 = vld [vmem:[%s9265_s5 + $0x24] ss:$8 sps:$4 sm:$0xff]  }
 0x377   : > { %v7000_v49 = vld [vmem:[%s9265_s5 + $0x25c] ss:$8 sps:$4 sm:$0xff]  }
 0x378   : > { %7382 = vtanh.f32 %v1330_v52  ;;  %v1331_v33 = vadd.f32 %v1321_v22, %v1311_v53  ;;  %v1427_v22 = vld [vmem:[%s9265_s5 + $0xa0] sm:$0xff]  ;;  %v7006_v52 = vld [vmem:[%s9265_s5 + $0x24c] ss:$8 sps:$4 sm:$0xff]  }
 0x379   : > { %7384 = vtanh.f32 %v1329_v50  ;;  %v7373_v54 = vpop.eup %7372  ;;  %v5986_v26 = vcombine.high %v1427_v22, %v1427_v22  ;;  %v5985_v28 = vcombine.low %v1427_v22, %v1427_v22  ;;  %v6998_v50 = vld [vmem:[%s9265_s5 + $0x258] ss:$8 sps:$4 sm:$0xff]   ;;  %v7003_v51 = vld [vmem:[%s9265_s5 + $0x1c4] ss:$8 sps:$4 sm:$0xff]   ;;  %v7007_v53 = vld [vmem:[%s9294_s4 + $0x10] sm:$0x1f]  }
 0x37a   : > { %7386 = vtanh.f32 %v1331_v33  ;;  %v7001_v33 = vld [vmem:[%s9265_s5 + $0x1c0] ss:$8 sps:$4 sm:$0xff]  }
 0x37b   : > { %v1774_v30 = vsel %vm1615_vm1, %v5985_v28, 0  ;;  %v6014_v28 = vld [vmem:[%s9265_s5 + $0x1f0] sm:$0xff] }
 0x37d   : > { %v7375_v55 = vpop.eup %7374 }
 0x37e   : > { %v7377_v56 = vpop.eup %7376  ;;  %v7879_v36 = vpack.c.bf16 %v7375_v55, %v7373_v54  ;;  %v7004_v54 = vld [vmem:[%s9265_s5 + $0x248] ss:$8 sps:$4 sm:$0xff]   ;;  %v7010_v55 = vld [vmem:[%s9265_s5 + $0x1b4] ss:$8 sps:$4 sm:$0xff]  }
 0x37f   : > { %v7379_v57 = vpop.eup %7378 }
 0x380   : > { %v7881_v58 = vpack.c.bf16 %v7379_v57, %v7377_v56  ;;  %v7013_v56 = vld [vmem:[%s9265_s5 + $0x23c] ss:$8 sps:$4 sm:$0xff]   ;;  %v7008_v57 = vld [vmem:[%s9265_s5 + $0x1b0] ss:$8 sps:$4 sm:$0xff]  }
 0x381   : > { %v7381_v59 = vpop.eup %7380 }
 0x385   : > { %v7383_v38 = vpop.eup %7382 }
 0x386   : > { %v7385_v60 = vpop.eup %7384  ;;  %v1342_v61 = vpack.c.bf16 %v7383_v38, %v7381_v59  ;;  %v7011_v59 = vld [vmem:[%s9265_s5 + $0x238] ss:$8 sps:$4 sm:$0xff]   ;;  %v7016_v38 = vld [vmem:[%s9265_s5 + $0x1a4] ss:$8 sps:$4 sm:$0xff]  }
 0x387   : > { %v7387_v62 = vpop.eup %7386 }
 0x388   : > { %v7883_v63 = vpack.c.bf16 %v7387_v62, %v7385_v60  ;;  %v7886_v0 = vsel %vm1355_vm2, %v1342_v61, 0  ;;  %v7019_v60 = vld [vmem:[%s9265_s5 + $0x22c] ss:$8 sps:$4 sm:$0xff]   ;;  %v7014_v61 = vld [vmem:[%s9265_s5 + $0x1a0] ss:$8 sps:$4 sm:$0xff]  }
 0x389   : > { %v7017_v62 = vld [vmem:[%s9265_s5 + $0x228] ss:$8 sps:$4 sm:$0xff]  }
 0x38a   : > { %5913 = vmatprep.subr.msk.bf16.mxu0 %vm1355_vm2, %v7883_v63  ;;  %5992 = vmatprep.subr.msk.bf16.mxu1 %vm1355_vm2, %v7883_v63 }
 0x38b   : > { %1375 = vmatpush1.bf16.msra.mxu0 %v7886_v0 }
 0x38c   : > { %1376 = vmatprep.subr.bf16.mxu0 %v7881_v58 }
 0x38f   : > { %1377 = vmatpush1.bf16.msra.mxu0 %v7879_v36 }
 0x390   : > { %5918 = vmatprep.subr.msk.bf16.mxu0 %vm1355_vm2, %v7883_v63 }
 0x392   : > { %5914 = vmatmul.mubr.msk.bf16.vlgmr.msra.gmra.mxu0 %vm1351_vm3, %v6960_v1  ;;  %v7022_v1 = vld [vmem:[%s9265_s5 + $0x194] ss:$8 sps:$4 sm:$0xff]  }
 0x393   : > { %1452 = vmatpush1.bf16.msra.mxu0 %v7886_v0  ;;  %1471 = vmatprep.mubr.bf16.mxu0 %v7496_v18 }
 0x394   : > { %1453 = vmatprep.subr.bf16.mxu0 %v7881_v58 }
 0x397   : > { %1454 = vmatpush1.bf16.msra.mxu0 %v7879_v36 }
 0x398   : > { %1779 = vmatprep.subr.bf16.mxu0 %v6964_v2  ;;  %v7025_v2 = vld [vmem:[%s9265_s5 + $0x21c] ss:$8 sps:$4 sm:$0xff]  }
 0x39a   : > { %5919 = vmatmul.mubr.msk.bf16.vlgmr.msra.gmra.mxu0 %vm1351_vm3, %v6961_v3  ;;  %v7020_v3 = vld [vmem:[%s9265_s5 + $0x190] ss:$8 sps:$4 sm:$0xff]  }
 0x39b   : > { %1780 = vmatpush1.bf16.msra.mxu0 %v6962_v4  ;;  %v7023_v4 = vld [vmem:[%s9265_s5 + $0x218] ss:$8 sps:$4 sm:$0xff]  }
 0x39c   : > { %1781 = vmatprep.subr.bf16.mxu0 %v6967_v6  ;;  %v7028_v6 = vld [vmem:[%s9265_s5 + $0x184] ss:$8 sps:$4 sm:$0xff]  }
 0x39f   : > { %1782 = vmatpush1.bf16.msra.mxu0 %v6965_v8  ;;  %v7031_v8 = vld [vmem:[%s9265_s5 + $0x20c] ss:$8 sps:$4 sm:$0xff]  }
 0x3a0   : > { %1783 = vmatprep.subr.bf16.mxu0 %v6970_v9  ;;  %v7026_v9 = vld [vmem:[%s9265_s5 + $0x180] ss:$8 sps:$4 sm:$0xff]  }
 0x3a3   : > { %1784 = vmatpush1.bf16.msra.mxu0 %v6968_v11  ;;  %v7029_v11 = vld [vmem:[%s9265_s5 + $0x208] ss:$8 sps:$4 sm:$0xff]  }
 0x3a4   : > { %1785 = vmatprep.subr.bf16.mxu0 %v6973_v13  ;;  %v7034_v13 = vld [vmem:[%s9265_s5 + $0x174] ss:$8 sps:$4 sm:$0xff]  }
 0x3a7   : > { %1786 = vmatpush1.bf16.msra.mxu0 %v6971_v14  ;;  %v7037_v14 = vld [vmem:[%s9265_s5 + $0x1fc] ss:$8 sps:$4 sm:$0xff]  }
 0x3a8   : > { %1787 = vmatprep.subr.bf16.mxu0 %v6976_v15  ;;  %v6064_v15 = vld [vmem:[%s9265_s5 + $0x298] sm:$0xff] }
 0x3ab   : > { %1788 = vmatpush1.bf16.msra.mxu0 %v6974_v7  ;;  %v7032_v7 = vld [vmem:[%s9265_s5 + $0x170] ss:$8 sps:$4 sm:$0xff]  }
 0x3ac   : > { %1789 = vmatprep.subr.bf16.mxu0 %v6979_v16  ;;  %v7035_v16 = vld [vmem:[%s9265_s5 + $0x1f8] ss:$8 sps:$4 sm:$0xff]  }
 0x3af   : > { %1790 = vmatpush1.bf16.msra.mxu0 %v6977_v17  ;;  %v7040_v17 = vld [vmem:[%s9265_s5 + $0x164] ss:$8 sps:$4 sm:$0xff]  }
 0x3b0   : > { %1791 = vmatprep.subr.bf16.mxu0 %v6982_v19  ;;  %v6086_v19 = vcombine.high %v6064_v15, %v6064_v15 }
 0x3b3   : > { %1792 = vmatpush1.bf16.msra.mxu0 %v6980_v20  ;;  %v6085_v20 = vcombine.low %v6064_v15, %v6064_v15  ;;  %v7076_v15 = vld [vmem:[%s9265_s5 + $0x304] ss:$8 sps:$4 sm:$0xff]  }
 0x3b4   : > { %1793 = vmatprep.subr.bf16.mxu0 %v6985_v21  ;;  %v7038_v21 = vld [vmem:[%s9265_s5 + $0x160] ss:$8 sps:$4 sm:$0xff]  }
 0x3b5   : > { %v2248_v22 = vsel %vm1615_vm1, %v6085_v20, 0  ;;  %v7085_v20 = vld [vmem:[%s9265_s5 + $0x37c] ss:$8 sps:$4 sm:$0xff]  }
 0x3b7   : > { %1794 = vmatpush1.bf16.msra.mxu0 %v6983_v24  ;;  %v7045_v24 = vld [vmem:[%s9265_s5 + $0x154] ss:$8 sps:$4 sm:$0xff]  }
 0x3b8   : > { %5987 = vmatprep.subr.msk.bf16.mxu0 %vm1615_vm1, %v5986_v26  ;;  %v7048_v26 = vld [vmem:[%s9265_s5 + $0x28c] ss:$8 sps:$4 sm:$0xff]  }
 0x3bb   : > { %1806 = vmatpush2.bf16.msra.mxu0 %v1774_v30  ;;  %v7043_v30 = vld [vmem:[%s9265_s5 + $0x150] ss:$8 sps:$4 sm:$0xff]  }
 0x3bc   : > { %1807 = vmatprep.subr.bf16.mxu0 %v6990_v32  ;;  %v7046_v32 = vld [vmem:[%s9265_s5 + $0x288] ss:$8 sps:$4 sm:$0xff]  }
 0x3bf   : > { %1808 = vmatpush2.bf16.msra.mxu0 %v6988_v23  ;;  %v6036_v23 = vcombine.high %v6014_v28, %v6014_v28 }
 0x3c0   : > { %1809 = vmatprep.subr.bf16.mxu0 %v6993_v34  ;;  %v7052_v34 = vld [vmem:[%s9265_s5 + $0x27c] ss:$8 sps:$4 sm:$0xff]  }
 0x3c3   : > { %1810 = vmatpush2.bf16.msra.mxu0 %v6991_v35  ;;  %v6035_v35 = vcombine.low %v6014_v28, %v6014_v28  ;;  %v7086_v28 = vld [vmem:[%s9265_s5 + $0x2e0] ss:$8 sps:$4 sm:$0xff]  }
 0x3c4   : > { %6042 = vmatprep.subr.msk.bf16.mxu0 %vm1355_vm2, %v7883_v63 }
 0x452   : > { %v1396_v37 = vpop.f32.mrf.mxu0 }
 0x454   : > { %v1398_v39 = vpop.f32.mrf.mxu0 }
 0x456   : > { %v1400_v25 = vpop.f32.mrf.mxu0 }
 0x457   : > { %v1405_v42 = vpack.c.bf16 %v1400_v25, %v1396_v37  ;;  %v7050_v37 = vld [vmem:[%s9265_s5 + $0x278] ss:$8 sps:$4 sm:$0xff]   ;;  %v7056_v25 = vld [vmem:[%s9265_s5 + $0x1e4] ss:$8 sps:$4 sm:$0xff]  }
 0x458   : > { %v1402_v40 = vpop.f32.mrf.mxu0 }
 0x459   : > { %v1406_v41 = vpack.c.bf16 %v1402_v40, %v1398_v39  ;;  %v2009_v39 = vsel %vm1615_vm1, %v6035_v35, 0  ;;  %v7054_v40 = vld [vmem:[%s9265_s5 + $0x1e0] ss:$8 sps:$4 sm:$0xff]  }
 0x45a   : > { %v1473_v43 = vpop.f32.mrf.mxu0  ;;  %v7095_v35 = vld [vmem:[%s9265_s5 + $0x358] ss:$8 sps:$4 sm:$0xff]  }
 0x45b   : > { %5988 = vmatprep.mubr.msk.bf16.mxu0 %vm1611_vm4, %v1406_v41  ;;  %v7059_v41 = vld [vmem:[%s9265_s5 + $0x1d4] ss:$8 sps:$4 sm:$0xff]  }
 0x45c   : > { %v1475_v27 = vpop.f32.mrf.mxu0  ;;  %1812 = vmatmul.mubr.bf16.vlgmr.msra.gmra.mxu0 %v1405_v42  ;;  %v7057_v42 = vld [vmem:[%s9265_s5 + $0x1d0] ss:$8 sps:$4 sm:$0xff]  }
 0x45d   : > { %2085 = vmatpush1.bf16.msra.mxu0 %v7886_v0  ;;  %2104 = vmatprep.mubr.bf16.mxu0 %v7496_v18 }
 0x45e   : > { %2086 = vmatprep.subr.bf16.mxu0 %v7881_v58  ;;  %v1477_v44 = vpop.f32.mrf.mxu0 }
 0x45f   : > { %v1482_v31 = vpack.c.bf16 %v1477_v44, %v1473_v43 }
 0x460   : > { %v1479_v29 = vpop.f32.mrf.mxu0 }
 0x461   : > { %v1483_v47 = vpack.c.bf16 %v1479_v29, %v1475_v27  ;;  %2087 = vmatpush1.bf16.msra.mxu0 %v7879_v36 }
 0x462   : > { %2253 = vmatprep.subr.bf16.mxu0 %v6996_v45 }
 0x463   : > { %5964 = vmatprep.mubr.msk.bf16.mxu1 %vm1611_vm4, %v1483_v47 }
 0x464   : > { %1655 = vmatmul.mubr.bf16.vlgmr.msra.gmra.mxu1 %v1482_v31  ;;  %6043 = vmatmul.mubr.msk.bf16.vlgmr.msra.gmra.mxu0 %vm1351_vm3, %v6997_v46 }
 0x465   : > { %1846 = vmatpush1.bf16.msra.mxu1 %v7886_v0  ;;  %2254 = vmatpush1.bf16.msra.mxu0 %v6994_v48 }
 0x466   : > { %1847 = vmatprep.subr.bf16.mxu1 %v7881_v58  ;;  %2255 = vmatprep.subr.bf16.mxu0 %v7000_v49 }
 0x467   : > { %1865 = vmatprep.mubr.bf16.mxu1 %v7496_v18 }
 0x469   : > { %1848 = vmatpush1.bf16.msra.mxu1 %v7879_v36  ;;  %2256 = vmatpush1.bf16.msra.mxu0 %v6998_v50 }
 0x46a   : > { %2014 = vmatprep.subr.bf16.mxu1 %v7003_v51  ;;  %2257 = vmatprep.subr.bf16.mxu0 %v7006_v52 }
 0x46c   : > { %5993 = vmatmul.mubr.msk.bf16.vlgmr.msra.gmra.mxu1 %vm1351_vm3, %v7007_v53 }
 0x46d   : > { %2015 = vmatpush1.bf16.msra.mxu1 %v7001_v33  ;;  %2258 = vmatpush1.bf16.msra.mxu0 %v7004_v54 }
 0x46e   : > { %2016 = vmatprep.subr.bf16.mxu1 %v7010_v55  ;;  %2259 = vmatprep.subr.bf16.mxu0 %v7013_v56 }
 0x471   : > { %2017 = vmatpush1.bf16.msra.mxu1 %v7008_v57  ;;  %2260 = vmatpush1.bf16.msra.mxu0 %v7011_v59 }
 0x472   : > { %2018 = vmatprep.subr.bf16.mxu1 %v7016_v38  ;;  %2261 = vmatprep.subr.bf16.mxu0 %v7019_v60  ;;  %v7062_v60 = vld [vmem:[%s9265_s5 + $0x3bc] ss:$8 sps:$4 sm:$0xff]  }
 0x475   : > { %2019 = vmatpush1.bf16.msra.mxu1 %v7014_v61  ;;  %2262 = vmatpush1.bf16.msra.mxu0 %v7017_v62  ;;  %v7063_v62 = vld [vmem:[%s9294_s4 + $0x28] sm:$0x1f]  }
 0x476   : > { %2020 = vmatprep.subr.bf16.mxu1 %v7022_v1  ;;  %2263 = vmatprep.subr.bf16.mxu0 %v7025_v2  ;;  %v7060_v2 = vld [vmem:[%s9265_s5 + $0x3b8] ss:$8 sps:$4 sm:$0xff]  }
 0x479   : > { %2021 = vmatpush1.bf16.msra.mxu1 %v7020_v3  ;;  %2264 = vmatpush1.bf16.msra.mxu0 %v7023_v4  ;;  %v7066_v4 = vld [vmem:[%s9265_s5 + $0x3ac] ss:$8 sps:$4 sm:$0xff]  }
 0x47a   : > { %2022 = vmatprep.subr.bf16.mxu1 %v7028_v6  ;;  %2265 = vmatprep.subr.bf16.mxu0 %v7031_v8  ;;  %v7064_v6 = vld [vmem:[%s9265_s5 + $0x3a8] ss:$8 sps:$4 sm:$0xff]   ;;  %v7069_v8 = vld [vmem:[%s9265_s5 + $0x314] ss:$8 sps:$4 sm:$0xff]  }
 0x47d   : > { %2023 = vmatpush1.bf16.msra.mxu1 %v7026_v9  ;;  %2266 = vmatpush1.bf16.msra.mxu0 %v7029_v11  ;;  %v7072_v9 = vld [vmem:[%s9265_s5 + $0x39c] ss:$8 sps:$4 sm:$0xff]  }
 0x47e   : > { %2024 = vmatprep.subr.bf16.mxu1 %v7034_v13  ;;  %2267 = vmatprep.subr.bf16.mxu0 %v7037_v14  ;;  %v7073_v11 = vld [vmem:[%s9294_s4 + $0x20] sm:$0x1f]   ;;  %v7067_v13 = vld [vmem:[%s9265_s5 + $0x310] ss:$8 sps:$4 sm:$0xff]  }
 0x47f   : > { %v7070_v14 = vld [vmem:[%s9265_s5 + $0x398] ss:$8 sps:$4 sm:$0xff]  }
 0x481   : > { %2025 = vmatpush1.bf16.msra.mxu1 %v7032_v7  ;;  %2268 = vmatpush1.bf16.msra.mxu0 %v7035_v16  ;;  %v7079_v7 = vld [vmem:[%s9265_s5 + $0x38c] ss:$8 sps:$4 sm:$0xff]   ;;  %v7074_v16 = vld [vmem:[%s9265_s5 + $0x300] ss:$8 sps:$4 sm:$0xff]  }
 0x482   : > { %2026 = vmatprep.subr.bf16.mxu1 %v7040_v17  ;;  %6087 = vmatprep.subr.msk.bf16.mxu0 %vm1615_vm1, %v6086_v19  ;;  %v7077_v17 = vld [vmem:[%s9265_s5 + $0x388] ss:$8 sps:$4 sm:$0xff]   ;;  %v7082_v19 = vld [vmem:[%s9265_s5 + $0x2f4] ss:$8 sps:$4 sm:$0xff]  }
 0x485   : > { %2027 = vmatpush1.bf16.msra.mxu1 %v7038_v21  ;;  %2280 = vmatpush2.bf16.msra.mxu0 %v2248_v22  ;;  %v7080_v21 = vld [vmem:[%s9265_s5 + $0x2f0] ss:$8 sps:$4 sm:$0xff]  }
 0x486   : > { %2028 = vmatprep.subr.bf16.mxu1 %v7045_v24  ;;  %2281 = vmatprep.subr.bf16.mxu0 %v7048_v26  ;;  %v7083_v22 = vld [vmem:[%s9265_s5 + $0x378] ss:$8 sps:$4 sm:$0xff]   ;;  %v7088_v24 = vld [vmem:[%s9265_s5 + $0x2e4] ss:$8 sps:$4 sm:$0xff]  }
 0x487   : > { %v7091_v26 = vld [vmem:[%s9265_s5 + $0x36c] ss:$8 sps:$4 sm:$0xff]  }
 0x489   : > { %2029 = vmatpush1.bf16.msra.mxu1 %v7043_v30  ;;  %2282 = vmatpush2.bf16.msra.mxu0 %v7046_v32  ;;  %v7089_v30 = vld [vmem:[%s9265_s5 + $0x368] ss:$8 sps:$4 sm:$0xff]   ;;  %v7094_v32 = vld [vmem:[%s9265_s5 + $0x2d4] ss:$8 sps:$4 sm:$0xff]  }
 0x48a   : > { %6037 = vmatprep.subr.msk.bf16.mxu1 %vm1615_vm1, %v6036_v23  ;;  %2283 = vmatprep.subr.bf16.mxu0 %v7052_v34  ;;  %v7097_v23 = vld [vmem:[%s9265_s5 + $0x35c] ss:$8 sps:$4 sm:$0xff]   ;;  %v7092_v34 = vld [vmem:[%s9265_s5 + $0x2d0] ss:$8 sps:$4 sm:$0xff]  }
 0x48d   : > { %2041 = vmatpush2.bf16.msra.mxu1 %v2009_v39  ;;  %2284 = vmatpush2.bf16.msra.mxu0 %v7050_v37  ;;  %v7100_v37 = vld [vmem:[%s9265_s5 + $0x2c4] ss:$8 sps:$4 sm:$0xff]  }
 0x48e   : > { %6142 = vmatprep.subr.msk.bf16.mxu0 %vm1355_vm2, %v7883_v63  ;;  %2042 = vmatprep.subr.bf16.mxu1 %v7056_v25  ;;  %v7103_v39 = vld [vmem:[%s9265_s5 + $0x34c] ss:$8 sps:$4 sm:$0xff]  }
 0x48f   : > { %v6164_v25 = vld [vmem:[%s9265_s5 + $0x3e8] sm:$0xff] }
 0x491   : > { %2043 = vmatpush2.bf16.msra.mxu1 %v7054_v40  ;;  %v7098_v40 = vld [vmem:[%s9265_s5 + $0x2c0] ss:$8 sps:$4 sm:$0xff]  }
 0x492   : > { %2044 = vmatprep.subr.bf16.mxu1 %v7059_v41  ;;  %v7101_v41 = vld [vmem:[%s9265_s5 + $0x348] ss:$8 sps:$4 sm:$0xff]  }
 0x495   : > { %2045 = vmatpush2.bf16.msra.mxu1 %v7057_v42  ;;  %v7106_v42 = vld [vmem:[%s9265_s5 + $0x2b4] ss:$8 sps:$4 sm:$0xff]  }
 0x496   : > { %6092 = vmatprep.subr.msk.bf16.mxu1 %vm1355_vm2, %v7883_v63 }
 0x51c   : > { %v1813_v43 = vpop.f32.mrf.mxu0 }
 0x51e   : > { %v1815_v27 = vpop.f32.mrf.mxu0 }
 0x520   : > { %v1817_v44 = vpop.f32.mrf.mxu0 }
 0x522   : > { %v1819_v45 = vpop.f32.mrf.mxu0 }
 0x524   : > { %v1656_v29 = vpop.f32.mrf.mxu1  ;;  %v2106_v46 = vpop.f32.mrf.mxu0 }
 0x525   : > { %v8128_v47 = vadd.f32 %v1813_v43, %v1656_v29  ;;  %v6186_v43 = vcombine.high %v6164_v25, %v6164_v25  ;;  %v7111_v29 = vld [vmem:[%s9265_s5 + $0x2a4] ss:$8 sps:$4 sm:$0xff]  }
 0x526   : > { %v1658_v48 = vpop.f32.mrf.mxu1  ;;  %v2108_v31 = vpop.f32.mrf.mxu0 }
 0x527   : > { %v8130_v49 = vadd.f32 %v1815_v27, %v1658_v48  ;;  %v6185_v27 = vcombine.low %v6164_v25, %v6164_v25  ;;  %v6114_v48 = vld [vmem:[%s9265_s5 + $0x340] sm:$0xff]  ;;  %v7138_v25 = vld [vmem:[%s9265_s5 + $0x4ec] ss:$8 sps:$4 sm:$0xff]  }
 0x528   : > { %v1660_v50 = vpop.f32.mrf.mxu1  ;;  %v2110_v51 = vpop.f32.mrf.mxu0 }
 0x529   : > { %v8132_v52 = vadd.f32 %v1817_v44, %v1660_v50  ;;  %v2115_v53 = vpack.c.bf16 %v2110_v51, %v2106_v46  ;;  %v7104_v44 = vld [vmem:[%s9265_s5 + $0x2b0] ss:$8 sps:$4 sm:$0xff]   ;;  %v7114_v46 = vld [vmem:[%s9265_s5 + $0x3dc] ss:$8 sps:$4 sm:$0xff]   ;;  %v6136_v51 = vcombine.high %v6114_v48, %v6114_v48 }
 0x52a   : > { %v1662_v33 = vpop.f32.mrf.mxu1  ;;  %v2112_v54 = vpop.f32.mrf.mxu0  ;;  %v7112_v50 = vld [vmem:[%s9265_s5 + $0x3d8] ss:$8 sps:$4 sm:$0xff]  }
 0x52b   : > { %v8134_v55 = vadd.f32 %v1819_v45, %v1662_v33  ;;  %v2116_v56 = vpack.c.bf16 %v2112_v54, %v2108_v31  ;;  %v2726_v45 = vsel %vm1615_vm1, %v6185_v27, 0  ;;  %v7109_v31 = vld [vmem:[%s9265_s5 + $0x2a0] ss:$8 sps:$4 sm:$0xff]   ;;  %v6135_v33 = vcombine.low %v6114_v48, %v6114_v48  ;;  %v7145_v27 = vld [vmem:[%s9265_s5 + $0x4dc] ss:$8 sps:$4 sm:$0xff]  }
 0x52c   : > { %v1867_v57 = vpop.f32.mrf.mxu1  ;;  %v7116_v54 = vld [vmem:[%s9265_s5 + $0x3c8] ss:$8 sps:$4 sm:$0xff]  }
 0x52d   : > { %6088 = vmatprep.mubr.msk.bf16.mxu0 %vm1611_vm4, %v2116_v56  ;;  %v2487_v56 = vsel %vm1615_vm1, %v6135_v33, 0  ;;  %v7146_v48 = vld [vmem:[%s9265_s5 + $0x440] ss:$8 sps:$4 sm:$0xff]  }
 0x52e   : > { %v1869_v59 = vpop.f32.mrf.mxu1  ;;  %2286 = vmatmul.mubr.bf16.vlgmr.msra.gmra.mxu0 %v2115_v53  ;;  %v7118_v53 = vld [vmem:[%s9265_s5 + $0x3cc] ss:$8 sps:$4 sm:$0xff]   ;;  %v7155_v33 = vld [vmem:[%s9265_s5 + $0x4b8] ss:$8 sps:$4 sm:$0xff]  }
 0x52f   : > { %2563 = vmatpush1.bf16.msra.mxu0 %v7886_v0  ;;  %2582 = vmatprep.mubr.bf16.mxu0 %v7496_v18 }
 0x530   : > { %2564 = vmatprep.subr.bf16.mxu0 %v7881_v58  ;;  %v1871_v38 = vpop.f32.mrf.mxu1 }
 0x531   : > { %v1876_v3 = vpack.c.bf16 %v1871_v38, %v1867_v57  ;;  %v7122_v57 = vld [vmem:[%s9265_s5 + $0x334] ss:$8 sps:$4 sm:$0xff]   ;;  %v7125_v38 = vld [vmem:[%s9265_s5 + $0x324] ss:$8 sps:$4 sm:$0xff]  }
 0x532   : > { %v1873_v61 = vpop.f32.mrf.mxu1 }
 0x533   : > { %v1877_v1 = vpack.c.bf16 %v1873_v61, %v1869_v59  ;;  %2565 = vmatpush1.bf16.msra.mxu0 %v7879_v36  ;;  %v7120_v59 = vld [vmem:[%s9265_s5 + $0x330] ss:$8 sps:$4 sm:$0xff]  }
 0x534   : > { %2731 = vmatprep.subr.bf16.mxu0 %v7062_v60  ;;  %v7123_v60 = vld [vmem:[%s9265_s5 + $0x320] ss:$8 sps:$4 sm:$0xff]  }
 0x535   : > { %6038 = vmatprep.mubr.msk.bf16.mxu1 %vm1611_vm4, %v1877_v1 }
 0x536   : > { %2047 = vmatmul.mubr.bf16.vlgmr.msra.gmra.mxu1 %v1876_v3  ;;  %6143 = vmatmul.mubr.msk.bf16.vlgmr.msra.gmra.mxu0 %vm1351_vm3, %v7063_v62 }
 0x537   : > { %2324 = vmatpush1.bf16.msra.mxu1 %v7886_v0  ;;  %2732 = vmatpush1.bf16.msra.mxu0 %v7060_v2 }
 0x538   : > { %2325 = vmatprep.subr.bf16.mxu1 %v7881_v58  ;;  %2733 = vmatprep.subr.bf16.mxu0 %v7066_v4 }
 0x539   : > { %2343 = vmatprep.mubr.bf16.mxu1 %v7496_v18 }
 0x53b   : > { %2326 = vmatpush1.bf16.msra.mxu1 %v7879_v36  ;;  %2734 = vmatpush1.bf16.msra.mxu0 %v7064_v6 }
 0x53c   : > { %2492 = vmatprep.subr.bf16.mxu1 %v7069_v8  ;;  %2735 = vmatprep.subr.bf16.mxu0 %v7072_v9 }
 0x53e   : > { %6093 = vmatmul.mubr.msk.bf16.vlgmr.msra.gmra.mxu1 %vm1351_vm3, %v7073_v11 }
 0x53f   : > { %2493 = vmatpush1.bf16.msra.mxu1 %v7067_v13  ;;  %2736 = vmatpush1.bf16.msra.mxu0 %v7070_v14 }
 0x540   : > { %2494 = vmatprep.subr.bf16.mxu1 %v7076_v15  ;;  %2737 = vmatprep.subr.bf16.mxu0 %v7079_v7 }
 0x543   : > { %2495 = vmatpush1.bf16.msra.mxu1 %v7074_v16  ;;  %2738 = vmatpush1.bf16.msra.mxu0 %v7077_v17 }
 0x544   : > { %2496 = vmatprep.subr.bf16.mxu1 %v7082_v19  ;;  %2739 = vmatprep.subr.bf16.mxu0 %v7085_v20 }
 0x547   : > { %2497 = vmatpush1.bf16.msra.mxu1 %v7080_v21  ;;  %2740 = vmatpush1.bf16.msra.mxu0 %v7083_v22 }
 0x548   : > { %2498 = vmatprep.subr.bf16.mxu1 %v7088_v24  ;;  %2741 = vmatprep.subr.bf16.mxu0 %v7091_v26 }
 0x54b   : > { %2499 = vmatpush1.bf16.msra.mxu1 %v7086_v28  ;;  %2742 = vmatpush1.bf16.msra.mxu0 %v7089_v30  ;;  %v7129_v30 = vld [vmem:[%s9294_s4 + $0x38] sm:$0x1f]  }
 0x54c   : > { %2500 = vmatprep.subr.bf16.mxu1 %v7094_v32  ;;  %2743 = vmatprep.subr.bf16.mxu0 %v7097_v23  ;;  %v7126_v23 = vld [vmem:[%s9265_s5 + $0x508] ss:$8 sps:$4 sm:$0xff]  }
 0x54f   : > { %2501 = vmatpush1.bf16.msra.mxu1 %v7092_v34  ;;  %2744 = vmatpush1.bf16.msra.mxu0 %v7095_v35  ;;  %v7132_v35 = vld [vmem:[%s9265_s5 + $0x4fc] ss:$8 sps:$4 sm:$0xff]  }
 0x550   : > { %2502 = vmatprep.subr.bf16.mxu1 %v7100_v37  ;;  %2745 = vmatprep.subr.bf16.mxu0 %v7103_v39  ;;  %v7130_v37 = vld [vmem:[%s9265_s5 + $0x4f8] ss:$8 sps:$4 sm:$0xff]   ;;  %v7135_v39 = vld [vmem:[%s9265_s5 + $0x464] ss:$8 sps:$4 sm:$0xff]  }
 0x553   : > { %2503 = vmatpush1.bf16.msra.mxu1 %v7098_v40  ;;  %2746 = vmatpush1.bf16.msra.mxu0 %v7101_v41  ;;  %v7139_v40 = vld [vmem:[%s9294_s4 + $0x30] sm:$0x1f]   ;;  %v7133_v41 = vld [vmem:[%s9265_s5 + $0x460] ss:$8 sps:$4 sm:$0xff]  }
 0x554   : > { %2504 = vmatprep.subr.bf16.mxu1 %v7106_v42  ;;  %6187 = vmatprep.subr.msk.bf16.mxu0 %vm1615_vm1, %v6186_v43  ;;  %v7136_v42 = vld [vmem:[%s9265_s5 + $0x4e8] ss:$8 sps:$4 sm:$0xff]   ;;  %v7142_v43 = vld [vmem:[%s9265_s5 + $0x454] ss:$8 sps:$4 sm:$0xff]  }
 0x557   : > { %2505 = vmatpush1.bf16.msra.mxu1 %v7104_v44  ;;  %2758 = vmatpush2.bf16.msra.mxu0 %v2726_v45  ;;  %v7140_v44 = vld [vmem:[%s9265_s5 + $0x450] ss:$8 sps:$4 sm:$0xff]  }
 0x558   : > { %2506 = vmatprep.subr.bf16.mxu1 %v7111_v29  ;;  %2759 = vmatprep.subr.bf16.mxu0 %v7114_v46  ;;  %v7143_v45 = vld [vmem:[%s9265_s5 + $0x4d8] ss:$8 sps:$4 sm:$0xff]   ;;  %v7148_v29 = vld [vmem:[%s9265_s5 + $0x444] ss:$8 sps:$4 sm:$0xff]  }
 0x559   : > { %v7151_v46 = vld [vmem:[%s9265_s5 + $0x4cc] ss:$8 sps:$4 sm:$0xff]  }
 0x55b   : > { %2507 = vmatpush1.bf16.msra.mxu1 %v7109_v31  ;;  %2760 = vmatpush2.bf16.msra.mxu0 %v7112_v50  ;;  %v7149_v31 = vld [vmem:[%s9265_s5 + $0x4c8] ss:$8 sps:$4 sm:$0xff]   ;;  %v7154_v50 = vld [vmem:[%s9265_s5 + $0x434] ss:$8 sps:$4 sm:$0xff]  }
 0x55c   : > { %6137 = vmatprep.subr.msk.bf16.mxu1 %vm1615_vm1, %v6136_v51  ;;  %2761 = vmatprep.subr.bf16.mxu0 %v7118_v53  ;;  %v7157_v51 = vld [vmem:[%s9265_s5 + $0x4bc] ss:$8 sps:$4 sm:$0xff]   ;;  %v7152_v53 = vld [vmem:[%s9265_s5 + $0x430] ss:$8 sps:$4 sm:$0xff]  }
 0x55f   : > { %2519 = vmatpush2.bf16.msra.mxu1 %v2487_v56  ;;  %2762 = vmatpush2.bf16.msra.mxu0 %v7116_v54  ;;  %v7160_v54 = vld [vmem:[%s9265_s5 + $0x424] ss:$8 sps:$4 sm:$0xff]  }
 0x560   : > { %6242 = vmatprep.subr.msk.bf16.mxu0 %vm1355_vm2, %v7883_v63  ;;  %2520 = vmatprep.subr.bf16.mxu1 %v7122_v57  ;;  %v7163_v56 = vld [vmem:[%s9265_s5 + $0x4ac] ss:$8 sps:$4 sm:$0xff]   ;;  %v7158_v57 = vld [vmem:[%s9265_s5 + $0x420] ss:$8 sps:$4 sm:$0xff]  }
 0x563   : > { %2521 = vmatpush2.bf16.msra.mxu1 %v7120_v59  ;;  %v7161_v59 = vld [vmem:[%s9265_s5 + $0x4a8] ss:$8 sps:$4 sm:$0xff]  }
 0x564   : > { %2522 = vmatprep.subr.bf16.mxu1 %v7125_v38  ;;  %v7166_v38 = vld [vmem:[%s9265_s5 + $0x414] ss:$8 sps:$4 sm:$0xff]  }
 0x567   : > { %2523 = vmatpush2.bf16.msra.mxu1 %v7123_v60  ;;  %v7169_v60 = vld [vmem:[%s9265_s5 + $0x49c] ss:$8 sps:$4 sm:$0xff]  }
 0x568   : > { %6192 = vmatprep.subr.msk.bf16.mxu1 %vm1355_vm2, %v7883_v63 }
 0x5ee   : > { %v2287_v61 = vpop.f32.mrf.mxu0 }
 0x5f0   : > { %v2289_v62 = vpop.f32.mrf.mxu0 }
 0x5f2   : > { %v2291_v1 = vpop.f32.mrf.mxu0 }
 0x5f4   : > { %v2293_v2 = vpop.f32.mrf.mxu0 }
 0x5f6   : > { %v2048_v3 = vpop.f32.mrf.mxu1  ;;  %v2584_v4 = vpop.f32.mrf.mxu0 }
 0x5f7   : > { %v2057_v6 = vadd.f32 %v2048_v3, %v8128_v47 }
 0x5f8   : > { %v2050_v8 = vpop.f32.mrf.mxu1  ;;  %v2586_v9 = vpop.f32.mrf.mxu0 }
 0x5f9   : > { %v2058_v11 = vadd.f32 %v2050_v8, %v8130_v49  ;;  %v8290_v13 = vadd.f32 %v2287_v61, %v2057_v6  ;;  %v6264_v61 = vld [vmem:[%s9265_s5 + $0x538] sm:$0xff]  ;;  %v7170_v6 = vld [vmem:[%s9265_s5 + $0x400] ss:$8 sps:$4 sm:$0xff]  }
 0x5fa   : > { %v2052_v14 = vpop.f32.mrf.mxu1  ;;  %v2588_v15 = vpop.f32.mrf.mxu0  ;;  %v6286_v3 = vcombine.high %v6264_v61, %v6264_v61 }
 0x5fb   : > { %v2059_v7 = vadd.f32 %v2052_v14, %v8132_v52  ;;  %v8293_v16 = vadd.f32 %v2289_v62, %v2058_v11  ;;  %v2593_v17 = vpack.c.bf16 %v2588_v15, %v2584_v4  ;;  %v7164_v62 = vld [vmem:[%s9265_s5 + $0x410] ss:$8 sps:$4 sm:$0xff]   ;;  %v6285_v4 = vcombine.low %v6264_v61, %v6264_v61  ;;  %v7180_v11 = vld [vmem:[%s9265_s5 + $0x52c] ss:$8 sps:$4 sm:$0xff]  }
 0x5fc   : > { %v2054_v19 = vpop.f32.mrf.mxu1  ;;  %v2590_v20 = vpop.f32.mrf.mxu0  ;;  %v6214_v14 = vld [vmem:[%s9265_s5 + $0x490] sm:$0xff]  ;;  %v7203_v61 = vld [vmem:[%s9265_s5 + $0x638] ss:$8 sps:$4 sm:$0xff]  }
 0x5fd   : > { %v2060_v21 = vadd.f32 %v2054_v19, %v8134_v55  ;;  %v2594_v22 = vpack.c.bf16 %v2590_v20, %v2586_v9  ;;  %v8296_v24 = vadd.f32 %v2291_v1, %v2059_v7  ;;  %v7128_v55 = vld [vmem:[%s9265_s5 + $0x50c] ss:$8 sps:$4 sm:$0xff]   ;;  %v7167_v1 = vld [vmem:[%s9265_s5 + $0x498] ss:$8 sps:$4 sm:$0xff]   ;;  %v3204_v8 = vsel %vm1615_vm1, %v6285_v4, 0 }
 0x5fe   : > { %v2345_v47 = vpop.f32.mrf.mxu1  ;;  %v7177_v9 = vld [vmem:[%s9265_s5 + $0x3f4] ss:$8 sps:$4 sm:$0xff]   ;;  %v7175_v15 = vld [vmem:[%s9265_s5 + $0x3f0] ss:$8 sps:$4 sm:$0xff]   ;;  %v6235_v20 = vcombine.low %v6214_v14, %v6214_v14 }
 0x5ff   : > { %6188 = vmatprep.mubr.msk.bf16.mxu0 %vm1611_vm4, %v2594_v22  ;;  %v8299_v49 = vadd.f32 %v2293_v2, %v2060_v21  ;;  %v7172_v2 = vld [vmem:[%s9265_s5 + $0x404] ss:$8 sps:$4 sm:$0xff]   ;;  %v7178_v7 = vld [vmem:[%s9265_s5 + $0x528] ss:$8 sps:$4 sm:$0xff]   ;;  %v7182_v21 = vld [vmem:[%s9265_s5 + $0x518] ss:$8 sps:$4 sm:$0xff]  }
 0x600   : > { %v2347_v26 = vpop.f32.mrf.mxu1  ;;  %2764 = vmatmul.mubr.bf16.vlgmr.msra.gmra.mxu0 %v2593_v17  ;;  %v6236_v17 = vcombine.high %v6214_v14, %v6214_v14  ;;  %v7184_v19 = vld [vmem:[%s9265_s5 + $0x51c] ss:$8 sps:$4 sm:$0xff]   ;;  %v2965_v22 = vsel %vm1615_vm1, %v6235_v20, 0  ;;  %v7218_v14 = vld [vmem:[%s9265_s5 + $0x580] ss:$8 sps:$4 sm:$0xff]  }
 0x601   : > { %3041 = vmatpush1.bf16.msra.mxu0 %v7886_v0  ;;  %3060 = vmatprep.mubr.bf16.mxu0 %v7496_v18  ;;  %v7217_v4 = vld [vmem:[%s9265_s5 + $0x61c] ss:$8 sps:$4 sm:$0xff]   ;;  %v7227_v20 = vld [vmem:[%s9265_s5 + $0x5f8] ss:$8 sps:$4 sm:$0xff]  }
 0x602   : > { %3042 = vmatprep.subr.bf16.mxu0 %v7881_v58  ;;  %v2349_v52 = vpop.f32.mrf.mxu1 }
 0x603   : > { %v2354_v34 = vpack.c.bf16 %v2349_v52, %v2345_v47  ;;  %v7188_v47 = vld [vmem:[%s9265_s5 + $0x484] ss:$8 sps:$4 sm:$0xff]   ;;  %v7191_v52 = vld [vmem:[%s9265_s5 + $0x474] ss:$8 sps:$4 sm:$0xff]  }
 0x604   : > { %v2351_v28 = vpop.f32.mrf.mxu1 }
 0x605   : > { %v2355_v32 = vpack.c.bf16 %v2351_v28, %v2347_v26  ;;  %3043 = vmatpush1.bf16.msra.mxu0 %v7879_v36  ;;  %v7186_v26 = vld [vmem:[%s9265_s5 + $0x480] ss:$8 sps:$4 sm:$0xff]  }
 0x606   : > { %3209 = vmatprep.subr.bf16.mxu0 %v7128_v55  ;;  %v7189_v55 = vld [vmem:[%s9265_s5 + $0x470] ss:$8 sps:$4 sm:$0xff]  }
 0x607   : > { %6138 = vmatprep.mubr.msk.bf16.mxu1 %vm1611_vm4, %v2355_v32 }
 0x608   : > { %2525 = vmatmul.mubr.bf16.vlgmr.msra.gmra.mxu1 %v2354_v34  ;;  %6243 = vmatmul.mubr.msk.bf16.vlgmr.msra.gmra.mxu0 %vm1351_vm3, %v7129_v30 }
 0x609   : > { %2802 = vmatpush1.bf16.msra.mxu1 %v7886_v0  ;;  %3210 = vmatpush1.bf16.msra.mxu0 %v7126_v23 }
 0x60a   : > { %2803 = vmatprep.subr.bf16.mxu1 %v7881_v58  ;;  %3211 = vmatprep.subr.bf16.mxu0 %v7132_v35 }
 0x60b   : > { %2821 = vmatprep.mubr.bf16.mxu1 %v7496_v18 }
 0x60d   : > { %2804 = vmatpush1.bf16.msra.mxu1 %v7879_v36  ;;  %3212 = vmatpush1.bf16.msra.mxu0 %v7130_v37 }
 0x60e   : > { %2970 = vmatprep.subr.bf16.mxu1 %v7135_v39  ;;  %3213 = vmatprep.subr.bf16.mxu0 %v7138_v25 }
 0x610   : > { %6193 = vmatmul.mubr.msk.bf16.vlgmr.msra.gmra.mxu1 %vm1351_vm3, %v7139_v40 }
 0x611   : > { %2971 = vmatpush1.bf16.msra.mxu1 %v7133_v41  ;;  %3214 = vmatpush1.bf16.msra.mxu0 %v7136_v42 }
 0x612   : > { %2972 = vmatprep.subr.bf16.mxu1 %v7142_v43  ;;  %3215 = vmatprep.subr.bf16.mxu0 %v7145_v27 }
 0x615   : > { %2973 = vmatpush1.bf16.msra.mxu1 %v7140_v44  ;;  %3216 = vmatpush1.bf16.msra.mxu0 %v7143_v45 }
 0x616   : > { %2974 = vmatprep.subr.bf16.mxu1 %v7148_v29  ;;  %3217 = vmatprep.subr.bf16.mxu0 %v7151_v46 }
 0x619   : > { %2975 = vmatpush1.bf16.msra.mxu1 %v7146_v48  ;;  %3218 = vmatpush1.bf16.msra.mxu0 %v7149_v31 }
 0x61a   : > { %2976 = vmatprep.subr.bf16.mxu1 %v7154_v50  ;;  %3219 = vmatprep.subr.bf16.mxu0 %v7157_v51 }
 0x61d   : > { %2977 = vmatpush1.bf16.msra.mxu1 %v7152_v53  ;;  %3220 = vmatpush1.bf16.msra.mxu0 %v7155_v33  ;;  %v7192_v53 = vld [vmem:[%s9294_s4 + $0x48] sm:$0x1f]  }
 0x61e   : > { %2978 = vmatprep.subr.bf16.mxu1 %v7160_v54  ;;  %3221 = vmatprep.subr.bf16.mxu0 %v7163_v56  ;;  %v7194_v56 = vld [vmem:[%s9265_s5 + $0x658] ss:$8 sps:$4 sm:$0xff]  }
 0x621   : > { %2979 = vmatpush1.bf16.msra.mxu1 %v7158_v57  ;;  %3222 = vmatpush1.bf16.msra.mxu0 %v7161_v59  ;;  %v7199_v57 = vld [vmem:[%s9265_s5 + $0x64c] ss:$8 sps:$4 sm:$0xff]   ;;  %v7197_v59 = vld [vmem:[%s9265_s5 + $0x648] ss:$8 sps:$4 sm:$0xff]  }
 0x622   : > { %2980 = vmatprep.subr.bf16.mxu1 %v7166_v38  ;;  %3223 = vmatprep.subr.bf16.mxu0 %v7169_v60  ;;  %v7202_v38 = vld [vmem:[%s9265_s5 + $0x5b4] ss:$8 sps:$4 sm:$0xff]  }
 0x623   : > { %v7205_v60 = vld [vmem:[%s9265_s5 + $0x63c] ss:$8 sps:$4 sm:$0xff]  }
 0x625   : > { %2981 = vmatpush1.bf16.msra.mxu1 %v7164_v62  ;;  %3224 = vmatpush1.bf16.msra.mxu0 %v7167_v1  ;;  %v7208_v62 = vld [vmem:[%s9265_s5 + $0x5a4] ss:$8 sps:$4 sm:$0xff]  }
 0x626   : > { %2982 = vmatprep.subr.bf16.mxu1 %v7172_v2  ;;  %6287 = vmatprep.subr.msk.bf16.mxu0 %vm1615_vm1, %v6286_v3  ;;  %v7211_v1 = vld [vmem:[%s9265_s5 + $0x62c] ss:$8 sps:$4 sm:$0xff]   ;;  %v7209_v2 = vld [vmem:[%s9265_s5 + $0x628] ss:$8 sps:$4 sm:$0xff]  }
 0x627   : > { %v7214_v3 = vld [vmem:[%s9265_s5 + $0x594] ss:$8 sps:$4 sm:$0xff]  }
 0x629   : > { %2983 = vmatpush1.bf16.msra.mxu1 %v7170_v6  ;;  %3236 = vmatpush2.bf16.msra.mxu0 %v3204_v8  ;;  %v7212_v6 = vld [vmem:[%s9265_s5 + $0x590] ss:$8 sps:$4 sm:$0xff]  }
 0x62a   : > { %2984 = vmatprep.subr.bf16.mxu1 %v7177_v9  ;;  %3237 = vmatprep.subr.bf16.mxu0 %v7180_v11  ;;  %v7215_v8 = vld [vmem:[%s9265_s5 + $0x618] ss:$8 sps:$4 sm:$0xff]   ;;  %v7220_v9 = vld [vmem:[%s9265_s5 + $0x584] ss:$8 sps:$4 sm:$0xff]  }
 0x62b   : > { %v7223_v11 = vld [vmem:[%s9265_s5 + $0x60c] ss:$8 sps:$4 sm:$0xff]  }
 0x62d   : > { %2985 = vmatpush1.bf16.msra.mxu1 %v7175_v15  ;;  %3238 = vmatpush2.bf16.msra.mxu0 %v7178_v7  ;;  %v7221_v15 = vld [vmem:[%s9265_s5 + $0x608] ss:$8 sps:$4 sm:$0xff]   ;;  %v7226_v7 = vld [vmem:[%s9265_s5 + $0x574] ss:$8 sps:$4 sm:$0xff]  }
 0x62e   : > { %6237 = vmatprep.subr.msk.bf16.mxu1 %vm1615_vm1, %v6236_v17  ;;  %3239 = vmatprep.subr.bf16.mxu0 %v7184_v19  ;;  %v7229_v17 = vld [vmem:[%s9265_s5 + $0x5fc] ss:$8 sps:$4 sm:$0xff]   ;;  %v7224_v19 = vld [vmem:[%s9265_s5 + $0x570] ss:$8 sps:$4 sm:$0xff]  }
 0x631   : > { %2997 = vmatpush2.bf16.msra.mxu1 %v2965_v22  ;;  %3240 = vmatpush2.bf16.msra.mxu0 %v7182_v21  ;;  %v7230_v21 = vld [vmem:[%s9265_s5 + $0x560] ss:$8 sps:$4 sm:$0xff]   ;;  %v7232_v22 = vld [vmem:[%s9265_s5 + $0x564] ss:$8 sps:$4 sm:$0xff]  }
 0x632   : > { %6342 = vmatprep.subr.msk.bf16.mxu0 %vm1355_vm2, %v7883_v63  ;;  %2998 = vmatprep.subr.bf16.mxu1 %v7188_v47  ;;  %v7235_v47 = vld [vmem:[%s9265_s5 + $0x5ec] ss:$8 sps:$4 sm:$0xff]  }
 0x635   : > { %2999 = vmatpush2.bf16.msra.mxu1 %v7186_v26  ;;  %v7233_v26 = vld [vmem:[%s9265_s5 + $0x5e8] ss:$8 sps:$4 sm:$0xff]  }
 0x636   : > { %3000 = vmatprep.subr.bf16.mxu1 %v7191_v52  ;;  %v7236_v52 = vld [vmem:[%s9265_s5 + $0x550] ss:$8 sps:$4 sm:$0xff]  }
 0x639   : > { %3001 = vmatpush2.bf16.msra.mxu1 %v7189_v55  ;;  %v7238_v55 = vld [vmem:[%s9265_s5 + $0x554] ss:$8 sps:$4 sm:$0xff]  }
 0x63a   : > { %6292 = vmatprep.subr.msk.bf16.mxu1 %vm1355_vm2, %v7883_v63 }
 0x6c0   : > { %v2765_v28 = vpop.f32.mrf.mxu0 }
 0x6c2   : > { %v2767_v30 = vpop.f32.mrf.mxu0 }
 0x6c4   : > { %v2769_v32 = vpop.f32.mrf.mxu0 }
 0x6c6   : > { %v2771_v23 = vpop.f32.mrf.mxu0 }
 0x6c8   : > { %v2526_v34 = vpop.f32.mrf.mxu1  ;;  %v3062_v35 = vpop.f32.mrf.mxu0 }
 0x6c9   : > { %v2535_v37 = vadd.f32 %v2526_v34, %v8290_v13  ;;  %v7243_v34 = vld [vmem:[%s9265_s5 + $0x544] ss:$8 sps:$4 sm:$0xff]  }
 0x6ca   : > { %v2528_v39 = vpop.f32.mrf.mxu1  ;;  %v3064_v25 = vpop.f32.mrf.mxu0 }
 0x6cb   : > { %v2536_v40 = vadd.f32 %v2528_v39, %v8293_v16  ;;  %v8454_v41 = vadd.f32 %v2765_v28, %v2535_v37  ;;  %v6364_v28 = vld [vmem:[%s9265_s5 + $0x688] sm:$0xff]  ;;  %v7244_v39 = vld [vmem:[%s9265_s5 + $0x678] ss:$8 sps:$4 sm:$0xff]  }
 0x6cc   : > { %v2530_v42 = vpop.f32.mrf.mxu1  ;;  %v3066_v43 = vpop.f32.mrf.mxu0  ;;  %v7241_v37 = vld [vmem:[%s9265_s5 + $0x540] ss:$8 sps:$4 sm:$0xff]  }
 0x6cd   : > { %v2537_v27 = vadd.f32 %v2530_v42, %v8296_v24  ;;  %v8457_v44 = vadd.f32 %v2767_v30, %v2536_v40  ;;  %v3071_v63 = vpack.c.bf16 %v3066_v43, %v3062_v35  ;;  %v6386_v30 = vcombine.high %v6364_v28, %v6364_v28  ;;  %v7246_v35 = vld [vmem:[%s9265_s5 + $0x67c] ss:$8 sps:$4 sm:$0xff]   ;;  %v7251_v43 = vld [vmem:[%s9265_s5 + $0x66c] ss:$8 sps:$4 sm:$0xff]  }
 0x6ce   : > { %v2532_v45 = vpop.f32.mrf.mxu1  ;;  %v3068_v29 = vpop.f32.mrf.mxu0 }
 0x6cf   : > { %v2538_v46 = vadd.f32 %v2532_v45, %v8299_v49  ;;  %v3072_v48 = vpack.c.bf16 %v3068_v29, %v3064_v25  ;;  %v8460_v31 = vadd.f32 %v2769_v32, %v2537_v27  ;;  %v7196_v49 = vld [vmem:[%s9265_s5 + $0x65c] ss:$8 sps:$4 sm:$0xff]   ;;  %v6385_v32 = vcombine.low %v6364_v28, %v6364_v28  ;;  %v7249_v27 = vld [vmem:[%s9265_s5 + $0x668] ss:$8 sps:$4 sm:$0xff]  }
 0x6d0   : > { %v2823_v13 = vpop.f32.mrf.mxu1  ;;  %v6314_v25 = vld [vmem:[%s9265_s5 + $0x5e0] sm:$0xff]  ;;  %v7254_v45 = vld [vmem:[%s9265_s5 + $0x5d4] ss:$8 sps:$4 sm:$0xff]   ;;  %v7252_v29 = vld [vmem:[%s9265_s5 + $0x5d0] ss:$8 sps:$4 sm:$0xff]  }
 0x6d1   : > { %6288 = vmatprep.mubr.msk.bf16.mxu0 %vm1611_vm4, %v3072_v48  ;;  %v8463_v16 = vadd.f32 %v2771_v23, %v2538_v46  ;;  %v3682_v23 = vsel %vm1615_vm1, %v6385_v32, 0  ;;  %v6336_v40 = vcombine.high %v6314_v25, %v6314_v25  ;;  %v6335_v42 = vcombine.low %v6314_v25, %v6314_v25  ;;  %v7257_v46 = vld [vmem:[%s9265_s5 + $0x5c4] ss:$8 sps:$4 sm:$0xff]   ;;  %v7255_v48 = vld [vmem:[%s9265_s5 + $0x5c0] ss:$8 sps:$4 sm:$0xff]  }
 0x6d2   : > { %v2825_v50 = vpop.f32.mrf.mxu1  ;;  %3242 = vmatmul.mubr.bf16.vlgmr.msra.gmra.mxu0 %v3071_v63 }
 0x6d3   : > { %3519 = vmatpush1.bf16.msra.mxu0 %v7886_v0  ;;  %3538 = vmatprep.mubr.bf16.mxu0 %v7496_v18  ;;  %v3443_v63 = vsel %vm1615_vm1, %v6335_v42, 0 }
 0x6d4   : > { %3520 = vmatprep.subr.bf16.mxu0 %v7881_v58  ;;  %v2827_v24 = vpop.f32.mrf.mxu1 }
 0x6d5   : > { %v2832_v54 = vpack.c.bf16 %v2827_v24, %v2823_v13 }
 0x6d6   : > { %v2829_v51 = vpop.f32.mrf.mxu1 }
 0x6d7   : > { %v2833_v33 = vpack.c.bf16 %v2829_v51, %v2825_v50  ;;  %3521 = vmatpush1.bf16.msra.mxu0 %v7879_v36 }
 0x6d8   : > { %3687 = vmatprep.subr.bf16.mxu0 %v7196_v49 }
 0x6d9   : > { %6238 = vmatprep.mubr.msk.bf16.mxu1 %vm1611_vm4, %v2833_v33 }
 0x6da   : > { %3003 = vmatmul.mubr.bf16.vlgmr.msra.gmra.mxu1 %v2832_v54  ;;  %6343 = vmatmul.mubr.msk.bf16.vlgmr.msra.gmra.mxu0 %vm1351_vm3, %v7192_v53 }
 0x6db   : > { %3280 = vmatpush1.bf16.msra.mxu1 %v7886_v0  ;;  %3299 = vmatprep.mubr.bf16.mxu1 %v7496_v18  ;;  %v7193_v0 = vld [vmem:[%s9294_s4 + $0x40] sm:$0x1f]  }
 0x6dc   : > { %3281 = vmatprep.subr.bf16.mxu1 %v7881_v58  ;;  %3688 = vmatpush1.bf16.msra.mxu0 %v7194_v56  ;;  %v7200_v58 = vld [vmem:[%s9265_s5 + $0x5b0] ss:$8 sps:$4 sm:$0xff]  }
 0x6dd   : > { %3689 = vmatprep.subr.bf16.mxu0 %v7199_v57 }
 0x6df   : > { %3282 = vmatpush1.bf16.msra.mxu1 %v7879_v36  ;;  %v7206_v36 = vld [vmem:[%s9265_s5 + $0x5a0] ss:$8 sps:$4 sm:$0xff]  }
 0x6e0   : > { %3690 = vmatpush1.bf16.msra.mxu0 %v7197_v59  ;;  %3448 = vmatprep.subr.bf16.mxu1 %v7202_v38 }
 0x6e1   : > { %3691 = vmatprep.subr.bf16.mxu0 %v7205_v60 }
 0x6e2   : > { %6293 = vmatmul.mubr.msk.bf16.vlgmr.msra.gmra.mxu1 %vm1351_vm3, %v7193_v0 }
 0x6e3   : > { %3449 = vmatpush1.bf16.msra.mxu1 %v7200_v58 }
 0x6e4   : > { %3692 = vmatpush1.bf16.msra.mxu0 %v7203_v61  ;;  %3450 = vmatprep.subr.bf16.mxu1 %v7208_v62 }
 0x6e5   : > { %3693 = vmatprep.subr.bf16.mxu0 %v7211_v1 }
 0x6e7   : > { %3451 = vmatpush1.bf16.msra.mxu1 %v7206_v36 }
 0x6e8   : > { %3694 = vmatpush1.bf16.msra.mxu0 %v7209_v2  ;;  %3452 = vmatprep.subr.bf16.mxu1 %v7214_v3 }
 0x6e9   : > { %3695 = vmatprep.subr.bf16.mxu0 %v7217_v4 }
 0x6eb   : > { %3453 = vmatpush1.bf16.msra.mxu1 %v7212_v6 }
 0x6ec   : > { %3696 = vmatpush1.bf16.msra.mxu0 %v7215_v8  ;;  %3454 = vmatprep.subr.bf16.mxu1 %v7220_v9 }
 0x6ed   : > { %3697 = vmatprep.subr.bf16.mxu0 %v7223_v11 }
 0x6ef   : > { %3455 = vmatpush1.bf16.msra.mxu1 %v7218_v14  ;;  %v7260_v14 = vld [vmem:[%s9268_s8 + $0x78] sm:$0xff]  }
 0x6f0   : > { %3698 = vmatpush1.bf16.msra.mxu0 %v7221_v15  ;;  %3456 = vmatprep.subr.bf16.mxu1 %v7226_v7  ;;  %v7261_v15 = vld [vmem:[%s9268_s8 + $0x70] sm:$0xff]   ;;  %v7262_v7 = vld [vmem:[%s9268_s8 + $0x68] sm:$0xff]  }
 0x6f1   : > { %3699 = vmatprep.subr.bf16.mxu0 %v7229_v17  ;;  %v7263_v17 = vld [vmem:[%s9268_s8 + $0x60] sm:$0xff]  }
 0x6f3   : > { %3457 = vmatpush1.bf16.msra.mxu1 %v7224_v19  ;;  %v7264_v19 = vld [vmem:[%s9268_s8 + $0x58] sm:$0xff]  }
 0x6f4   : > { %3700 = vmatpush1.bf16.msra.mxu0 %v7227_v20  ;;  %3458 = vmatprep.subr.bf16.mxu1 %v7232_v22  ;;  %v7265_v20 = vld [vmem:[%s9268_s8 + $0x50] sm:$0xff]  }
 0x6f5   : > { %3701 = vmatprep.subr.bf16.mxu0 %v7235_v47  ;;  %v7267_v22 = vld [vmem:[%s9268_s8 + $0x90] sm:$0xff]  }
 0x6f7   : > { %3459 = vmatpush1.bf16.msra.mxu1 %v7230_v21  ;;  %v7266_v21 = vld [vmem:[%s9268_s8 + $0x98] sm:$0xff]  }
 0x6f8   : > { %3702 = vmatpush1.bf16.msra.mxu0 %v7233_v26  ;;  %3460 = vmatprep.subr.bf16.mxu1 %v7238_v55  ;;  %v3734_v26 = vld [vmem:[%s9266_s6] sm:$0x3] }
 0x6f9   : > { %6387 = vmatprep.subr.msk.bf16.mxu0 %vm1615_vm1, %v6386_v30  ;;  %v3739_v30 = vrot.slane %v3734_v26, %v1316_v12 }
 0x6fb   : > { %3461 = vmatpush1.bf16.msra.mxu1 %v7236_v52 }
 0x6fc   : > { %3714 = vmatpush2.bf16.msra.mxu0 %v3682_v23  ;;  %3462 = vmatprep.subr.bf16.mxu1 %v7243_v34 }
 0x6fd   : > { %3715 = vmatprep.subr.bf16.mxu0 %v7246_v35 }
 0x6ff   : > { %3463 = vmatpush1.bf16.msra.mxu1 %v7241_v37  ;;  %v3743_v37 = vrot.slane %v3734_v26, %v1320_v5  ;;  %v7286_v26 = vld [vmem:[%s9268_s8 + $0xa0] sm:$0xff]  }
 0x700   : > { %3716 = vmatpush2.bf16.msra.mxu0 %v7244_v39  ;;  %6337 = vmatprep.subr.msk.bf16.mxu1 %vm1615_vm1, %v6336_v40 }
 0x701   : > { %3717 = vmatprep.subr.bf16.mxu0 %v7251_v43 }
 0x703   : > { %3475 = vmatpush2.bf16.msra.mxu1 %v3443_v63 }
 0x704   : > { %3718 = vmatpush2.bf16.msra.mxu0 %v7249_v27  ;;  %3476 = vmatprep.subr.bf16.mxu1 %v7254_v45 }
 0x705   : > { %3963 = vmatprep.subr.bf16.mxu0 %v7496_v18 }
 0x707   : > { %3477 = vmatpush2.bf16.msra.mxu1 %v7252_v29 }
 0x708   : > { %3478 = vmatprep.subr.bf16.mxu1 %v7257_v46 }
 0x70b   : > { %3479 = vmatpush2.bf16.msra.mxu1 %v7255_v48 }
 0x792   : > { %v3243_v13 = vpop.f32.mrf.mxu0 }
 0x794   : > { %v3245_v50 = vpop.f32.mrf.mxu0 }
 0x796   : > { %v3247_v24 = vpop.f32.mrf.mxu0 }
 0x798   : > { %v3249_v49 = vpop.f32.mrf.mxu0 }
 0x79a   : > { %v3004_v51 = vpop.f32.mrf.mxu1  ;;  %v3540_v53 = vpop.f32.mrf.mxu0 }
 0x79b   : > { %v3013_v33 = vadd.f32 %v3004_v51, %v8454_v41  ;;  %v7258_v41 = vld [vmem:[%s9268_s8 + $0x88] sm:$0xff]  }
 0x79c   : > { %v3006_v54 = vpop.f32.mrf.mxu1  ;;  %v3542_v56 = vpop.f32.mrf.mxu0 }
 0x79d   : > { %v3014_v57 = vadd.f32 %v3006_v54, %v8457_v44  ;;  %v3252_v59 = vadd.f32 %v3243_v13, %v3013_v33  ;;  %v6391_v33 = vld [vmem:[%s9267_s7 + $0x1] sm:$0x1]  ;;  %v7268_v54 = vld [vmem:[%s9268_s8 + $0x38] sm:$0xff]  }
 0x79e   : > { %v3008_v38 = vpop.f32.mrf.mxu1  ;;  %v3544_v60 = vpop.f32.mrf.mxu0 }
 0x79f   : > { %v3015_v0 = vadd.f32 %v3008_v38, %v8460_v31  ;;  %v3253_v58 = vadd.f32 %v3245_v50, %v3014_v57  ;;  %v3549_v61 = vpack.c.bf16 %v3544_v60, %v3540_v53  ;;  %v3756_v53 = vld [vmem:[%s9267_s7] sm:$0x1]  ;;  %v7270_v57 = vld [vmem:[%s9268_s8 + $0x28] sm:$0xff]   ;;  %v7272_v38 = vld [vmem:[%s9268_s8 + $0x18] sm:$0xff]  }
 0x7a0   : > { %v3010_v62 = vpop.f32.mrf.mxu1  ;;  %v3546_v1 = vpop.f32.mrf.mxu0  ;;  %v7273_v60 = vld [vmem:[%s9268_s8 + $0x10] sm:$0xff]  }
 0x7a1   : > { %v3016_v36 = vadd.f32 %v3010_v62, %v8463_v16  ;;  %v3550_v2 = vpack.c.bf16 %v3546_v1, %v3542_v56  ;;  %v3254_v3 = vadd.f32 %v3247_v24, %v3015_v0  ;;  %v7259_v16 = vld [vmem:[%s9268_s8 + $0x80] sm:$0xff]   ;;  %v7269_v56 = vld [vmem:[%s9268_s8 + $0x30] sm:$0xff]   ;;  %v7274_v0 = vld [vmem:[%s9268_s8 + $0x8] sm:$0xff]  }
 0x7a2   : > { %v3301_v4 = vpop.f32.mrf.mxu1  ;;  %v7277_v62 = vld [vmem:[%s9268_s8 + $0x40] sm:$0xff]  }
 0x7a3   : > { %6388 = vmatprep.mubr.msk.bf16.mxu0 %vm1611_vm4, %v3550_v2  ;;  %v3255_v44 = vadd.f32 %v3249_v49, %v3016_v36 }
 0x7a4   : > { %v3303_v6 = vpop.f32.mrf.mxu1  ;;  %3720 = vmatmul.mubr.bf16.vlgmr.msra.gmra.mxu0 %v3549_v61  ;;  %v7276_v61 = vld [vmem:[%s9268_s8 + $0x48] sm:$0xff]  }
 0x7a5   : > { %3964 = vmatpush1.bf16.msra.mxu0 %v7258_v41  ;;  %v7278_v41 = vld [vmem:[%s9268_s8 + $0xd8] sm:$0xff]  }
 0x7a6   : > { %v3305_v31 = vpop.f32.mrf.mxu1  ;;  %3965 = vmatprep.subr.bf16.mxu0 %v7496_v18 }
 0x7a7   : > { %v3310_v11 = vpack.c.bf16 %v3305_v31, %v3301_v4 }
 0x7a8   : > { %v3307_v8 = vpop.f32.mrf.mxu1 }
 0x7a9   : > { %v3311_v9 = vpack.c.bf16 %v3307_v8, %v3303_v6  ;;  %3966 = vmatpush1.bf16.msra.mxu0 %v7259_v16  ;;  %v7279_v6 = vld [vmem:[%s9268_s8 + $0xd0] sm:$0xff]  }
 0x7aa   : > { %3967 = vmatprep.subr.bf16.mxu0 %v7496_v18 }
 0x7ab   : > { %6338 = vmatprep.mubr.msk.bf16.mxu1 %vm1611_vm4, %v3311_v9 }
 0x7ac   : > { %3481 = vmatmul.mubr.bf16.vlgmr.msra.gmra.mxu1 %v3310_v11  ;;  %v7280_v11 = vld [vmem:[%s9268_s8 + $0xc8] sm:$0xff]  }
 0x7ad   : > { %3800 = vmatprep.mubr.bf16.mxu1 %v7496_v18  ;;  %3968 = vmatpush1.bf16.msra.mxu0 %v7260_v14 }
 0x7ae   : > { %3969 = vmatprep.subr.bf16.mxu0 %v7496_v18 }
 0x7b1   : > { %3970 = vmatpush1.bf16.msra.mxu0 %v7261_v15 }
 0x7b2   : > { %3971 = vmatprep.subr.bf16.mxu0 %v7496_v18 }
 0x7b5   : > { %3972 = vmatpush1.bf16.msra.mxu0 %v7262_v7  ;;  %v7281_v7 = vld [vmem:[%s9268_s8 + $0xc0] sm:$0xff]  }
 0x7b6   : > { %3973 = vmatprep.subr.bf16.mxu0 %v7496_v18 }
 0x7b9   : > { %3974 = vmatpush1.bf16.msra.mxu0 %v7263_v17  ;;  %v6436_v17 = vld [vmem:[%s9267_s7 + $0x2] sm:$0x1] }
 0x7ba   : > { %3975 = vmatprep.subr.bf16.mxu0 %v7496_v18 }
 0x7bd   : > { %3976 = vmatpush1.bf16.msra.mxu0 %v7264_v19  ;;  %v7282_v19 = vld [vmem:[%s9268_s8 + $0xb8] sm:$0xff]  }
 0x7be   : > { %3977 = vmatprep.subr.bf16.mxu0 %v7496_v18 }
 0x7c1   : > { %3978 = vmatpush1.bf16.msra.mxu0 %v7265_v20  ;;  %v7283_v20 = vld [vmem:[%s9268_s8 + $0xb0] sm:$0xff]  }
 0x7c2   : > { %3991 = vmatprep.subr.bf16.mxu0 %v7496_v18 }
 0x7c5   : > { %3992 = vmatpush2.bf16.msra.mxu0 %v7266_v21  ;;  %v7284_v21 = vld [vmem:[%s9268_s8 + $0xa8] sm:$0xff]  }
 0x7c6   : > { %3993 = vmatprep.subr.bf16.mxu0 %v7496_v18 }
 0x7c9   : > { %3994 = vmatpush2.bf16.msra.mxu0 %v7267_v22  ;;  %v6470_v22 = vld [vmem:[%s9267_s7 + $0x3] sm:$0x1] }
 0x864   : > { %v3721_v47 = vpop.f32.mrf.mxu0 }
 0x866   : > { %v3723_v52 = vpop.f32.mrf.mxu0 }
 0x868   : > { %v3725_v35 = vpop.f32.mrf.mxu0 }
 0x86a   : > { %v3727_v45 = vpop.f32.mrf.mxu0 }
 0x86c   : > { %v3482_v55 = vpop.f32.mrf.mxu1 }
 0x86d   : > { %v3491_v28 = vadd.f32 %v3482_v55, %v3252_v59  ;;  %v7271_v59 = vld [vmem:[%s9268_s8 + $0x20] sm:$0xff]   ;;  %v7288_v55 = vld [vmem:[%s9268_s8 + $0xe8] sm:$0xff]  }
 0x86e   : > { %v3484_v32 = vpop.f32.mrf.mxu1 }
 0x86f   : > { %v3730_v23 = vadd.f32 %v3721_v47, %v3491_v28  ;;  %v3492_v34 = vadd.f32 %v3484_v32, %v3253_v58  ;;  %v7275_v58 = vld [vmem:[%s9268_s8] sm:$0xff]   ;;  %v7285_v47 = vld [vmem:[%s9268_s8 + $0x128] sm:$0xff]   ;;  %v7289_v28 = vld [vmem:[%s9268_s8 + $0x118] sm:$0xff]  }
 0x870   : > { %v3486_v39 = vpop.f32.mrf.mxu1  ;;  %v7291_v32 = vld [vmem:[%s9268_s8 + $0x110] sm:$0xff]  }
 0x871   : > { %v3731_v25 = vadd.f32 %v3723_v52, %v3492_v34  ;;  %v3493_v40 = vadd.f32 %v3486_v39, %v3254_v3  ;;  %v3746_v42 = vadd.f32 %v3739_v30, %v3730_v23  ;;  %v7287_v52 = vld [vmem:[%s9268_s8 + $0x120] sm:$0xff]   ;;  %v7292_v23 = vld [vmem:[%s9268_s8 + $0x108] sm:$0xff]   ;;  %v7296_v39 = vld [vmem:[%s9268_s8 + $0x138] sm:$0xff]  }
 0x872   : > { %v3488_v43 = vpop.f32.mrf.mxu1  ;;  %v7293_v34 = vld [vmem:[%s9268_s8 + $0x100] sm:$0xff]  }
 0x873   : > { %v3732_v27 = vadd.f32 %v3725_v35, %v3493_v40  ;;  %v3494_v63 = vadd.f32 %v3488_v43, %v3255_v44  ;;  %v3747_v29 = vadd.f32 %v3743_v37, %v3731_v25  ;;  %7388 = vtanh.f32 %v3746_v42  ;;  %v7294_v35 = vld [vmem:[%s9268_s8 + $0xf8] sm:$0xff]   ;;  %v7297_v25 = vld [vmem:[%s9268_s8 + $0x130] sm:$0xff]  }
 0x875   : > { %v3748_v46 = vadd.f32 %v3739_v30, %v3732_v27  ;;  %v3733_v48 = vadd.f32 %v3727_v45, %v3494_v63  ;;  %v7290_v30 = vld [vmem:[%s9268_s8 + $0xe0] sm:$0xff]  }
 0x877   : > { %7390 = vtanh.f32 %v3748_v46  ;;  %v3749_v12 = vadd.f32 %v3743_v37, %v3733_v48  ;;  %v7295_v37 = vld [vmem:[%s9268_s8 + $0xf0] sm:$0xff]  }
 0x878   : > { %7392 = vtanh.f32 %v3747_v29 }
 0x879   : > { %7394 = vtanh.f32 %v3749_v12 }
 0x880   : > { %v7389_v13 = vpop.eup %7388 }
 0x884   : > { %v7391_v50 = vpop.eup %7390 }
 0x885   : > { %v7393_v10 = vpop.eup %7392  ;;  %v3754_v5 = vpack.c.bf16 %v7391_v50, %v7389_v13 }
 0x886   : > { %v7395_v24 = vpop.eup %7394 }
 0x887   : > { %v8666_v49 = vpack.c.bf16 %v7395_v24, %v7393_v10  ;;  %v8669_v51 = vsel %vm3761_vm5, %v3754_v5, 0 }
 0x889   : > { %6389 = vmatprep.subr.msk.bf16.mxu1 %vm3761_vm5, %v8666_v49  ;;  %6437 = vmatprep.subr.msk.bf16.mxu0 %vm3761_vm5, %v8666_v49 }
 0x88a   : > { %3783 = vmatpush1.bf16.msra.mxu1 %v8669_v51 }
 0x88b   : > { %6392 = vmatprep.subr.msk.bf16.mxu1 %vm3761_vm5, %v8666_v49 }
 0x88d   : > { %6390 = vmatmul.mubr.msk.bf16.vlgmr.msra.gmra.mxu1 %vm3757_vm6, %v3756_v53 }
 0x88e   : > { %3851 = vmatpush1.bf16.msra.mxu1 %v8669_v51  ;;  %3868 = vmatprep.mubr.bf16.mxu1 %v7496_v18 }
 0x88f   : > { %4066 = vmatprep.subr.bf16.mxu1 %v7496_v18 }
 0x895   : > { %6393 = vmatmul.mubr.msk.bf16.vlgmr.msra.gmra.mxu1 %vm3757_vm6, %v6391_v33 }
 0x896   : > { %4067 = vmatpush1.bf16.msra.mxu1 %v7268_v54 }
 0x897   : > { %4068 = vmatprep.subr.bf16.mxu1 %v7496_v18 }
 0x89a   : > { %4069 = vmatpush1.bf16.msra.mxu1 %v7269_v56  ;;  %v6504_v56 = vld [vmem:[%s9267_s7 + $0x4] sm:$0x1] }
 0x89b   : > { %4070 = vmatprep.subr.bf16.mxu1 %v7496_v18 }
 0x89e   : > { %4071 = vmatpush1.bf16.msra.mxu1 %v7270_v57  ;;  %v7298_v57 = vld [vmem:[%s9268_s8 + $0x178] sm:$0xff]  }
 0x89f   : > { %4072 = vmatprep.subr.bf16.mxu1 %v7496_v18 }
 0x8a2   : > { %4073 = vmatpush1.bf16.msra.mxu1 %v7271_v59 }
 0x8a3   : > { %4074 = vmatprep.subr.bf16.mxu1 %v7496_v18 }
 0x8a6   : > { %4075 = vmatpush1.bf16.msra.mxu1 %v7272_v38 }
 0x8a7   : > { %4076 = vmatprep.subr.bf16.mxu1 %v7496_v18 }
 0x8aa   : > { %4077 = vmatpush1.bf16.msra.mxu1 %v7273_v60 }
 0x8ab   : > { %4078 = vmatprep.subr.bf16.mxu1 %v7496_v18 }
 0x8ae   : > { %4079 = vmatpush1.bf16.msra.mxu1 %v7274_v0  ;;  %v7299_v0 = vld [vmem:[%s9268_s8 + $0x170] sm:$0xff]  }
 0x8af   : > { %4080 = vmatprep.subr.bf16.mxu1 %v7496_v18 }
 0x8b2   : > { %4081 = vmatpush1.bf16.msra.mxu1 %v7275_v58  ;;  %v7300_v58 = vld [vmem:[%s9268_s8 + $0x168] sm:$0xff]  }
 0x8b3   : > { %4094 = vmatprep.subr.bf16.mxu1 %v7496_v18 }
 0x8b6   : > { %4095 = vmatpush2.bf16.msra.mxu1 %v7276_v61  ;;  %v6538_v61 = vld [vmem:[%s9267_s7 + $0x5] sm:$0x1] }
 0x8b7   : > { %4096 = vmatprep.subr.bf16.mxu1 %v7496_v18 }
 0x8ba   : > { %4097 = vmatpush2.bf16.msra.mxu1 %v7277_v62  ;;  %v7301_v62 = vld [vmem:[%s9268_s8 + $0x1c8] sm:$0xff]  }
 0x8bb   : > { %4238 = vmatprep.subr.bf16.mxu1 %v7496_v18 }
 0x94d   : > { %v3802_v1 = vpop.f32.mrf.mxu1 }
 0x94e   : > { %v3809_v3 = vpack.c.bf16 %v3802_v1, %v3802_v1  ;;  %v7302_v1 = vld [vmem:[%s9268_s8 + $0x160] sm:$0xff]  }
 0x94f   : > { %v3804_v36 = vpop.f32.mrf.mxu1 }
 0x950   : > { %v3810_v2 = vpack.c.bf16 %v3804_v36, %v3804_v36  ;;  %v7303_v36 = vld [vmem:[%s9268_s8 + $0x1c0] sm:$0xff]  }
 0x951   : > { %v3806_v4 = vpop.f32.mrf.mxu1 }
 0x952   : > { %6435 = vmatprep.mubr.msk.bf16.mxu1 %vm523_vm0, %v3810_v2  ;;  %v7304_v2 = vld [vmem:[%s9268_s8 + $0x158] sm:$0xff]   ;;  %v7307_v4 = vld [vmem:[%s9268_s8 + $0x1b0] sm:$0xff]  }
 0x953   : > { %v3807_v44 = vpop.f32.mrf.mxu1  ;;  %4099 = vmatmul.mubr.bf16.vlgmr.msra.gmra.mxu1 %v3809_v3  ;;  %v7306_v3 = vld [vmem:[%s9268_s8 + $0x150] sm:$0xff]  }
 0x954   : > { %4239 = vmatpush1.bf16.msra.mxu1 %v7278_v41  ;;  %v7305_v41 = vld [vmem:[%s9268_s8 + $0x1b8] sm:$0xff]   ;;  %v7308_v44 = vld [vmem:[%s9268_s8 + $0x148] sm:$0xff]  }
 0x955   : > { %v3870_v31 = vpop.f32.mrf.mxu1  ;;  %4240 = vmatprep.subr.bf16.mxu1 %v7496_v18 }
 0x956   : > { %v3877_v16 = vpack.c.bf16 %v3870_v31, %v3870_v31  ;;  %v7310_v31 = vld [vmem:[%s9268_s8 + $0x140] sm:$0xff]  }
 0x957   : > { %v3872_v8 = vpop.f32.mrf.mxu1 }
 0x958   : > { %v3878_v9 = vpack.c.bf16 %v3872_v8, %v3872_v8  ;;  %4241 = vmatpush1.bf16.msra.mxu1 %v7279_v6  ;;  %v7309_v6 = vld [vmem:[%s9268_s8 + $0x1a8] sm:$0xff]   ;;  %v7311_v8 = vld [vmem:[%s9268_s8 + $0x1a0] sm:$0xff]  }
 0x959   : > { %4242 = vmatprep.subr.bf16.mxu1 %v7496_v18  ;;  %v3874_v14 = vpop.f32.mrf.mxu1 }
 0x95a   : > { %6424 = vmatprep.mubr.msk.bf16.mxu0 %vm523_vm0, %v3878_v9  ;;  %v7312_v9 = vld [vmem:[%s9268_s8 + $0x188] sm:$0xff]   ;;  %v7315_v14 = vld [vmem:[%s9268_s8 + $0x190] sm:$0xff]  }
 0x95b   : > { %3996 = vmatmul.mubr.bf16.vlgmr.msra.gmra.mxu0 %v3877_v16  ;;  %v3875_v15 = vpop.f32.mrf.mxu1  ;;  %v7314_v16 = vld [vmem:[%s9268_s8 + $0x180] sm:$0xff]  }
 0x95c   : > { %4126 = vmatpush1.bf16.msra.mxu0 %v8669_v51  ;;  %4243 = vmatpush1.bf16.msra.mxu1 %v7280_v11  ;;  %v7313_v11 = vld [vmem:[%s9268_s8 + $0x198] sm:$0xff]  }
 0x95d   : > { %6471 = vmatprep.subr.msk.bf16.mxu0 %vm3761_vm5, %v8666_v49  ;;  %4244 = vmatprep.subr.bf16.mxu1 %v7496_v18  ;;  %v7316_v15 = vld [vmem:[%s9268_s8 + $0x1d8] sm:$0xff]  }
 0x95e   : > { %4143 = vmatprep.mubr.bf16.mxu0 %v7496_v18 }
 0x960   : > { %4245 = vmatpush1.bf16.msra.mxu1 %v7281_v7  ;;  %v7317_v7 = vld [vmem:[%s9268_s8 + $0x1d0] sm:$0xff]  }
 0x961   : > { %4246 = vmatprep.subr.bf16.mxu1 %v7496_v18 }
 0x963   : > { %6438 = vmatmul.mubr.msk.bf16.vlgmr.msra.gmra.mxu0 %vm3757_vm6, %v6436_v17 }
 0x964   : > { %4247 = vmatpush1.bf16.msra.mxu1 %v7282_v19  ;;  %4299 = vmatpush1.bf16.msra.mxu0 %v8669_v51 }
 0x965   : > { %4248 = vmatprep.subr.bf16.mxu1 %v7496_v18  ;;  %4316 = vmatprep.mubr.bf16.mxu0 %v7496_v18 }
 0x966   : > { %4411 = vmatprep.subr.bf16.mxu0 %v7496_v18 }
 0x968   : > { %4249 = vmatpush1.bf16.msra.mxu1 %v7283_v20 }
 0x969   : > { %4250 = vmatprep.subr.bf16.mxu1 %v7496_v18 }
 0x96b   : > { %6472 = vmatmul.mubr.msk.bf16.vlgmr.msra.gmra.mxu0 %vm3757_vm6, %v6470_v22 }
 0x96c   : > { %4251 = vmatpush1.bf16.msra.mxu1 %v7284_v21  ;;  %4412 = vmatpush1.bf16.msra.mxu0 %v7285_v47 }
 0x96d   : > { %4252 = vmatprep.subr.bf16.mxu1 %v7496_v18  ;;  %4413 = vmatprep.subr.bf16.mxu0 %v7496_v18 }
 0x970   : > { %4253 = vmatpush1.bf16.msra.mxu1 %v7286_v26  ;;  %4414 = vmatpush1.bf16.msra.mxu0 %v7287_v52 }
 0x971   : > { %4266 = vmatprep.subr.bf16.mxu1 %v7496_v18  ;;  %4415 = vmatprep.subr.bf16.mxu0 %v7496_v18 }
 0x974   : > { %4267 = vmatpush2.bf16.msra.mxu1 %v7288_v55  ;;  %4416 = vmatpush1.bf16.msra.mxu0 %v7289_v28 }
 0x975   : > { %4268 = vmatprep.subr.bf16.mxu1 %v7496_v18  ;;  %4417 = vmatprep.subr.bf16.mxu0 %v7496_v18 }
 0x978   : > { %4269 = vmatpush2.bf16.msra.mxu1 %v7290_v30  ;;  %4418 = vmatpush1.bf16.msra.mxu0 %v7291_v32 }
 0x979   : > { %6505 = vmatprep.subr.msk.bf16.mxu1 %vm3761_vm5, %v8666_v49  ;;  %4419 = vmatprep.subr.bf16.mxu0 %v7496_v18 }
 0x97c   : > { %4420 = vmatpush1.bf16.msra.mxu0 %v7292_v23 }
 0x97d   : > { %4421 = vmatprep.subr.bf16.mxu0 %v7496_v18 }
 0x980   : > { %4422 = vmatpush1.bf16.msra.mxu0 %v7293_v34 }
 0x981   : > { %4423 = vmatprep.subr.bf16.mxu0 %v7496_v18 }
 0x984   : > { %4424 = vmatpush1.bf16.msra.mxu0 %v7294_v35 }
 0x985   : > { %4425 = vmatprep.subr.bf16.mxu0 %v7496_v18 }
 0x988   : > { %4426 = vmatpush1.bf16.msra.mxu0 %v7295_v37 }
 0x989   : > { %4439 = vmatprep.subr.bf16.mxu0 %v7496_v18 }
 0x98c   : > { %4440 = vmatpush2.bf16.msra.mxu0 %v7296_v39 }
 0x98d   : > { %4441 = vmatprep.subr.bf16.mxu0 %v7496_v18 }
 0x990   : > { %4442 = vmatpush2.bf16.msra.mxu0 %v7297_v25 }
 0x991   : > { %6539 = vmatprep.subr.msk.bf16.mxu0 %vm3761_vm5, %v8666_v49 }
 0xa13   : > { %v4100_v40 = vpop.f32.mrf.mxu1 }
 0xa15   : > { %v4102_v42 = vpop.f32.mrf.mxu1 }
 0xa16   : > { %v6572_v42 = vld [vmem:[%s9267_s7 + $0x6] sm:$0x1] }
 0xa17   : > { %v4103_v43 = vpop.f32.mrf.mxu1 }
 0xa18   : > { %v7318_v43 = vld [vmem:[%s9268_s8 + $0x218] sm:$0xff]  }
 0xa19   : > { %v4104_v27 = vpop.f32.mrf.mxu1 }
 0xa1b   : > { %v3997_v63 = vpop.f32.mrf.mxu0 }
 0xa1c   : > { %v8828_v45 = vadd.f32 %v4100_v40, %v3997_v63 }
 0xa1d   : > { %v3999_v29 = vpop.f32.mrf.mxu0 }
 0xa1e   : > { %v7319_v29 = vld [vmem:[%s9268_s8 + $0x210] sm:$0xff]  }
 0xa1f   : > { %v4000_v46 = vpop.f32.mrf.mxu0 }
 0xa20   : > { %v7320_v46 = vld [vmem:[%s9268_s8 + $0x208] sm:$0xff]  }
 0xa21   : > { %v4001_v48 = vpop.f32.mrf.mxu0 }
 0xa22   : > { %v6606_v48 = vld [vmem:[%s9267_s7 + $0x7] sm:$0x1] }
 0xa23   : > { %v4145_v12 = vpop.f32.mrf.mxu0 }
 0xa24   : > { %v4152_v10 = vpack.c.bf16 %v4145_v12, %v4145_v12  ;;  %v7321_v12 = vld [vmem:[%s9268_s8 + $0x268] sm:$0xff]  }
 0xa25   : > { %v4147_v13 = vpop.f32.mrf.mxu0 }
 0xa26   : > { %v4153_v50 = vpack.c.bf16 %v4147_v13, %v4147_v13  ;;  %v7322_v13 = vld [vmem:[%s9268_s8 + $0x200] sm:$0xff]  }
 0xa27   : > { %v4149_v5 = vpop.f32.mrf.mxu0 }
 0xa28   : > { %6469 = vmatprep.mubr.msk.bf16.mxu1 %vm523_vm0, %v4153_v50  ;;  %v7323_v50 = vld [vmem:[%s9268_s8 + $0x260] sm:$0xff]   ;;  %v7325_v5 = vld [vmem:[%s9268_s8 + $0x258] sm:$0xff]  }
 0xa29   : > { %v4150_v24 = vpop.f32.mrf.mxu0  ;;  %4271 = vmatmul.mubr.bf16.vlgmr.msra.gmra.mxu1 %v4152_v10  ;;  %v7324_v10 = vld [vmem:[%s9268_s8 + $0x1f8] sm:$0xff]  }
 0xa2a   : > { %4472 = vmatpush1.bf16.msra.mxu1 %v8669_v51  ;;  %4489 = vmatprep.mubr.bf16.mxu1 %v7496_v18  ;;  %v7326_v24 = vld [vmem:[%s9268_s8 + $0x1f0] sm:$0xff]  }
 0xa2b   : > { %v4318_v53 = vpop.f32.mrf.mxu0  ;;  %4584 = vmatprep.subr.bf16.mxu1 %v7496_v18 }
 0xa2c   : > { %v4325_v59 = vpack.c.bf16 %v4318_v53, %v4318_v53  ;;  %v7327_v53 = vld [vmem:[%s9268_s8 + $0x250] sm:$0xff]  }
 0xa2d   : > { %v4320_v33 = vpop.f32.mrf.mxu0 }
 0xa2e   : > { %v4326_v54 = vpack.c.bf16 %v4320_v33, %v4320_v33  ;;  %v7328_v33 = vld [vmem:[%s9268_s8 + $0x1e8] sm:$0xff]  }
 0xa2f   : > { %v4322_v38 = vpop.f32.mrf.mxu0 }
 0xa30   : > { %6503 = vmatprep.mubr.msk.bf16.mxu0 %vm523_vm0, %v4326_v54  ;;  %v7329_v54 = vld [vmem:[%s9268_s8 + $0x248] sm:$0xff]   ;;  %v7333_v38 = vld [vmem:[%s9268_s8 + $0x238] sm:$0xff]  }
 0xa31   : > { %4444 = vmatmul.mubr.bf16.vlgmr.msra.gmra.mxu0 %v4325_v59  ;;  %6506 = vmatmul.mubr.msk.bf16.vlgmr.msra.gmra.mxu1 %vm3757_vm6, %v6504_v56  ;;  %v4323_v60 = vpop.f32.mrf.mxu0  ;;  %v7330_v56 = vld [vmem:[%s9268_s8 + $0x1e0] sm:$0xff]   ;;  %v7332_v59 = vld [vmem:[%s9268_s8 + $0x228] sm:$0xff]  }
 0xa32   : > { %4585 = vmatpush1.bf16.msra.mxu1 %v7298_v57  ;;  %4645 = vmatpush1.bf16.msra.mxu0 %v8669_v51  ;;  %v7331_v57 = vld [vmem:[%s9268_s8 + $0x240] sm:$0xff]  }
 0xa33   : > { %4586 = vmatprep.subr.bf16.mxu1 %v7496_v18  ;;  %4662 = vmatprep.mubr.bf16.mxu0 %v7496_v18  ;;  %v7334_v60 = vld [vmem:[%s9268_s8 + $0x220] sm:$0xff]  }
 0xa34   : > { %4757 = vmatprep.subr.bf16.mxu0 %v7496_v18 }
 0xa36   : > { %4587 = vmatpush1.bf16.msra.mxu1 %v7299_v0  ;;  %v7335_v0 = vld [vmem:[%s9268_s8 + $0x230] sm:$0xff]  }
 0xa37   : > { %4588 = vmatprep.subr.bf16.mxu1 %v7496_v18 }
 0xa39   : > { %6540 = vmatmul.mubr.msk.bf16.vlgmr.msra.gmra.mxu0 %vm3757_vm6, %v6538_v61  ;;  %v7337_v61 = vld [vmem:[%s9268_s8 + $0x270] sm:$0xff]  }
 0xa3a   : > { %4589 = vmatpush1.bf16.msra.mxu1 %v7300_v58  ;;  %4758 = vmatpush1.bf16.msra.mxu0 %v7301_v62  ;;  %v7336_v58 = vld [vmem:[%s9268_s8 + $0x278] sm:$0xff]  }
 0xa3b   : > { %4590 = vmatprep.subr.bf16.mxu1 %v7496_v18  ;;  %4759 = vmatprep.subr.bf16.mxu0 %v7496_v18 }
 0xa3e   : > { %4591 = vmatpush1.bf16.msra.mxu1 %v7302_v1  ;;  %4760 = vmatpush1.bf16.msra.mxu0 %v7303_v36 }
 0xa3f   : > { %4592 = vmatprep.subr.bf16.mxu1 %v7496_v18  ;;  %4761 = vmatprep.subr.bf16.mxu0 %v7496_v18 }
 0xa42   : > { %4593 = vmatpush1.bf16.msra.mxu1 %v7304_v2  ;;  %4762 = vmatpush1.bf16.msra.mxu0 %v7305_v41 }
 0xa43   : > { %4594 = vmatprep.subr.bf16.mxu1 %v7496_v18  ;;  %4763 = vmatprep.subr.bf16.mxu0 %v7496_v18 }
 0xa46   : > { %4595 = vmatpush1.bf16.msra.mxu1 %v7306_v3  ;;  %4764 = vmatpush1.bf16.msra.mxu0 %v7307_v4 }
 0xa47   : > { %4596 = vmatprep.subr.bf16.mxu1 %v7496_v18  ;;  %4765 = vmatprep.subr.bf16.mxu0 %v7496_v18 }
 0xa4a   : > { %4597 = vmatpush1.bf16.msra.mxu1 %v7308_v44  ;;  %4766 = vmatpush1.bf16.msra.mxu0 %v7309_v6 }
 0xa4b   : > { %4598 = vmatprep.subr.bf16.mxu1 %v7496_v18  ;;  %4767 = vmatprep.subr.bf16.mxu0 %v7496_v18 }
 0xa4e   : > { %4599 = vmatpush1.bf16.msra.mxu1 %v7310_v31  ;;  %4768 = vmatpush1.bf16.msra.mxu0 %v7311_v8 }
 0xa4f   : > { %4612 = vmatprep.subr.bf16.mxu1 %v7496_v18  ;;  %4769 = vmatprep.subr.bf16.mxu0 %v7496_v18 }
 0xa52   : > { %4613 = vmatpush2.bf16.msra.mxu1 %v7312_v9  ;;  %4770 = vmatpush1.bf16.msra.mxu0 %v7313_v11 }
 0xa53   : > { %4614 = vmatprep.subr.bf16.mxu1 %v7496_v18  ;;  %4771 = vmatprep.subr.bf16.mxu0 %v7496_v18 }
 0xa56   : > { %4615 = vmatpush2.bf16.msra.mxu1 %v7314_v16  ;;  %4772 = vmatpush1.bf16.msra.mxu0 %v7315_v14 }
 0xa57   : > { %6573 = vmatprep.subr.msk.bf16.mxu1 %vm3761_vm5, %v8666_v49  ;;  %4785 = vmatprep.subr.bf16.mxu0 %v7496_v18 }
 0xa5a   : > { %4786 = vmatpush2.bf16.msra.mxu0 %v7316_v15 }
 0xa5b   : > { %4787 = vmatprep.subr.bf16.mxu0 %v7496_v18 }
 0xa5e   : > { %4788 = vmatpush2.bf16.msra.mxu0 %v7317_v7 }
 0xa5f   : > { %6607 = vmatprep.subr.msk.bf16.mxu0 %vm3761_vm5, %v8666_v49 }
 0xae9   : > { %v4272_v17 = vpop.f32.mrf.mxu1 }
 0xaea   : > { %v4278_v19 = vadd.f32 %v4272_v17, %v8828_v45 }
 0xaeb   : > { %v4274_v20 = vpop.f32.mrf.mxu1 }
 0xaed   : > { %v4275_v21 = vpop.f32.mrf.mxu1 }
 0xaef   : > { %v4276_v22 = vpop.f32.mrf.mxu1 }
 0xaf0   : > { %v7338_v22 = vld [vmem:[%s9268_s8 + $0x2b8] sm:$0xff]  }
 0xaf1   : > { %v4445_v47 = vpop.f32.mrf.mxu0  ;;  %v4491_v26 = vpop.f32.mrf.mxu1 }
 0xaf2   : > { %v8929_v52 = vadd.f32 %v4445_v47, %v4278_v19  ;;  %v4498_v55 = vpack.c.bf16 %v4491_v26, %v4491_v26  ;;  %v6640_v19 = vld [vmem:[%s9267_s7 + $0x8] sm:$0x1]  ;;  %v7339_v26 = vld [vmem:[%s9268_s8 + $0x2b0] sm:$0xff]  }
 0xaf3   : > { %v4447_v28 = vpop.f32.mrf.mxu0  ;;  %v4493_v30 = vpop.f32.mrf.mxu1 }
 0xaf4   : > { %v4499_v32 = vpack.c.bf16 %v4493_v30, %v4493_v30  ;;  %v7343_v28 = vld [vmem:[%s9268_s8 + $0x300] sm:$0xff]  }
 0xaf5   : > { %v4448_v23 = vpop.f32.mrf.mxu0  ;;  %v4495_v34 = vpop.f32.mrf.mxu1  ;;  %v7342_v30 = vld [vmem:[%s9268_s8 + $0x2a0] sm:$0xff]  }
 0xaf6   : > { %6537 = vmatprep.mubr.msk.bf16.mxu1 %vm523_vm0, %v4499_v32  ;;  %v7345_v32 = vld [vmem:[%s9268_s8 + $0x2f8] sm:$0xff]   ;;  %v7347_v34 = vld [vmem:[%s9268_s8 + $0x2f0] sm:$0xff]  }
 0xaf7   : > { %v4449_v35 = vpop.f32.mrf.mxu0  ;;  %4617 = vmatmul.mubr.bf16.vlgmr.msra.gmra.mxu1 %v4498_v55  ;;  %v4496_v37 = vpop.f32.mrf.mxu1  ;;  %v7341_v55 = vld [vmem:[%s9268_s8 + $0x308] sm:$0xff]   ;;  %v7344_v23 = vld [vmem:[%s9268_s8 + $0x298] sm:$0xff]  }
 0xaf8   : > { %4818 = vmatpush1.bf16.msra.mxu1 %v8669_v51  ;;  %4835 = vmatprep.mubr.bf16.mxu1 %v7496_v18  ;;  %v7346_v35 = vld [vmem:[%s9268_s8 + $0x290] sm:$0xff]   ;;  %v7349_v37 = vld [vmem:[%s9268_s8 + $0x2e8] sm:$0xff]  }
 0xaf9   : > { %v4664_v39 = vpop.f32.mrf.mxu0  ;;  %4930 = vmatprep.subr.bf16.mxu1 %v7496_v18 }
 0xafa   : > { %v4671_v27 = vpack.c.bf16 %v4664_v39, %v4664_v39  ;;  %v7348_v39 = vld [vmem:[%s9268_s8 + $0x288] sm:$0xff]  }
 0xafb   : > { %v4666_v25 = vpop.f32.mrf.mxu0 }
 0xafc   : > { %v4672_v40 = vpack.c.bf16 %v4666_v25, %v4666_v25  ;;  %v7350_v25 = vld [vmem:[%s9268_s8 + $0x280] sm:$0xff]  }
 0xafd   : > { %v4668_v63 = vpop.f32.mrf.mxu0 }
 0xafe   : > { %6571 = vmatprep.mubr.msk.bf16.mxu0 %vm523_vm0, %v4672_v40  ;;  %v7351_v40 = vld [vmem:[%s9268_s8 + $0x2e0] sm:$0xff]   ;;  %v7355_v63 = vld [vmem:[%s9268_s8 + $0x2d0] sm:$0xff]  }
 0xaff   : > { %4790 = vmatmul.mubr.bf16.vlgmr.msra.gmra.mxu0 %v4671_v27  ;;  %6574 = vmatmul.mubr.msk.bf16.vlgmr.msra.gmra.mxu1 %vm3757_vm6, %v6572_v42  ;;  %v4669_v45 = vpop.f32.mrf.mxu0  ;;  %v7352_v42 = vld [vmem:[%s9268_s8 + $0x2c8] sm:$0xff]   ;;  %v7354_v27 = vld [vmem:[%s9268_s8 + $0x2c0] sm:$0xff]  }
 0xb00   : > { %4931 = vmatpush1.bf16.msra.mxu1 %v7318_v43  ;;  %4991 = vmatpush1.bf16.msra.mxu0 %v8669_v51  ;;  %v7353_v43 = vld [vmem:[%s9268_s8 + $0x2d8] sm:$0xff]  }
 0xb01   : > { %4932 = vmatprep.subr.bf16.mxu1 %v7496_v18  ;;  %5008 = vmatprep.mubr.bf16.mxu0 %v7496_v18  ;;  %v7356_v45 = vld [vmem:[%s9268_s8 + $0x318] sm:$0xff]  }
 0xb02   : > { %5103 = vmatprep.subr.bf16.mxu0 %v7496_v18 }
 0xb04   : > { %4933 = vmatpush1.bf16.msra.mxu1 %v7319_v29  ;;  %v7357_v29 = vld [vmem:[%s9268_s8 + $0x310] sm:$0xff]  }
 0xb05   : > { %4934 = vmatprep.subr.bf16.mxu1 %v7496_v18 }
 0xb07   : > { %6608 = vmatmul.mubr.msk.bf16.vlgmr.msra.gmra.mxu0 %vm3757_vm6, %v6606_v48 }
 0xb08   : > { %4935 = vmatpush1.bf16.msra.mxu1 %v7320_v46  ;;  %5104 = vmatpush1.bf16.msra.mxu0 %v7321_v12  ;;  %v7497_v46 = vmov 0.0  }
 0xb09   : > { %4936 = vmatprep.subr.bf16.mxu1 %v7496_v18  ;;  %5105 = vmatprep.subr.bf16.mxu0 %v7496_v18 }
 0xb0c   : > { %4937 = vmatpush1.bf16.msra.mxu1 %v7322_v13  ;;  %5106 = vmatpush1.bf16.msra.mxu0 %v7323_v50 }
 0xb0d   : > { %4938 = vmatprep.subr.bf16.mxu1 %v7496_v18  ;;  %5107 = vmatprep.subr.bf16.mxu0 %v7496_v18 }
 0xb10   : > { %4939 = vmatpush1.bf16.msra.mxu1 %v7324_v10  ;;  %5108 = vmatpush1.bf16.msra.mxu0 %v7325_v5 }
 0xb11   : > { %4940 = vmatprep.subr.bf16.mxu1 %v7496_v18  ;;  %5109 = vmatprep.subr.bf16.mxu0 %v7496_v18 }
 0xb14   : > { %4941 = vmatpush1.bf16.msra.mxu1 %v7326_v24  ;;  %5110 = vmatpush1.bf16.msra.mxu0 %v7327_v53 }
 0xb15   : > { %4942 = vmatprep.subr.bf16.mxu1 %v7496_v18  ;;  %5111 = vmatprep.subr.bf16.mxu0 %v7496_v18 }
 0xb18   : > { %4943 = vmatpush1.bf16.msra.mxu1 %v7328_v33  ;;  %5112 = vmatpush1.bf16.msra.mxu0 %v7329_v54 }
 0xb19   : > { %4944 = vmatprep.subr.bf16.mxu1 %v7496_v18  ;;  %5113 = vmatprep.subr.bf16.mxu0 %v7496_v18 }
 0xb1c   : > { %4945 = vmatpush1.bf16.msra.mxu1 %v7330_v56  ;;  %5114 = vmatpush1.bf16.msra.mxu0 %v7331_v57 }
 0xb1d   : > { %4958 = vmatprep.subr.bf16.mxu1 %v7496_v18  ;;  %5115 = vmatprep.subr.bf16.mxu0 %v7496_v18 }
 0xb20   : > { %4959 = vmatpush2.bf16.msra.mxu1 %v7332_v59  ;;  %5116 = vmatpush1.bf16.msra.mxu0 %v7333_v38 }
 0xb21   : > { %4960 = vmatprep.subr.bf16.mxu1 %v7496_v18  ;;  %5117 = vmatprep.subr.bf16.mxu0 %v7496_v18 }
 0xb24   : > { %4961 = vmatpush2.bf16.msra.mxu1 %v7334_v60  ;;  %5118 = vmatpush1.bf16.msra.mxu0 %v7335_v0 }
 0xb25   : > { %6641 = vmatprep.subr.msk.bf16.mxu1 %vm3761_vm5, %v8666_v49  ;;  %5131 = vmatprep.subr.bf16.mxu0 %v7496_v18 }
 0xb28   : > { %5132 = vmatpush2.bf16.msra.mxu0 %v7336_v58 }
 0xb29   : > { %5133 = vmatprep.subr.bf16.mxu0 %v7496_v18 }
 0xb2c   : > { %5134 = vmatpush2.bf16.msra.mxu0 %v7337_v61 }
 0xb2d   : > { %6675 = vmatprep.subr.msk.bf16.mxu0 %vm3761_vm5, %v8666_v49 }
 0xbb7   : > { %v4618_v62 = vpop.f32.mrf.mxu1 }
 0xbb8   : > { %v4624_v1 = vadd.f32 %v4618_v62, %v8929_v52  ;;  %v6674_v52 = vld [vmem:[%s9267_s7 + $0x9] sm:$0x1] }
 0xbb9   : > { %v4620_v36 = vpop.f32.mrf.mxu1 }
 0xbbb   : > { %v4621_v2 = vpop.f32.mrf.mxu1 }
 0xbbd   : > { %v4622_v41 = vpop.f32.mrf.mxu1 }
 0xbbf   : > { %v4791_v3 = vpop.f32.mrf.mxu0  ;;  %v4837_v4 = vpop.f32.mrf.mxu1 }
 0xbc0   : > { %v9030_v44 = vadd.f32 %v4791_v3, %v4624_v1  ;;  %v4844_v6 = vpack.c.bf16 %v4837_v4, %v4837_v4  ;;  %v7359_v3 = vld [vmem:[%s9270_s10 + $0x30] sm:$0xff]   ;;  %v7360_v4 = vld [vmem:[%s9270_s10 + $0x28] sm:$0xff]  }
 0xbc1   : > { %v4793_v31 = vpop.f32.mrf.mxu0  ;;  %v4839_v8 = vpop.f32.mrf.mxu1 }
 0xbc2   : > { %v4845_v9 = vpack.c.bf16 %v4839_v8, %v4839_v8  ;;  %v7363_v31 = vld [vmem:[%s9270_s10 + $0x10] sm:$0xff]   ;;  %v7364_v8 = vld [vmem:[%s9270_s10 + $0x8] sm:$0xff]  }
 0xbc3   : > { %v4794_v11 = vpop.f32.mrf.mxu0  ;;  %v4841_v16 = vpop.f32.mrf.mxu1 }
 0xbc4   : > { %6605 = vmatprep.mubr.msk.bf16.mxu1 %vm523_vm0, %v4845_v9  ;;  %v7365_v9 = vld [vmem:[%s9270_s10] sm:$0xff]   ;;  %v7366_v11 = vld [vmem:[%s9272_s12 + $0x28] ss:$0 sps:$4 sm:$0x33]  }
 0xbc5   : > { %v4795_v14 = vpop.f32.mrf.mxu0  ;;  %4963 = vmatmul.mubr.bf16.vlgmr.msra.gmra.mxu1 %v4844_v6  ;;  %v4842_v49 = vpop.f32.mrf.mxu1  ;;  %v7362_v6 = vld [vmem:[%s9270_s10 + $0x18] sm:$0xff]   ;;  %v5655_v16 = vsel %vm5653_vm8, %v7366_v11, 0 }
 0xbc6   : > { %5164 = vmatpush1.bf16.msra.mxu1 %v8669_v51  ;;  %5181 = vmatprep.mubr.bf16.mxu1 %v7496_v18 }
 0xbc7   : > { %v5010_v15 = vpop.f32.mrf.mxu0  ;;  %5276 = vmatprep.subr.bf16.mxu1 %v7496_v18 }
 0xbc8   : > { %v5017_v20 = vpack.c.bf16 %v5010_v15, %v5010_v15 }
 0xbc9   : > { %v5012_v7 = vpop.f32.mrf.mxu0 }
 0xbca   : > { %v5018_v17 = vpack.c.bf16 %v5012_v7, %v5012_v7 }
 0xbcb   : > { %v5014_v21 = vpop.f32.mrf.mxu0 }
 0xbcc   : > { %6639 = vmatprep.mubr.msk.bf16.mxu0 %vm523_vm0, %v5018_v17 }
 0xbcd   : > { %5136 = vmatmul.mubr.bf16.vlgmr.msra.gmra.mxu0 %v5017_v20  ;;  %6642 = vmatmul.mubr.msk.bf16.vlgmr.msra.gmra.mxu1 %vm3757_vm6, %v6640_v19  ;;  %v5015_v47 = vpop.f32.mrf.mxu0  ;;  %v5490_v20 = vld [vmem:[%s9269_s9] sm:$0x1] }
 0xbce   : > { %5337 = vmatpush1.bf16.msra.mxu0 %v8669_v51  ;;  %5354 = vmatprep.mubr.bf16.mxu0 %v7496_v18  ;;  %v7340_v51 = vld [vmem:[%s9268_s8 + $0x2a8] sm:$0xff]  }
 0xbcf   : > { %5277 = vmatpush1.bf16.msra.mxu1 %v7338_v22  ;;  %5449 = vmatprep.subr.bf16.mxu0 %v7496_v18 }
 0xbd0   : > { %5278 = vmatprep.subr.bf16.mxu1 %v7496_v18 }
 0xbd3   : > { %5279 = vmatpush1.bf16.msra.mxu1 %v7339_v26 }
 0xbd4   : > { %5280 = vmatprep.subr.bf16.mxu1 %v7496_v18 }
 0xbd5   : > { %6676 = vmatmul.mubr.msk.bf16.vlgmr.msra.gmra.mxu0 %vm3757_vm6, %v6674_v52 }
 0xbd6   : > { %5450 = vmatpush1.bf16.msra.mxu0 %v7341_v55 }
 0xbd7   : > { %5281 = vmatpush1.bf16.msra.mxu1 %v7340_v51  ;;  %5451 = vmatprep.subr.bf16.mxu0 %v7496_v18 }
 0xbd8   : > { %5282 = vmatprep.subr.bf16.mxu1 %v7496_v18 }
 0xbda   : > { %5452 = vmatpush1.bf16.msra.mxu0 %v7343_v28  ;;  %v7367_v28 = vld [vmem:[%s9272_s12 + $0x20] sm:$0xff]  }
 0xbdb   : > { %5283 = vmatpush1.bf16.msra.mxu1 %v7342_v30  ;;  %5453 = vmatprep.subr.bf16.mxu0 %v7496_v18  ;;  %v7368_v30 = vld [vmem:[%s9272_s12 + $0x18] sm:$0xff]  }
 0xbdc   : > { %5284 = vmatprep.subr.bf16.mxu1 %v7496_v18 }
 0xbde   : > { %5454 = vmatpush1.bf16.msra.mxu0 %v7345_v32  ;;  %v7369_v32 = vld [vmem:[%s9272_s12 + $0x10] sm:$0xff]  }
 0xbdf   : > { %5285 = vmatpush1.bf16.msra.mxu1 %v7344_v23  ;;  %5455 = vmatprep.subr.bf16.mxu0 %v7496_v18  ;;  %v7370_v23 = vld [vmem:[%s9272_s12 + $0x8] sm:$0xff]  }
 0xbe0   : > { %5286 = vmatprep.subr.bf16.mxu1 %v7496_v18 }
 0xbe2   : > { %5456 = vmatpush1.bf16.msra.mxu0 %v7347_v34  ;;  %v7371_v34 = vld [vmem:[%s9272_s12] sm:$0xff]  }
 0xbe3   : > { %5287 = vmatpush1.bf16.msra.mxu1 %v7346_v35  ;;  %5457 = vmatprep.subr.bf16.mxu0 %v7496_v18  ;;  %v5509_v35 = vld [vmem:[%s9271_s11] sm:$0x1] }
 0xbe4   : > { %5288 = vmatprep.subr.bf16.mxu1 %v7496_v18 }
 0xbe6   : > { %5458 = vmatpush1.bf16.msra.mxu0 %v7349_v37 }
 0xbe7   : > { %5289 = vmatpush1.bf16.msra.mxu1 %v7348_v39  ;;  %5459 = vmatprep.subr.bf16.mxu0 %v7496_v18 }
 0xbe8   : > { %5290 = vmatprep.subr.bf16.mxu1 %v7496_v18 }
 0xbea   : > { %5460 = vmatpush1.bf16.msra.mxu0 %v7351_v40 }
 0xbeb   : > { %5291 = vmatpush1.bf16.msra.mxu1 %v7350_v25  ;;  %5461 = vmatprep.subr.bf16.mxu0 %v7496_v18 }
 0xbec   : > { %5304 = vmatprep.subr.bf16.mxu1 %v7496_v18 }
 0xbee   : > { %5462 = vmatpush1.bf16.msra.mxu0 %v7353_v43 }
 0xbef   : > { %5305 = vmatpush2.bf16.msra.mxu1 %v7352_v42  ;;  %5463 = vmatprep.subr.bf16.mxu0 %v7496_v18 }
 0xbf0   : > { %5306 = vmatprep.subr.bf16.mxu1 %v7496_v18 }
 0xbf2   : > { %5464 = vmatpush1.bf16.msra.mxu0 %v7355_v63  ;;  %v5615_v63 = vld [vmem:[%s9273_s13] sm:$0x1] }
 0xbf3   : > { %5307 = vmatpush2.bf16.msra.mxu1 %v7354_v27  ;;  %5477 = vmatprep.subr.bf16.mxu0 %v7496_v18 }
 0xbf4   : > { %6805 = vmatprep.subr.bf16.mxu1 %v7497_v46 }
 0xbf6   : > { %5478 = vmatpush2.bf16.msra.mxu0 %v7356_v45 }
 0xbf7   : > { %5479 = vmatprep.subr.bf16.mxu0 %v7496_v18  ;;  %v7358_v18 = vld [vmem:[%s9270_s10 + $0x38] ss:$0 sps:$4 sm:$0xff]  }
 0xbf8   : > { %v5560_v60 = vsel %vm1615_vm1, %v7358_v18, 0 }
 0xbfa   : > { %5480 = vmatpush2.bf16.msra.mxu0 %v7357_v29 }
 0xbfb   : > { %6825 = vmatprep.subr.bf16.mxu0 %v7497_v46 }
 0xc85   : > { %v4964_v48 = vpop.f32.mrf.mxu1 }
 0xc86   : > { %v4970_v12 = vadd.f32 %v4964_v48, %v9030_v44  ;;  %v7361_v44 = vld [vmem:[%s9270_s10 + $0x20] sm:$0xff]  }
 0xc87   : > { %v4966_v13 = vpop.f32.mrf.mxu1 }
 0xc89   : > { %v4967_v50 = vpop.f32.mrf.mxu1 }
 0xc8b   : > { %v4968_v10 = vpop.f32.mrf.mxu1 }
 0xc8d   : > { %v5137_v5 = vpop.f32.mrf.mxu0  ;;  %v5183_v24 = vpop.f32.mrf.mxu1 }
 0xc8e   : > { %v5143_v53 = vadd.f32 %v5137_v5, %v4970_v12  ;;  %v5190_v33 = vpack.c.bf16 %v5183_v24, %v5183_v24 }
 0xc8f   : > { %v5139_v54 = vpop.f32.mrf.mxu0  ;;  %v5185_v56 = vpop.f32.mrf.mxu1 }
 0xc90   : > { %v5191_v57 = vpack.c.bf16 %v5185_v56, %v5185_v56 }
 0xc91   : > { %v5140_v59 = vpop.f32.mrf.mxu0  ;;  %v5187_v38 = vpop.f32.mrf.mxu1 }
 0xc92   : > { %6673 = vmatprep.mubr.msk.bf16.mxu1 %vm523_vm0, %v5191_v57 }
 0xc93   : > { %v5141_v0 = vpop.f32.mrf.mxu0  ;;  %5309 = vmatmul.mubr.bf16.vlgmr.msra.gmra.mxu1 %v5190_v33  ;;  %v5188_v58 = vpop.f32.mrf.mxu1 }
 0xc94   : > { %6806 = vmatpush3.bf16.msra.mxu1 %v5560_v60  ;;  %6821 = vmatprep.mubr.msk.bf16.mxu1 %vm7498_vm7, %v7497_v46 }
 0xc95   : > { %v5356_v61 = vpop.f32.mrf.mxu0  ;;  %6807 = vmatprep.subr.bf16.mxu1 %v7497_v46 }
 0xc96   : > { %v5363_v36 = vpack.c.bf16 %v5356_v61, %v5356_v61 }
 0xc97   : > { %v5358_v62 = vpop.f32.mrf.mxu0 }
 0xc98   : > { %v5364_v1 = vpack.c.bf16 %v5358_v62, %v5358_v62  ;;  %6808 = vmatpush3.bf16.msra.mxu1 %v7359_v3 }
 0xc99   : > { %v5360_v2 = vpop.f32.mrf.mxu0  ;;  %6809 = vmatprep.subr.bf16.mxu1 %v7497_v46 }
 0xc9a   : > { %6707 = vmatprep.mubr.msk.bf16.mxu0 %vm523_vm0, %v5364_v1 }
 0xc9b   : > { %5482 = vmatmul.mubr.bf16.vlgmr.msra.gmra.mxu0 %v5363_v36  ;;  %v5361_v41 = vpop.f32.mrf.mxu0 }
 0xc9c   : > { %6810 = vmatpush3.bf16.msra.mxu1 %v7360_v4  ;;  %6837 = vmatprep.mubr.msk.bf16.mxu0 %vm7498_vm7, %v7497_v46 }
 0xc9d   : > { %6811 = vmatprep.subr.bf16.mxu1 %v7497_v46  ;;  %6826 = vmatpush3.bf16.msra.mxu0 %v5655_v16 }
 0xc9e   : > { %6827 = vmatprep.subr.bf16.mxu0 %v7497_v46 }
 0xca0   : > { %6812 = vmatpush3.bf16.msra.mxu1 %v7361_v44 }
 0xca1   : > { %6813 = vmatprep.subr.bf16.mxu1 %v7497_v46  ;;  %6828 = vmatpush3.bf16.msra.mxu0 %v7367_v28 }
 0xca2   : > { %6829 = vmatprep.subr.bf16.mxu0 %v7497_v46 }
 0xca4   : > { %6814 = vmatpush3.bf16.msra.mxu1 %v7362_v6 }
 0xca5   : > { %6815 = vmatprep.subr.bf16.mxu1 %v7497_v46  ;;  %6830 = vmatpush3.bf16.msra.mxu0 %v7368_v30 }
 0xca6   : > { %6831 = vmatprep.subr.bf16.mxu0 %v7497_v46 }
 0xca8   : > { %6816 = vmatpush3.bf16.msra.mxu1 %v7363_v31 }
 0xca9   : > { %6817 = vmatprep.subr.bf16.mxu1 %v7497_v46  ;;  %6832 = vmatpush3.bf16.msra.mxu0 %v7369_v32 }
 0xcaa   : > { %6833 = vmatprep.subr.bf16.mxu0 %v7497_v46 }
 0xcac   : > { %6818 = vmatpush3.bf16.msra.mxu1 %v7364_v8 }
 0xcad   : > { %6819 = vmatprep.subr.bf16.mxu1 %v7497_v46  ;;  %6834 = vmatpush3.bf16.msra.mxu0 %v7370_v23 }
 0xcae   : > { %6835 = vmatprep.subr.bf16.mxu0 %v7497_v46 }
 0xcb0   : > { %6820 = vmatpush3.bf16.msra.mxu1 %v7365_v9 }
 0xcb1   : > { %6836 = vmatpush3.bf16.msra.mxu0 %v7371_v34 }
 0xd53   : > { %v5310_v14 = vpop.f32.mrf.mxu1 }
 0xd54   : > { %v5316_v17 = vadd.f32 %v5310_v14, %v5143_v53 }
 0xd55   : > { %v5312_v49 = vpop.f32.mrf.mxu1 }
 0xd57   : > { %v5313_v15 = vpop.f32.mrf.mxu1 }
 0xd59   : > { %v5314_v7 = vpop.f32.mrf.mxu1 }
 0xd5b   : > { %v5483_v19 = vpop.f32.mrf.mxu0 }
 0xd5c   : > { %v5489_v21 = vadd.f32 %v5483_v19, %v5316_v17 }
 0xd5d   : > { %v5485_v22 = vpop.f32.mrf.mxu0 }
 0xd5e   : > { %v5491_v47 = vadd.f32 %v5490_v20, %v5489_v21 }
 0xd5f   : > { %v5486_v26 = vpop.f32.mrf.mxu0 }
 0xd60   : > { %7396 = vtanh.f32 %v5491_v47 }
 0xd61   : > { %v5487_v52 = vpop.f32.mrf.mxu0 }
 0xd6d   : > { %v7397_v55 = vpop.eup %7396 }
 0xd6e   : > { %v5493_v51 = vpack.c.bf16 %v7397_v55, %v7397_v55 }
 0xd70   : > { %6822 = vmatmul.mubr.msk.bf16.vlgmr.msra.gmra.mxu1 %vm5555_vm9, %v5493_v51 }
 0xe30   : > { %v5596_v37 = vpop.f32.mrf.mxu1 }
 0xe31   : > { %v5597_v39 = vadd.f32 %v5596_v37, %v5509_v35 }
 0xe32   : > { %v6823_v25 = vpop.f32.mrf.mxu1 }
 0xe33   : > { %7398 = vtanh.f32 %v5597_v39 }
 0xe34   : > { %v5599_v40 = vpop.f32.mrf.mxu1 }
 0xe36   : > { %v6824_v42 = vpop.f32.mrf.mxu1 }
 0xe40   : > { %v7399_v43 = vpop.eup %7398 }
 0xe41   : > { %v5603_v27 = vpack.c.bf16 %v7399_v43, %v7399_v43 }
 0xe43   : > { %6838 = vmatmul.mubr.msk.bf16.vlgmr.msra.gmra.mxu0 %vm5649_vm10, %v5603_v27 }
 0xf03   : > { %v5691_v45 = vpop.f32.mrf.mxu0 }
 0xf04   : > { %v5692_v29 = vadd.f32 %v5691_v45, %v5615_v63 }
 0xf05   : > { %v6839_v46 = vpop.f32.mrf.mxu0 }
 0xf06   : > { %v5699_v48 = vsel %vm5697_vm11, %v5692_v29, -inf  ;;  %5698 = vst.msk [vmem:[%s490_s17] sm:$0x1] %vm5697_vm11, %v5692_v29 }
 0xf07   : > { %5700 = vmax.xlane.f32.xlu0 %v5699_v48  ;;  %v5694_v12 = vpop.f32.mrf.mxu0 }
 0xf09   : > { %v6840_v13 = vpop.f32.mrf.mxu0 }
 0xf90   : > { %v5701_v50 = vpop.xlane.xlu0 %5700 }
 0xf91   : > { %v5702_v10 = vsub.f32 %v5692_v29, %v5701_v50 }
 0xf93   : > { %v5703_v5 = vmul.f32 1.442695, %v5702_v10 }
 0xf95   : > { %7400 = vpow2.f32 %v5703_v5 }
 0xfa2   : > { %v7401_v24 = vpop.eup %7400 }
 0xfa3   : > { %v5705_v18 = vsel %vm5697_vm11, %v7401_v24, 0.0 }
 0xfa4   : > { %5706 = vadd.xlane.f32.xlu0 %v5705_v18 }
 0xfa5   : > { %7417 = shalt.err (!%p7414_p3)
}
 0xfa6   : > { %s7418_s3 = scalar_lea.hbm %s5726_s20, 16  ;;  %s7422_s26 = scalar_lea.hbm %s9274_s14, 32 }
 0xfa7   : > { %p7419_p4 = scmp.ne.s32.totalorder %s5726_s20, %s7418_s3  ;;  %p7423_p9 = scmp.lt.s32.totalorder %s5726_s20, %s9274_s14 }
 0xfa8   : > { %p7424_p10 = scmp.lt.s32.totalorder %s7422_s26, %s7418_s3 }
 0xfa9   : > { %p7420_p7 = pnand %p7419_p4, %p7619_p5 }
 0xfaa   : > { %p7425_p11 = por %p7424_p10, %p7423_p9 }
 0xfab   : > { %p7421_p8 = pneg %p7420_p7 }
 0xfad   : > { %p7426_p12 = pnand %p7425_p11, %p7421_p8 }
 0xfaf   : > { %7429 = shalt.err (!%p7426_p12)
}
 0xfb0   : > { %6841 = dma.vmem_to_hbm [thread:$0]  (%p7619_p5), %s5729_s0, 16, %s5726_s20, %s5712_s27  }
 0xfb1   : > { %s496_s1 = scalar_lea.vmem [#allocation4], %s9195_s30  ;;  %s9295_s24 = sshll.u32 %s7602_s22, 4 }
 0xfb2   : > { %s5741_s2 = sshll.u32 %s496_s1, 4  ;;  %s5739_s3 = scalar_lea.hbm %s9275_s15, %s9295_s24  ;;  %s5742_s2 = int_to_ptr.vmem [resolvable:$true] %s5741_s2 }
 0xfb3   : > { %s5716_s16 = scalar_lea.sflag [#allocation5], %s9195_s30  ;;  %s7430_s17 = scalar_lea.vmem %s5742_s2, 16 }
 0xfb4   : > { %p7431_p13 = scmp.ne.s32.totalorder %s5742_s2, %s7430_s17  ;;  %s7500_s20 = smov [#allocation4]  }
 0xfb5   : > { %s7434_s0 = sshll.u32 %s7500_s20, 4  ;;  %s7435_s0 = int_to_ptr.vmem [resolvable:$false] %s7434_s0 }
 0xfb6   : > { %p7432_p0 = pnand %p7431_p13, %p7619_p5  ;;  %s7436_s27 = scalar_lea.vmem %s7435_s0, 32 }
 0xfb7   : > { %p7437_p2 = scmp.lt.s32.totalorder %s5742_s2, %s7435_s0  ;;  %p7438_p3 = scmp.lt.s32.totalorder %s7436_s27, %s7430_s17 }
 0xfb8   : > { %p7433_p1 = pneg %p7432_p0 }
 0xfb9   : > { %p7439_p4 = por %p7438_p3, %p7437_p2 }
 0xfbb   : > { %p7440_p7 = pnand %p7439_p4, %p7433_p1 }
0x102d   : > { %v5707_v53 = vpop.xlane.xlu0 %5706 }
0x102e   : > { %7402 = vrcp.f32 %v5707_v53 }
0x103b   : > { %v7403_v33 = vpop.eup %7402 }
0x103c   : > { %v5709_v54 = vmul.f32 %v7403_v33, %v7401_v24 }
0x103e   : > { %5710 = vst.msk [vmem:[%s496_s1] sm:$0x1] %vm5697_vm11, %v5709_v54 }
0x103f   : > { %7443 = shalt.err (!%p7440_p7)
}
0x1040   : > { %s7444_s22 = scalar_lea.hbm %s5739_s3, 16  ;;  %s7448_s26 = scalar_lea.hbm %s9275_s15, 32 }
0x1041   : > { %p7445_p8 = scmp.ne.s32.totalorder %s5739_s3, %s7444_s22  ;;  %p7449_p11 = scmp.lt.s32.totalorder %s5739_s3, %s9275_s15 }
0x1042   : > { %p7450_p12 = scmp.lt.s32.totalorder %s7448_s26, %s7444_s22 }
0x1043   : > { %p7446_p9 = pnand %p7445_p8, %p7619_p5 }
0x1044   : > { %p7451_p13 = por %p7450_p12, %p7449_p11 }
0x1045   : > { %p7447_p10 = pneg %p7446_p9 }
0x1047   : > { %p7452_p0 = pnand %p7451_p13, %p7447_p10 }
0x1049   : > { %7455 = shalt.err (!%p7452_p0)
}
0x104a   : > { %6842 = dma.vmem_to_hbm [thread:$0]  (%p7619_p5), %s5742_s2, 16, %s5739_s3, %s5716_s16  }
0x104b PF: > { %p6852_p1 = scmp.ge.s32.totalorder %s7494_s21, 2  ;;  %s5753_s4 = sand.u32 1, %s7482_s18  }
0x104c   : > { %s5754_s23 = scalar_lea.sflag [#allocation3], %s5753_s4 }
0x104d   : > { %p6846_p2 = pnand %p6852_p1, %p7623_p6 }
0x104f   : > { %p6847_p3 = pneg %p6846_p2 }
0x1051   : > { %7473 = dma.done.wait (%p6847_p3), %s5754_s23, 16  }
0x1052   : > { %7475 = vsyncadd (%p6847_p3), %s5754_s23, 4294967280  ;;  %s5762_s17 = scalar_lea.sflag [#allocation5], %s5753_s4 }
0x1053   : > { %7477 = dma.done.wait (%p6847_p3), %s5762_s17, 16  }
0x1054   : > { %7479 = vsyncadd (%p6847_p3), %s5762_s17, 4294967280  ;;  %s9296_s21 = sld [smem:[#allocation9_spill]]  ;;  %s9299_s18 = smov %s7486_s19 }
0x1055   : > { %s9297_s20 = sld [smem:[#allocation8_spill]] }
0x1056   : > { %s9298_s28 = sld [smem:[#allocation10_spill]] }
0x105a   : > { %p29_p5 = scmp.ge.s32.totalorder %s9296_s21, 4  }
0x105b   : > { %s9300_s19 = smov %s9297_s20 }
0x105c   : > { %s9301_s20 = smov %s9298_s28  ;;  %31 = sbr.rel (!%p29_p5) target bundleno = 11 (0xb), region = 172 }
0x1061   :  { %5766 = vsyncpa [#allocation3], 1 }
0x1062   :  { %5768 = vsyncpa [#allocation3 + $0x1], 1 }
0x1063   :  { %5769 = vsyncpa [#allocation5], 1 }
0x1064   :  { %5771 = vsyncpa [#allocation5 + $0x1], 1 }

</bundles_post_ra>
